<compile_context>
chip_gen: v6e
topology: v6e:2x2x1
jax: 0.10.0
libtpu: 0.0.40
codegen_flags: <defaults>
</compile_context>

<pallas_src>
import functools

import jax
import jax.numpy as jnp
import numpy as np
from jax.experimental import pallas as pl
from jax.experimental.pallas import tpu as pltpu

_KSIZE = 7
_PAD = _KSIZE // 2


# ----------------------------------------------------------------------------
# Kernel
# ----------------------------------------------------------------------------
def _spatial_attention_kernel(w_ref, mask_ref, x_ref, o_ref, sum_acc, max_acc,
                              *, W):
    """One (batch-block, channel-block) grid step.

    w_ref    : (2*7*7,) f32 SMEM    conv weights, 1/C folded into channel 0
    mask_ref : (7, H*W) f32 VMEM    per-kw column-validity masks (width padding)
    x_ref    : (tile_n, tile_c, H*W) input block (lane-dense spatial axis)
    o_ref    : (tile_n, 1, H*W)     output block (written on the last c step)
    sum_acc  : (tile_n, 1, H*W) f32 running channel sum
    max_acc  : (tile_n, 1, H*W) f32 running channel max
    """
    c_idx = pl.program_id(1)
    tile_n, tile_c, HW = x_ref.shape

    @pl.when(c_idx == 0)
    def _init():
        sum_acc[...] = jnp.zeros_like(sum_acc)
        max_acc[...] = jnp.full_like(max_acc, -jnp.inf)

    # ---- lane-dense, vectorized channel reduction of this block -------------
    if tile_c <= 32:
        xs = x_ref[...].astype(jnp.float32)                    # (tn, tc, HW)
        psum = jnp.sum(xs, axis=1, keepdims=True)              # (tn, 1, HW)
        pmax = jnp.max(xs, axis=1, keepdims=True)
    else:
        # Chunked fori_loop bounds the live vreg set for large channel blocks.
        chunk = 32
        n_full, rem = divmod(tile_c, chunk)

        def body(i, carry):
            s, m = carry
            off = pl.multiple_of(i * chunk, chunk)
            blk = x_ref[:, pl.ds(off, chunk), :].astype(jnp.float32)
            return (s + jnp.sum(blk, axis=1, keepdims=True),
                    jnp.maximum(m, jnp.max(blk, axis=1, keepdims=True)))

        psum = jnp.zeros((tile_n, 1, HW), jnp.float32)
        pmax = jnp.full((tile_n, 1, HW), -jnp.inf, jnp.float32)
        psum, pmax = jax.lax.fori_loop(0, n_full, body, (psum, pmax), unroll=2)
        if rem:
            blk = x_ref[:, n_full * chunk:tile_c, :].astype(jnp.float32)
            psum = psum + jnp.sum(blk, axis=1, keepdims=True)
            pmax = jnp.maximum(pmax, jnp.max(blk, axis=1, keepdims=True))

    sum_acc[...] = sum_acc[...] + psum
    max_acc[...] = jnp.maximum(max_acc[...], pmax)

    # ---- last channel block: 7x7 conv (2 -> 1 ch) + sigmoid, once per image -
    @pl.when(c_idx == pl.num_programs(1) - 1)
    def _finalize():
        S = _PAD * W + _PAD                       # flat halo: 3*W + 3
        zpad = jnp.zeros((tile_n, 1, S), jnp.float32)
        # 1/C is folded into the avg-channel weights -> use the raw sum map.
        padded = (jnp.concatenate([zpad, sum_acc[...], zpad], axis=-1),
                  jnp.concatenate([zpad, max_acc[...], zpad], axis=-1))
        acc = jnp.zeros((tile_n, 1, HW), jnp.float32)
        for kw in range(_KSIZE):
            part = jnp.zeros((tile_n, 1, HW), jnp.float32)
            for ci in range(2):
                for kh in range(_KSIZE):
                    # flat shift (kh-3)*W + (kw-3), re-based by the halo S
                    start = kh * W + kw
                    tap = padded[ci][:, :, start:start + HW]
                    part = part + w_ref[ci * 49 + kh * 7 + kw] * tap
            # zero taps whose kw offset left the row (width zero-padding)
            acc = acc + part * mask_ref[kw:kw + 1, :]
        o_ref[...] = jax.nn.sigmoid(acc).astype(o_ref.dtype)


# ----------------------------------------------------------------------------
# Wrapper helpers
# ----------------------------------------------------------------------------
def _round_up(x, m):
    return (x + m - 1) // m * m


def _padded_bytes(shape, itemsize):
    """Approximate VMEM footprint honouring (8,128) tiling of the minor dims."""
    if len(shape) == 1:
        return _round_up(shape[0] * itemsize, 512)
    lead = 1
    for d in shape[:-2]:
        lead *= d
    sub = _round_up(shape[-2], max(8, 32 // itemsize))
    lane = _round_up(shape[-1], 128)
    return lead * sub * lane * itemsize


def _vmem_caps():
    """(scoped-VMEM cap, per-block budget); generation aware, v7x-safe fallback."""
    try:
        phys = int(pltpu.get_tpu_info().vmem_capacity_bytes)
    except Exception:
        phys = 64 << 20                       # assume the smallest (v7x: 64 MiB)
    cap = min(int(phys * 0.6), 48 << 20)      # ~38 MiB on v7x, 48 MiB on v5e/v6e
    return cap, min(8 << 20, cap // 4)


def _pick_tiles(N, C, HW, itemsize, block_budget):
    """Whole-image channel blocks when they fit; batch-block tiny images while
    keeping >= 2 batch grid steps so both v7x TensorCores stay busy."""
    def blk(tn, tc):
        return _padded_bytes((tn, tc, HW), itemsize)

    # Channel tile must keep the block's sublane dim full-C or 32-aligned.
    valid = [t for t in range(1, C + 1)
             if C % t == 0 and (t == C or t % 32 == 0)]
    fitting = [t for t in valid if blk(1, t) <= block_budget]
    tile_c = max(fitting) if fitting else min(valid)

    tile_n = 1
    if tile_c == C:
        cands = [t for t in range(1, N + 1)
                 if N % t == 0 and blk(t, C) <= block_budget
                 and (N // t >= 2 or N == 1)]
        if cands:
            tile_n = max(cands)
    return tile_n, tile_c


def spatial_attention_forward(w, x):
    """Pallas forward of SpatialAttention.  w: (1, 2, 7, 7), x: (N, C, H, W).

    x may be fp32 or bf16 (kept as-is in HBM; accumulation is fp32 in-kernel).
    """
    N, C, H, W = x.shape
    assert w.shape == (1, 2, _KSIZE, _KSIZE), w.shape
    HW = H * W

    # Weights: flat (2*7*7,) f32 table for SMEM; fold the 1/C mean scale into
    # the avg-channel taps so the kernel never rescales the running sum.
    w2 = w.astype(jnp.float32).reshape(2, _KSIZE * _KSIZE)
    w_flat = (w2 * jnp.array([[1.0 / C], [1.0]], jnp.float32)).reshape(-1)

    # Column-validity masks for the width zero-padding of the 7x7 conv,
    # expressed directly in the flat H*W lane domain.
    col = np.arange(HW) % W
    masks = np.stack([((col + kw - _PAD >= 0) & (col + kw - _PAD < W))
                      for kw in range(_KSIZE)]).astype(np.float32)   # (7, HW)
    masks = jnp.asarray(masks)

    cap, block_budget = _vmem_caps()
    tile_n, tile_c = _pick_tiles(N, C, HW, x.dtype.itemsize, block_budget)
    num_nt, num_ct = N // tile_n, C // tile_c

    kernel = functools.partial(_spatial_attention_kernel, W=W)

    # (8,128)-padded VMEM estimate with headroom (double-buffered blocks,
    # mask bank, fp32 accumulators, finalize temporaries).
    map_bytes = _padded_bytes((tile_n, 1, HW + 2 * (_PAD * W + _PAD)), 4)
    est = (2 * _padded_bytes((tile_n, tile_c, HW), x.dtype.itemsize)   # input
           + 2 * _padded_bytes((_KSIZE, HW), 4)                        # masks
           + 2 * _padded_bytes((tile_n, 1, HW), x.dtype.itemsize)      # output
           + 2 * _padded_bytes((tile_n, 1, HW), 4)                     # scratch
           + 16 * map_bytes                                            # conv tmp
           + (2 << 20))                                                # headroom
    vmem_limit = int(min(max(est, 16 << 20), cap))

    grid_spec = pltpu.PrefetchScalarGridSpec(
        num_scalar_prefetch=0,
        grid=(num_nt, num_ct),
        in_specs=[
            pl.BlockSpec(memory_space=pltpu.MemorySpace.SMEM),           # weights
            pl.BlockSpec((_KSIZE, HW), lambda n, c: (0, 0)),             # masks
            pl.BlockSpec((tile_n, tile_c, HW), lambda n, c: (n, c, 0)),  # x block
        ],
        out_specs=pl.BlockSpec((tile_n, 1, HW), lambda n, c: (n, 0, 0)),
        scratch_shapes=[pltpu.VMEM((tile_n, 1, HW), jnp.float32),
                        pltpu.VMEM((tile_n, 1, HW), jnp.float32)],
    )

    out_flat = pl.pallas_call(
        kernel,
        out_shape=jax.ShapeDtypeStruct((N, 1, HW), x.dtype),
        grid_spec=grid_spec,
        compiler_params=pltpu.CompilerParams(
            dimension_semantics=("parallel", "arbitrary"),
            vmem_limit_bytes=vmem_limit),
    )(w_flat, masks, x.reshape(N, C, HW))

    return out_flat.reshape(N, 1, H, W)


# ----------------------------------------------------------------------------
# Pure-JAX reference for verification
# ----------------------------------------------------------------------------
def spatial_attention_reference(w, x):
    avg = jnp.mean(x, axis=1, keepdims=True)
    mx = jnp.max(x, axis=1, keepdims=True)
    x1 = jnp.concatenate([avg, mx], axis=1)                  # (N, 2, H, W)
    y = jax.lax.conv_general_dilated(
        x1, w, window_strides=(1, 1),
        padding=((_PAD, _PAD), (_PAD, _PAD)),
        dimension_numbers=('NCHW', 'OIHW', 'NCHW'))
    return jax.nn.sigmoid(y)


if __name__ == "__main__":
    key = jax.random.PRNGKey(0)
    kx, kw = jax.random.split(key)
    N, C, H, W = 2, 4, 16, 16

    x = jax.random.normal(kx, (N, C, H, W), jnp.float32)
    w = 0.1 * jax.random.normal(kw, (1, 2, _KSIZE, _KSIZE), jnp.float32)

    out = jax.block_until_ready(spatial_attention_forward(w, x))
    ref = jax.block_until_ready(spatial_attention_reference(w, x))

    assert out.shape == (N, 1, H, W), out.shape
    np.testing.assert_allclose(np.asarray(out), np.asarray(ref),
                               atol=1e-5, rtol=1e-4)
    print("KERNEL_OK")
</pallas_src>

<mosaic_0001>
module attributes {stable_mosaic.version = 11 : i64} {
  func.func @_spatial_attention_kernel(%arg0: i32, %arg1: i32, %arg2: memref<98xf32, #tpu.memory_space<smem>>, %arg3: memref<7x256xf32, #tpu.memory_space<vmem>>, %arg4: memref<1x4x256xf32, #tpu.memory_space<vmem>>, %arg5: memref<1x1x256xf32, #tpu.memory_space<vmem>>, %arg6: memref<1x1x256xf32, #tpu.memory_space<vmem>>, %arg7: memref<1x1x256xf32, #tpu.memory_space<vmem>>) attributes {dimension_semantics = [#tpu.dimension_semantics<parallel>, #tpu.dimension_semantics<arbitrary>], iteration_bounds = array<i64: 2, 1>, scalar_prefetch = 0 : i64, scratch_operands = 2 : i64, tpu.core_type = #tpu.core_type<tc>, window_params = [{transform_indices = @transform_0, window_bounds = array<i64: 98>}, {pipeline_mode = #tpu.pipeline_mode<synchronous>, transform_indices = @transform_1, window_bounds = array<i64: 7, 256>}, {transform_indices = @transform_2, window_bounds = array<i64: 1, 4, 256>}, {transform_indices = @transform_3, window_bounds = array<i64: 1, 1, 256>}]} {
    %c0_i32 = arith.constant 0 : i32
    %0 = arith.cmpi eq, %arg1, %c0_i32 : i32
    %1 = arith.extui %0 : i1 to i32
    %c0_i32_0 = arith.constant 0 : i32
    %2 = arith.cmpi ne, %1, %c0_i32_0 : i32
    scf.if %2 {
      %cst_18 = arith.constant 0.000000e+00 : f32
      %17 = vector.broadcast %cst_18 : f32 to vector<1x1x256xf32>
      %c0_19 = arith.constant 0 : index
      %c0_20 = arith.constant 0 : index
      %c0_21 = arith.constant 0 : index
      %18 = vector.load %arg6[%c0_19, %c0_20, %c0_21] : memref<1x1x256xf32, #tpu.memory_space<vmem>>, vector<1x1x256xf32>
      tpu.vector_store %arg6[%c0_19, %c0_20, %c0_21], %17 {strides = array<i32>} : memref<1x1x256xf32, #tpu.memory_space<vmem>>, vector<1x1x256xf32>,
      %cst_22 = arith.constant 0xFF800000 : f32
      %19 = vector.broadcast %cst_22 : f32 to vector<1x1x256xf32>
      %c0_23 = arith.constant 0 : index
      %c0_24 = arith.constant 0 : index
      %c0_25 = arith.constant 0 : index
      %20 = vector.load %arg7[%c0_23, %c0_24, %c0_25] : memref<1x1x256xf32, #tpu.memory_space<vmem>>, vector<1x1x256xf32>
      tpu.vector_store %arg7[%c0_23, %c0_24, %c0_25], %19 {strides = array<i32>} : memref<1x1x256xf32, #tpu.memory_space<vmem>>, vector<1x1x256xf32>,
    } else {
    }
    %c0 = arith.constant 0 : index
    %c0_1 = arith.constant 0 : index
    %c0_2 = arith.constant 0 : index
    %3 = vector.load %arg4[%c0, %c0_1, %c0_2] : memref<1x4x256xf32, #tpu.memory_space<vmem>>, vector<1x4x256xf32>
    %cst = arith.constant dense<0.000000e+00> : vector<1x256xf32>
    %4 = vector.multi_reduction <add>, %3, %cst [1] : vector<1x4x256xf32> to vector<1x256xf32>
    %5 = vector.shape_cast %4 : vector<1x256xf32> to vector<1x1x256xf32>
    %cst_3 = arith.constant dense<0xFF800000> : vector<1x256xf32>
    %6 = vector.multi_reduction <maximumf>, %3, %cst_3 [1] : vector<1x4x256xf32> to vector<1x256xf32>
    %7 = vector.shape_cast %6 : vector<1x256xf32> to vector<1x1x256xf32>
    %c0_4 = arith.constant 0 : index
    %c0_5 = arith.constant 0 : index
    %c0_6 = arith.constant 0 : index
    %8 = vector.load %arg6[%c0_4, %c0_5, %c0_6] : memref<1x1x256xf32, #tpu.memory_space<vmem>>, vector<1x1x256xf32>
    %9 = arith.addf %8, %5 : vector<1x1x256xf32>
    %c0_7 = arith.constant 0 : index
    %c0_8 = arith.constant 0 : index
    %c0_9 = arith.constant 0 : index
    %10 = vector.load %arg6[%c0_7, %c0_8, %c0_9] : memref<1x1x256xf32, #tpu.memory_space<vmem>>, vector<1x1x256xf32>
    tpu.vector_store %arg6[%c0_7, %c0_8, %c0_9], %9 {strides = array<i32>} : memref<1x1x256xf32, #tpu.memory_space<vmem>>, vector<1x1x256xf32>,
    %c0_10 = arith.constant 0 : index
    %c0_11 = arith.constant 0 : index
    %c0_12 = arith.constant 0 : index
    %11 = vector.load %arg7[%c0_10, %c0_11, %c0_12] : memref<1x1x256xf32, #tpu.memory_space<vmem>>, vector<1x1x256xf32>
    %12 = arith.maximumf %11, %7 : vector<1x1x256xf32>
    %c0_13 = arith.constant 0 : index
    %c0_14 = arith.constant 0 : index
    %c0_15 = arith.constant 0 : index
    %13 = vector.load %arg7[%c0_13, %c0_14, %c0_15] : memref<1x1x256xf32, #tpu.memory_space<vmem>>, vector<1x1x256xf32>
    tpu.vector_store %arg7[%c0_13, %c0_14, %c0_15], %12 {strides = array<i32>} : memref<1x1x256xf32, #tpu.memory_space<vmem>>, vector<1x1x256xf32>,
    %c0_i32_16 = arith.constant 0 : i32
    %14 = arith.cmpi eq, %arg1, %c0_i32_16 : i32
    %15 = arith.extui %14 : i1 to i32
    %c0_i32_17 = arith.constant 0 : i32
    %16 = arith.cmpi ne, %15, %c0_i32_17 : i32
    scf.if %16 {
      %cst_18 = arith.constant 0.000000e+00 : f32
      %17 = vector.broadcast %cst_18 : f32 to vector<1x1x51xf32>
      %c0_19 = arith.constant 0 : index
      %c0_20 = arith.constant 0 : index
      %c0_21 = arith.constant 0 : index
      %18 = vector.load %arg6[%c0_19, %c0_20, %c0_21] : memref<1x1x256xf32, #tpu.memory_space<vmem>>, vector<1x1x256xf32>
      %19 = tpu.concatenate %17, %18, %17 in 2 : vector<1x1x51xf32>, vector<1x1x256xf32>, vector<1x1x51xf32> -> vector<1x1x358xf32>
      %c0_22 = arith.constant 0 : index
      %c0_23 = arith.constant 0 : index
      %c0_24 = arith.constant 0 : index
      %20 = vector.load %arg7[%c0_22, %c0_23, %c0_24] : memref<1x1x256xf32, #tpu.memory_space<vmem>>, vector<1x1x256xf32>
      %21 = tpu.concatenate %17, %20, %17 in 2 : vector<1x1x51xf32>, vector<1x1x256xf32>, vector<1x1x51xf32> -> vector<1x1x358xf32>
      %cst_25 = arith.constant 0.000000e+00 : f32
      %22 = vector.broadcast %cst_25 : f32 to vector<1x1x256xf32>
      %cst_26 = arith.constant 0.000000e+00 : f32
      %23 = vector.broadcast %cst_26 : f32 to vector<1x1x256xf32>
      %24 = vector.extract_strided_slice %19 {offsets = [0, 0, 0], sizes = [1, 1, 256], strides = [1, 1, 1]} : vector<1x1x358xf32> to vector<1x1x256xf32>
      %c0_27 = arith.constant 0 : index
      %25 = memref.load %arg2[%c0_27] : memref<98xf32, #tpu.memory_space<smem>>
      %26 = vector.broadcast %25 : f32 to vector<1x1x256xf32>
      %27 = arith.mulf %26, %24 : vector<1x1x256xf32>
      %28 = arith.addf %23, %27 : vector<1x1x256xf32>
      %29 = vector.extract_strided_slice %19 {offsets = [0, 0, 16], sizes = [1, 1, 256], strides = [1, 1, 1]} : vector<1x1x358xf32> to vector<1x1x256xf32>
      %c7 = arith.constant 7 : index
      %30 = memref.load %arg2[%c7] : memref<98xf32, #tpu.memory_space<smem>>
      %31 = vector.broadcast %30 : f32 to vector<1x1x256xf32>
      %32 = arith.mulf %31, %29 : vector<1x1x256xf32>
      %33 = arith.addf %28, %32 : vector<1x1x256xf32>
      %34 = vector.extract_strided_slice %19 {offsets = [0, 0, 32], sizes = [1, 1, 256], strides = [1, 1, 1]} : vector<1x1x358xf32> to vector<1x1x256xf32>
      %c14 = arith.constant 14 : index
      %35 = memref.load %arg2[%c14] : memref<98xf32, #tpu.memory_space<smem>>
      %36 = vector.broadcast %35 : f32 to vector<1x1x256xf32>
      %37 = arith.mulf %36, %34 : vector<1x1x256xf32>
      %38 = arith.addf %33, %37 : vector<1x1x256xf32>
      %39 = vector.extract_strided_slice %19 {offsets = [0, 0, 48], sizes = [1, 1, 256], strides = [1, 1, 1]} : vector<1x1x358xf32> to vector<1x1x256xf32>
      %c21 = arith.constant 21 : index
      %40 = memref.load %arg2[%c21] : memref<98xf32, #tpu.memory_space<smem>>
      %41 = vector.broadcast %40 : f32 to vector<1x1x256xf32>
      %42 = arith.mulf %41, %39 : vector<1x1x256xf32>
      %43 = arith.addf %38, %42 : vector<1x1x256xf32>
      %44 = vector.extract_strided_slice %19 {offsets = [0, 0, 64], sizes = [1, 1, 256], strides = [1, 1, 1]} : vector<1x1x358xf32> to vector<1x1x256xf32>
      %c28 = arith.constant 28 : index
      %45 = memref.load %arg2[%c28] : memref<98xf32, #tpu.memory_space<smem>>
      %46 = vector.broadcast %45 : f32 to vector<1x1x256xf32>
      %47 = arith.mulf %46, %44 : vector<1x1x256xf32>
      %48 = arith.addf %43, %47 : vector<1x1x256xf32>
      %49 = vector.extract_strided_slice %19 {offsets = [0, 0, 80], sizes = [1, 1, 256], strides = [1, 1, 1]} : vector<1x1x358xf32> to vector<1x1x256xf32>
      %c35 = arith.constant 35 : index
      %50 = memref.load %arg2[%c35] : memref<98xf32, #tpu.memory_space<smem>>
      %51 = vector.broadcast %50 : f32 to vector<1x1x256xf32>
      %52 = arith.mulf %51, %49 : vector<1x1x256xf32>
      %53 = arith.addf %48, %52 : vector<1x1x256xf32>
      %54 = vector.extract_strided_slice %19 {offsets = [0, 0, 96], sizes = [1, 1, 256], strides = [1, 1, 1]} : vector<1x1x358xf32> to vector<1x1x256xf32>
      %c42 = arith.constant 42 : index
      %55 = memref.load %arg2[%c42] : memref<98xf32, #tpu.memory_space<smem>>
      %56 = vector.broadcast %55 : f32 to vector<1x1x256xf32>
      %57 = arith.mulf %56, %54 : vector<1x1x256xf32>
      %58 = arith.addf %53, %57 : vector<1x1x256xf32>
      %59 = vector.extract_strided_slice %21 {offsets = [0, 0, 0], sizes = [1, 1, 256], strides = [1, 1, 1]} : vector<1x1x358xf32> to vector<1x1x256xf32>
      %c49 = arith.constant 49 : index
      %60 = memref.load %arg2[%c49] : memref<98xf32, #tpu.memory_space<smem>>
      %61 = vector.broadcast %60 : f32 to vector<1x1x256xf32>
      %62 = arith.mulf %61, %59 : vector<1x1x256xf32>
      %63 = arith.addf %58, %62 : vector<1x1x256xf32>
      %64 = vector.extract_strided_slice %21 {offsets = [0, 0, 16], sizes = [1, 1, 256], strides = [1, 1, 1]} : vector<1x1x358xf32> to vector<1x1x256xf32>
      %c56 = arith.constant 56 : index
      %65 = memref.load %arg2[%c56] : memref<98xf32, #tpu.memory_space<smem>>
      %66 = vector.broadcast %65 : f32 to vector<1x1x256xf32>
      %67 = arith.mulf %66, %64 : vector<1x1x256xf32>
      %68 = arith.addf %63, %67 : vector<1x1x256xf32>
      %69 = vector.extract_strided_slice %21 {offsets = [0, 0, 32], sizes = [1, 1, 256], strides = [1, 1, 1]} : vector<1x1x358xf32> to vector<1x1x256xf32>
      %c63 = arith.constant 63 : index
      %70 = memref.load %arg2[%c63] : memref<98xf32, #tpu.memory_space<smem>>
      %71 = vector.broadcast %70 : f32 to vector<1x1x256xf32>
      %72 = arith.mulf %71, %69 : vector<1x1x256xf32>
      %73 = arith.addf %68, %72 : vector<1x1x256xf32>
      %74 = vector.extract_strided_slice %21 {offsets = [0, 0, 48], sizes = [1, 1, 256], strides = [1, 1, 1]} : vector<1x1x358xf32> to vector<1x1x256xf32>
      %c70 = arith.constant 70 : index
      %75 = memref.load %arg2[%c70] : memref<98xf32, #tpu.memory_space<smem>>
      %76 = vector.broadcast %75 : f32 to vector<1x1x256xf32>
      %77 = arith.mulf %76, %74 : vector<1x1x256xf32>
      %78 = arith.addf %73, %77 : vector<1x1x256xf32>
      %79 = vector.extract_strided_slice %21 {offsets = [0, 0, 64], sizes = [1, 1, 256], strides = [1, 1, 1]} : vector<1x1x358xf32> to vector<1x1x256xf32>
      %c77 = arith.constant 77 : index
      %80 = memref.load %arg2[%c77] : memref<98xf32, #tpu.memory_space<smem>>
      %81 = vector.broadcast %80 : f32 to vector<1x1x256xf32>
      %82 = arith.mulf %81, %79 : vector<1x1x256xf32>
      %83 = arith.addf %78, %82 : vector<1x1x256xf32>
      %84 = vector.extract_strided_slice %21 {offsets = [0, 0, 80], sizes = [1, 1, 256], strides = [1, 1, 1]} : vector<1x1x358xf32> to vector<1x1x256xf32>
      %c84 = arith.constant 84 : index
      %85 = memref.load %arg2[%c84] : memref<98xf32, #tpu.memory_space<smem>>
      %86 = vector.broadcast %85 : f32 to vector<1x1x256xf32>
      %87 = arith.mulf %86, %84 : vector<1x1x256xf32>
      %88 = arith.addf %83, %87 : vector<1x1x256xf32>
      %89 = vector.extract_strided_slice %21 {offsets = [0, 0, 96], sizes = [1, 1, 256], strides = [1, 1, 1]} : vector<1x1x358xf32> to vector<1x1x256xf32>
      %c91 = arith.constant 91 : index
      %90 = memref.load %arg2[%c91] : memref<98xf32, #tpu.memory_space<smem>>
      %91 = vector.broadcast %90 : f32 to vector<1x1x256xf32>
      %92 = arith.mulf %91, %89 : vector<1x1x256xf32>
      %93 = arith.addf %88, %92 : vector<1x1x256xf32>
      %c0_28 = arith.constant 0 : index
      %c0_29 = arith.constant 0 : index
      %94 = vector.load %arg3[%c0_28, %c0_29] : memref<7x256xf32, #tpu.memory_space<vmem>>, vector<1x256xf32>
      %95 = vector.shape_cast %94 : vector<1x256xf32> to vector<1x1x256xf32>
      %96 = arith.mulf %93, %95 : vector<1x1x256xf32>
      %97 = arith.addf %22, %96 : vector<1x1x256xf32>
      %cst_30 = arith.constant 0.000000e+00 : f32
      %98 = vector.broadcast %cst_30 : f32 to vector<1x1x256xf32>
      %99 = vector.extract_strided_slice %19 {offsets = [0, 0, 1], sizes = [1, 1, 256], strides = [1, 1, 1]} : vector<1x1x358xf32> to vector<1x1x256xf32>
      %c1 = arith.constant 1 : index
      %100 = memref.load %arg2[%c1] : memref<98xf32, #tpu.memory_space<smem>>
      %101 = vector.broadcast %100 : f32 to vector<1x1x256xf32>
      %102 = arith.mulf %101, %99 : vector<1x1x256xf32>
      %103 = arith.addf %98, %102 : vector<1x1x256xf32>
      %104 = vector.extract_strided_slice %19 {offsets = [0, 0, 17], sizes = [1, 1, 256], strides = [1, 1, 1]} : vector<1x1x358xf32> to vector<1x1x256xf32>
      %c8 = arith.constant 8 : index
      %105 = memref.load %arg2[%c8] : memref<98xf32, #tpu.memory_space<smem>>
      %106 = vector.broadcast %105 : f32 to vector<1x1x256xf32>
      %107 = arith.mulf %106, %104 : vector<1x1x256xf32>
      %108 = arith.addf %103, %107 : vector<1x1x256xf32>
      %109 = vector.extract_strided_slice %19 {offsets = [0, 0, 33], sizes = [1, 1, 256], strides = [1, 1, 1]} : vector<1x1x358xf32> to vector<1x1x256xf32>
      %c15 = arith.constant 15 : index
      %110 = memref.load %arg2[%c15] : memref<98xf32, #tpu.memory_space<smem>>
      %111 = vector.broadcast %110 : f32 to vector<1x1x256xf32>
      %112 = arith.mulf %111, %109 : vector<1x1x256xf32>
      %113 = arith.addf %108, %112 : vector<1x1x256xf32>
      %114 = vector.extract_strided_slice %19 {offsets = [0, 0, 49], sizes = [1, 1, 256], strides = [1, 1, 1]} : vector<1x1x358xf32> to vector<1x1x256xf32>
      %c22 = arith.constant 22 : index
      %115 = memref.load %arg2[%c22] : memref<98xf32, #tpu.memory_space<smem>>
      %116 = vector.broadcast %115 : f32 to vector<1x1x256xf32>
      %117 = arith.mulf %116, %114 : vector<1x1x256xf32>
      %118 = arith.addf %113, %117 : vector<1x1x256xf32>
      %119 = vector.extract_strided_slice %19 {offsets = [0, 0, 65], sizes = [1, 1, 256], strides = [1, 1, 1]} : vector<1x1x358xf32> to vector<1x1x256xf32>
      %c29 = arith.constant 29 : index
      %120 = memref.load %arg2[%c29] : memref<98xf32, #tpu.memory_space<smem>>
      %121 = vector.broadcast %120 : f32 to vector<1x1x256xf32>
      %122 = arith.mulf %121, %119 : vector<1x1x256xf32>
      %123 = arith.addf %118, %122 : vector<1x1x256xf32>
      %124 = vector.extract_strided_slice %19 {offsets = [0, 0, 81], sizes = [1, 1, 256], strides = [1, 1, 1]} : vector<1x1x358xf32> to vector<1x1x256xf32>
      %c36 = arith.constant 36 : index
      %125 = memref.load %arg2[%c36] : memref<98xf32, #tpu.memory_space<smem>>
      %126 = vector.broadcast %125 : f32 to vector<1x1x256xf32>
      %127 = arith.mulf %126, %124 : vector<1x1x256xf32>
      %128 = arith.addf %123, %127 : vector<1x1x256xf32>
      %129 = vector.extract_strided_slice %19 {offsets = [0, 0, 97], sizes = [1, 1, 256], strides = [1, 1, 1]} : vector<1x1x358xf32> to vector<1x1x256xf32>
      %c43 = arith.constant 43 : index
      %130 = memref.load %arg2[%c43] : memref<98xf32, #tpu.memory_space<smem>>
      %131 = vector.broadcast %130 : f32 to vector<1x1x256xf32>
      %132 = arith.mulf %131, %129 : vector<1x1x256xf32>
      %133 = arith.addf %128, %132 : vector<1x1x256xf32>
      %134 = vector.extract_strided_slice %21 {offsets = [0, 0, 1], sizes = [1, 1, 256], strides = [1, 1, 1]} : vector<1x1x358xf32> to vector<1x1x256xf32>
      %c50 = arith.constant 50 : index
      %135 = memref.load %arg2[%c50] : memref<98xf32, #tpu.memory_space<smem>>
      %136 = vector.broadcast %135 : f32 to vector<1x1x256xf32>
      %137 = arith.mulf %136, %134 : vector<1x1x256xf32>
      %138 = arith.addf %133, %137 : vector<1x1x256xf32>
      %139 = vector.extract_strided_slice %21 {offsets = [0, 0, 17], sizes = [1, 1, 256], strides = [1, 1, 1]} : vector<1x1x358xf32> to vector<1x1x256xf32>
      %c57 = arith.constant 57 : index
      %140 = memref.load %arg2[%c57] : memref<98xf32, #tpu.memory_space<smem>>
      %141 = vector.broadcast %140 : f32 to vector<1x1x256xf32>
      %142 = arith.mulf %141, %139 : vector<1x1x256xf32>
      %143 = arith.addf %138, %142 : vector<1x1x256xf32>
      %144 = vector.extract_strided_slice %21 {offsets = [0, 0, 33], sizes = [1, 1, 256], strides = [1, 1, 1]} : vector<1x1x358xf32> to vector<1x1x256xf32>
      %c64 = arith.constant 64 : index
      %145 = memref.load %arg2[%c64] : memref<98xf32, #tpu.memory_space<smem>>
      %146 = vector.broadcast %145 : f32 to vector<1x1x256xf32>
      %147 = arith.mulf %146, %144 : vector<1x1x256xf32>
      %148 = arith.addf %143, %147 : vector<1x1x256xf32>
      %149 = vector.extract_strided_slice %21 {offsets = [0, 0, 49], sizes = [1, 1, 256], strides = [1, 1, 1]} : vector<1x1x358xf32> to vector<1x1x256xf32>
      %c71 = arith.constant 71 : index
      %150 = memref.load %arg2[%c71] : memref<98xf32, #tpu.memory_space<smem>>
      %151 = vector.broadcast %150 : f32 to vector<1x1x256xf32>
      %152 = arith.mulf %151, %149 : vector<1x1x256xf32>
      %153 = arith.addf %148, %152 : vector<1x1x256xf32>
      %154 = vector.extract_strided_slice %21 {offsets = [0, 0, 65], sizes = [1, 1, 256], strides = [1, 1, 1]} : vector<1x1x358xf32> to vector<1x1x256xf32>
      %c78 = arith.constant 78 : index
      %155 = memref.load %arg2[%c78] : memref<98xf32, #tpu.memory_space<smem>>
      %156 = vector.broadcast %155 : f32 to vector<1x1x256xf32>
      %157 = arith.mulf %156, %154 : vector<1x1x256xf32>
      %158 = arith.addf %153, %157 : vector<1x1x256xf32>
      %159 = vector.extract_strided_slice %21 {offsets = [0, 0, 81], sizes = [1, 1, 256], strides = [1, 1, 1]} : vector<1x1x358xf32> to vector<1x1x256xf32>
      %c85 = arith.constant 85 : index
      %160 = memref.load %arg2[%c85] : memref<98xf32, #tpu.memory_space<smem>>
      %161 = vector.broadcast %160 : f32 to vector<1x1x256xf32>
      %162 = arith.mulf %161, %159 : vector<1x1x256xf32>
      %163 = arith.addf %158, %162 : vector<1x1x256xf32>
      %164 = vector.extract_strided_slice %21 {offsets = [0, 0, 97], sizes = [1, 1, 256], strides = [1, 1, 1]} : vector<1x1x358xf32> to vector<1x1x256xf32>
      %c92 = arith.constant 92 : index
      %165 = memref.load %arg2[%c92] : memref<98xf32, #tpu.memory_space<smem>>
      %166 = vector.broadcast %165 : f32 to vector<1x1x256xf32>
      %167 = arith.mulf %166, %164 : vector<1x1x256xf32>
      %168 = arith.addf %163, %167 : vector<1x1x256xf32>
      %c1_31 = arith.constant 1 : index
      %c0_32 = arith.constant 0 : index
      %169 = vector.load %arg3[%c1_31, %c0_32] : memref<7x256xf32, #tpu.memory_space<vmem>>, vector<1x256xf32>
      %170 = vector.shape_cast %169 : vector<1x256xf32> to vector<1x1x256xf32>
      %171 = arith.mulf %168, %170 : vector<1x1x256xf32>
      %172 = arith.addf %97, %171 : vector<1x1x256xf32>
      %cst_33 = arith.constant 0.000000e+00 : f32
      %173 = vector.broadcast %cst_33 : f32 to vector<1x1x256xf32>
      %174 = vector.extract_strided_slice %19 {offsets = [0, 0, 2], sizes = [1, 1, 256], strides = [1, 1, 1]} : vector<1x1x358xf32> to vector<1x1x256xf32>
      %c2 = arith.constant 2 : index
      %175 = memref.load %arg2[%c2] : memref<98xf32, #tpu.memory_space<smem>>
      %176 = vector.broadcast %175 : f32 to vector<1x1x256xf32>
      %177 = arith.mulf %176, %174 : vector<1x1x256xf32>
      %178 = arith.addf %173, %177 : vector<1x1x256xf32>
      %179 = vector.extract_strided_slice %19 {offsets = [0, 0, 18], sizes = [1, 1, 256], strides = [1, 1, 1]} : vector<1x1x358xf32> to vector<1x1x256xf32>
      %c9 = arith.constant 9 : index
      %180 = memref.load %arg2[%c9] : memref<98xf32, #tpu.memory_space<smem>>
      %181 = vector.broadcast %180 : f32 to vector<1x1x256xf32>
      %182 = arith.mulf %181, %179 : vector<1x1x256xf32>
      %183 = arith.addf %178, %182 : vector<1x1x256xf32>
      %184 = vector.extract_strided_slice %19 {offsets = [0, 0, 34], sizes = [1, 1, 256], strides = [1, 1, 1]} : vector<1x1x358xf32> to vector<1x1x256xf32>
      %c16 = arith.constant 16 : index
      %185 = memref.load %arg2[%c16] : memref<98xf32, #tpu.memory_space<smem>>
      %186 = vector.broadcast %185 : f32 to vector<1x1x256xf32>
      %187 = arith.mulf %186, %184 : vector<1x1x256xf32>
      %188 = arith.addf %183, %187 : vector<1x1x256xf32>
      %189 = vector.extract_strided_slice %19 {offsets = [0, 0, 50], sizes = [1, 1, 256], strides = [1, 1, 1]} : vector<1x1x358xf32> to vector<1x1x256xf32>
      %c23 = arith.constant 23 : index
      %190 = memref.load %arg2[%c23] : memref<98xf32, #tpu.memory_space<smem>>
      %191 = vector.broadcast %190 : f32 to vector<1x1x256xf32>
      %192 = arith.mulf %191, %189 : vector<1x1x256xf32>
      %193 = arith.addf %188, %192 : vector<1x1x256xf32>
      %194 = vector.extract_strided_slice %19 {offsets = [0, 0, 66], sizes = [1, 1, 256], strides = [1, 1, 1]} : vector<1x1x358xf32> to vector<1x1x256xf32>
      %c30 = arith.constant 30 : index
      %195 = memref.load %arg2[%c30] : memref<98xf32, #tpu.memory_space<smem>>
      %196 = vector.broadcast %195 : f32 to vector<1x1x256xf32>
      %197 = arith.mulf %196, %194 : vector<1x1x256xf32>
      %198 = arith.addf %193, %197 : vector<1x1x256xf32>
      %199 = vector.extract_strided_slice %19 {offsets = [0, 0, 82], sizes = [1, 1, 256], strides = [1, 1, 1]} : vector<1x1x358xf32> to vector<1x1x256xf32>
      %c37 = arith.constant 37 : index
      %200 = memref.load %arg2[%c37] : memref<98xf32, #tpu.memory_space<smem>>
      %201 = vector.broadcast %200 : f32 to vector<1x1x256xf32>
      %202 = arith.mulf %201, %199 : vector<1x1x256xf32>
      %203 = arith.addf %198, %202 : vector<1x1x256xf32>
      %204 = vector.extract_strided_slice %19 {offsets = [0, 0, 98], sizes = [1, 1, 256], strides = [1, 1, 1]} : vector<1x1x358xf32> to vector<1x1x256xf32>
      %c44 = arith.constant 44 : index
      %205 = memref.load %arg2[%c44] : memref<98xf32, #tpu.memory_space<smem>>
      %206 = vector.broadcast %205 : f32 to vector<1x1x256xf32>
      %207 = arith.mulf %206, %204 : vector<1x1x256xf32>
      %208 = arith.addf %203, %207 : vector<1x1x256xf32>
      %209 = vector.extract_strided_slice %21 {offsets = [0, 0, 2], sizes = [1, 1, 256], strides = [1, 1, 1]} : vector<1x1x358xf32> to vector<1x1x256xf32>
      %c51 = arith.constant 51 : index
      %210 = memref.load %arg2[%c51] : memref<98xf32, #tpu.memory_space<smem>>
      %211 = vector.broadcast %210 : f32 to vector<1x1x256xf32>
      %212 = arith.mulf %211, %209 : vector<1x1x256xf32>
      %213 = arith.addf %208, %212 : vector<1x1x256xf32>
      %214 = vector.extract_strided_slice %21 {offsets = [0, 0, 18], sizes = [1, 1, 256], strides = [1, 1, 1]} : vector<1x1x358xf32> to vector<1x1x256xf32>
      %c58 = arith.constant 58 : index
      %215 = memref.load %arg2[%c58] : memref<98xf32, #tpu.memory_space<smem>>
      %216 = vector.broadcast %215 : f32 to vector<1x1x256xf32>
      %217 = arith.mulf %216, %214 : vector<1x1x256xf32>
      %218 = arith.addf %213, %217 : vector<1x1x256xf32>
      %219 = vector.extract_strided_slice %21 {offsets = [0, 0, 34], sizes = [1, 1, 256], strides = [1, 1, 1]} : vector<1x1x358xf32> to vector<1x1x256xf32>
      %c65 = arith.constant 65 : index
      %220 = memref.load %arg2[%c65] : memref<98xf32, #tpu.memory_space<smem>>
      %221 = vector.broadcast %220 : f32 to vector<1x1x256xf32>
      %222 = arith.mulf %221, %219 : vector<1x1x256xf32>
      %223 = arith.addf %218, %222 : vector<1x1x256xf32>
      %224 = vector.extract_strided_slice %21 {offsets = [0, 0, 50], sizes = [1, 1, 256], strides = [1, 1, 1]} : vector<1x1x358xf32> to vector<1x1x256xf32>
      %c72 = arith.constant 72 : index
      %225 = memref.load %arg2[%c72] : memref<98xf32, #tpu.memory_space<smem>>
      %226 = vector.broadcast %225 : f32 to vector<1x1x256xf32>
      %227 = arith.mulf %226, %224 : vector<1x1x256xf32>
      %228 = arith.addf %223, %227 : vector<1x1x256xf32>
      %229 = vector.extract_strided_slice %21 {offsets = [0, 0, 66], sizes = [1, 1, 256], strides = [1, 1, 1]} : vector<1x1x358xf32> to vector<1x1x256xf32>
      %c79 = arith.constant 79 : index
      %230 = memref.load %arg2[%c79] : memref<98xf32, #tpu.memory_space<smem>>
      %231 = vector.broadcast %230 : f32 to vector<1x1x256xf32>
      %232 = arith.mulf %231, %229 : vector<1x1x256xf32>
      %233 = arith.addf %228, %232 : vector<1x1x256xf32>
      %234 = vector.extract_strided_slice %21 {offsets = [0, 0, 82], sizes = [1, 1, 256], strides = [1, 1, 1]} : vector<1x1x358xf32> to vector<1x1x256xf32>
      %c86 = arith.constant 86 : index
      %235 = memref.load %arg2[%c86] : memref<98xf32, #tpu.memory_space<smem>>
      %236 = vector.broadcast %235 : f32 to vector<1x1x256xf32>
      %237 = arith.mulf %236, %234 : vector<1x1x256xf32>
      %238 = arith.addf %233, %237 : vector<1x1x256xf32>
      %239 = vector.extract_strided_slice %21 {offsets = [0, 0, 98], sizes = [1, 1, 256], strides = [1, 1, 1]} : vector<1x1x358xf32> to vector<1x1x256xf32>
      %c93 = arith.constant 93 : index
      %240 = memref.load %arg2[%c93] : memref<98xf32, #tpu.memory_space<smem>>
      %241 = vector.broadcast %240 : f32 to vector<1x1x256xf32>
      %242 = arith.mulf %241, %239 : vector<1x1x256xf32>
      %243 = arith.addf %238, %242 : vector<1x1x256xf32>
      %c2_34 = arith.constant 2 : index
      %c0_35 = arith.constant 0 : index
      %244 = vector.load %arg3[%c2_34, %c0_35] : memref<7x256xf32, #tpu.memory_space<vmem>>, vector<1x256xf32>
      %245 = vector.shape_cast %244 : vector<1x256xf32> to vector<1x1x256xf32>
      %246 = arith.mulf %243, %245 : vector<1x1x256xf32>
      %247 = arith.addf %172, %246 : vector<1x1x256xf32>
      %cst_36 = arith.constant 0.000000e+00 : f32
      %248 = vector.broadcast %cst_36 : f32 to vector<1x1x256xf32>
      %249 = vector.extract_strided_slice %19 {offsets = [0, 0, 3], sizes = [1, 1, 256], strides = [1, 1, 1]} : vector<1x1x358xf32> to vector<1x1x256xf32>
      %c3 = arith.constant 3 : index
      %250 = memref.load %arg2[%c3] : memref<98xf32, #tpu.memory_space<smem>>
      %251 = vector.broadcast %250 : f32 to vector<1x1x256xf32>
      %252 = arith.mulf %251, %249 : vector<1x1x256xf32>
      %253 = arith.addf %248, %252 : vector<1x1x256xf32>
      %254 = vector.extract_strided_slice %19 {offsets = [0, 0, 19], sizes = [1, 1, 256], strides = [1, 1, 1]} : vector<1x1x358xf32> to vector<1x1x256xf32>
      %c10 = arith.constant 10 : index
      %255 = memref.load %arg2[%c10] : memref<98xf32, #tpu.memory_space<smem>>
      %256 = vector.broadcast %255 : f32 to vector<1x1x256xf32>
      %257 = arith.mulf %256, %254 : vector<1x1x256xf32>
      %258 = arith.addf %253, %257 : vector<1x1x256xf32>
      %259 = vector.extract_strided_slice %19 {offsets = [0, 0, 35], sizes = [1, 1, 256], strides = [1, 1, 1]} : vector<1x1x358xf32> to vector<1x1x256xf32>
      %c17 = arith.constant 17 : index
      %260 = memref.load %arg2[%c17] : memref<98xf32, #tpu.memory_space<smem>>
      %261 = vector.broadcast %260 : f32 to vector<1x1x256xf32>
      %262 = arith.mulf %261, %259 : vector<1x1x256xf32>
      %263 = arith.addf %258, %262 : vector<1x1x256xf32>
      %264 = vector.extract_strided_slice %19 {offsets = [0, 0, 51], sizes = [1, 1, 256], strides = [1, 1, 1]} : vector<1x1x358xf32> to vector<1x1x256xf32>
      %c24 = arith.constant 24 : index
      %265 = memref.load %arg2[%c24] : memref<98xf32, #tpu.memory_space<smem>>
      %266 = vector.broadcast %265 : f32 to vector<1x1x256xf32>
      %267 = arith.mulf %266, %264 : vector<1x1x256xf32>
      %268 = arith.addf %263, %267 : vector<1x1x256xf32>
      %269 = vector.extract_strided_slice %19 {offsets = [0, 0, 67], sizes = [1, 1, 256], strides = [1, 1, 1]} : vector<1x1x358xf32> to vector<1x1x256xf32>
      %c31 = arith.constant 31 : index
      %270 = memref.load %arg2[%c31] : memref<98xf32, #tpu.memory_space<smem>>
      %271 = vector.broadcast %270 : f32 to vector<1x1x256xf32>
      %272 = arith.mulf %271, %269 : vector<1x1x256xf32>
      %273 = arith.addf %268, %272 : vector<1x1x256xf32>
      %274 = vector.extract_strided_slice %19 {offsets = [0, 0, 83], sizes = [1, 1, 256], strides = [1, 1, 1]} : vector<1x1x358xf32> to vector<1x1x256xf32>
      %c38 = arith.constant 38 : index
      %275 = memref.load %arg2[%c38] : memref<98xf32, #tpu.memory_space<smem>>
      %276 = vector.broadcast %275 : f32 to vector<1x1x256xf32>
      %277 = arith.mulf %276, %274 : vector<1x1x256xf32>
      %278 = arith.addf %273, %277 : vector<1x1x256xf32>
      %279 = vector.extract_strided_slice %19 {offsets = [0, 0, 99], sizes = [1, 1, 256], strides = [1, 1, 1]} : vector<1x1x358xf32> to vector<1x1x256xf32>
      %c45 = arith.constant 45 : index
      %280 = memref.load %arg2[%c45] : memref<98xf32, #tpu.memory_space<smem>>
      %281 = vector.broadcast %280 : f32 to vector<1x1x256xf32>
      %282 = arith.mulf %281, %279 : vector<1x1x256xf32>
      %283 = arith.addf %278, %282 : vector<1x1x256xf32>
      %284 = vector.extract_strided_slice %21 {offsets = [0, 0, 3], sizes = [1, 1, 256], strides = [1, 1, 1]} : vector<1x1x358xf32> to vector<1x1x256xf32>
      %c52 = arith.constant 52 : index
      %285 = memref.load %arg2[%c52] : memref<98xf32, #tpu.memory_space<smem>>
      %286 = vector.broadcast %285 : f32 to vector<1x1x256xf32>
      %287 = arith.mulf %286, %284 : vector<1x1x256xf32>
      %288 = arith.addf %283, %287 : vector<1x1x256xf32>
      %289 = vector.extract_strided_slice %21 {offsets = [0, 0, 19], sizes = [1, 1, 256], strides = [1, 1, 1]} : vector<1x1x358xf32> to vector<1x1x256xf32>
      %c59 = arith.constant 59 : index
      %290 = memref.load %arg2[%c59] : memref<98xf32, #tpu.memory_space<smem>>
      %291 = vector.broadcast %290 : f32 to vector<1x1x256xf32>
      %292 = arith.mulf %291, %289 : vector<1x1x256xf32>
      %293 = arith.addf %288, %292 : vector<1x1x256xf32>
      %294 = vector.extract_strided_slice %21 {offsets = [0, 0, 35], sizes = [1, 1, 256], strides = [1, 1, 1]} : vector<1x1x358xf32> to vector<1x1x256xf32>
      %c66 = arith.constant 66 : index
      %295 = memref.load %arg2[%c66] : memref<98xf32, #tpu.memory_space<smem>>
      %296 = vector.broadcast %295 : f32 to vector<1x1x256xf32>
      %297 = arith.mulf %296, %294 : vector<1x1x256xf32>
      %298 = arith.addf %293, %297 : vector<1x1x256xf32>
      %299 = vector.extract_strided_slice %21 {offsets = [0, 0, 51], sizes = [1, 1, 256], strides = [1, 1, 1]} : vector<1x1x358xf32> to vector<1x1x256xf32>
      %c73 = arith.constant 73 : index
      %300 = memref.load %arg2[%c73] : memref<98xf32, #tpu.memory_space<smem>>
      %301 = vector.broadcast %300 : f32 to vector<1x1x256xf32>
      %302 = arith.mulf %301, %299 : vector<1x1x256xf32>
      %303 = arith.addf %298, %302 : vector<1x1x256xf32>
      %304 = vector.extract_strided_slice %21 {offsets = [0, 0, 67], sizes = [1, 1, 256], strides = [1, 1, 1]} : vector<1x1x358xf32> to vector<1x1x256xf32>
      %c80 = arith.constant 80 : index
      %305 = memref.load %arg2[%c80] : memref<98xf32, #tpu.memory_space<smem>>
      %306 = vector.broadcast %305 : f32 to vector<1x1x256xf32>
      %307 = arith.mulf %306, %304 : vector<1x1x256xf32>
      %308 = arith.addf %303, %307 : vector<1x1x256xf32>
      %309 = vector.extract_strided_slice %21 {offsets = [0, 0, 83], sizes = [1, 1, 256], strides = [1, 1, 1]} : vector<1x1x358xf32> to vector<1x1x256xf32>
      %c87 = arith.constant 87 : index
      %310 = memref.load %arg2[%c87] : memref<98xf32, #tpu.memory_space<smem>>
      %311 = vector.broadcast %310 : f32 to vector<1x1x256xf32>
      %312 = arith.mulf %311, %309 : vector<1x1x256xf32>
      %313 = arith.addf %308, %312 : vector<1x1x256xf32>
      %314 = vector.extract_strided_slice %21 {offsets = [0, 0, 99], sizes = [1, 1, 256], strides = [1, 1, 1]} : vector<1x1x358xf32> to vector<1x1x256xf32>
      %c94 = arith.constant 94 : index
      %315 = memref.load %arg2[%c94] : memref<98xf32, #tpu.memory_space<smem>>
      %316 = vector.broadcast %315 : f32 to vector<1x1x256xf32>
      %317 = arith.mulf %316, %314 : vector<1x1x256xf32>
      %318 = arith.addf %313, %317 : vector<1x1x256xf32>
      %c3_37 = arith.constant 3 : index
      %c0_38 = arith.constant 0 : index
      %319 = vector.load %arg3[%c3_37, %c0_38] : memref<7x256xf32, #tpu.memory_space<vmem>>, vector<1x256xf32>
      %320 = vector.shape_cast %319 : vector<1x256xf32> to vector<1x1x256xf32>
      %321 = arith.mulf %318, %320 : vector<1x1x256xf32>
      %322 = arith.addf %247, %321 : vector<1x1x256xf32>
      %cst_39 = arith.constant 0.000000e+00 : f32
      %323 = vector.broadcast %cst_39 : f32 to vector<1x1x256xf32>
      %324 = vector.extract_strided_slice %19 {offsets = [0, 0, 4], sizes = [1, 1, 256], strides = [1, 1, 1]} : vector<1x1x358xf32> to vector<1x1x256xf32>
      %c4 = arith.constant 4 : index
      %325 = memref.load %arg2[%c4] : memref<98xf32, #tpu.memory_space<smem>>
      %326 = vector.broadcast %325 : f32 to vector<1x1x256xf32>
      %327 = arith.mulf %326, %324 : vector<1x1x256xf32>
      %328 = arith.addf %323, %327 : vector<1x1x256xf32>
      %329 = vector.extract_strided_slice %19 {offsets = [0, 0, 20], sizes = [1, 1, 256], strides = [1, 1, 1]} : vector<1x1x358xf32> to vector<1x1x256xf32>
      %c11 = arith.constant 11 : index
      %330 = memref.load %arg2[%c11] : memref<98xf32, #tpu.memory_space<smem>>
      %331 = vector.broadcast %330 : f32 to vector<1x1x256xf32>
      %332 = arith.mulf %331, %329 : vector<1x1x256xf32>
      %333 = arith.addf %328, %332 : vector<1x1x256xf32>
      %334 = vector.extract_strided_slice %19 {offsets = [0, 0, 36], sizes = [1, 1, 256], strides = [1, 1, 1]} : vector<1x1x358xf32> to vector<1x1x256xf32>
      %c18 = arith.constant 18 : index
      %335 = memref.load %arg2[%c18] : memref<98xf32, #tpu.memory_space<smem>>
      %336 = vector.broadcast %335 : f32 to vector<1x1x256xf32>
      %337 = arith.mulf %336, %334 : vector<1x1x256xf32>
      %338 = arith.addf %333, %337 : vector<1x1x256xf32>
      %339 = vector.extract_strided_slice %19 {offsets = [0, 0, 52], sizes = [1, 1, 256], strides = [1, 1, 1]} : vector<1x1x358xf32> to vector<1x1x256xf32>
      %c25 = arith.constant 25 : index
      %340 = memref.load %arg2[%c25] : memref<98xf32, #tpu.memory_space<smem>>
      %341 = vector.broadcast %340 : f32 to vector<1x1x256xf32>
      %342 = arith.mulf %341, %339 : vector<1x1x256xf32>
      %343 = arith.addf %338, %342 : vector<1x1x256xf32>
      %344 = vector.extract_strided_slice %19 {offsets = [0, 0, 68], sizes = [1, 1, 256], strides = [1, 1, 1]} : vector<1x1x358xf32> to vector<1x1x256xf32>
      %c32 = arith.constant 32 : index
      %345 = memref.load %arg2[%c32] : memref<98xf32, #tpu.memory_space<smem>>
      %346 = vector.broadcast %345 : f32 to vector<1x1x256xf32>
      %347 = arith.mulf %346, %344 : vector<1x1x256xf32>
      %348 = arith.addf %343, %347 : vector<1x1x256xf32>
      %349 = vector.extract_strided_slice %19 {offsets = [0, 0, 84], sizes = [1, 1, 256], strides = [1, 1, 1]} : vector<1x1x358xf32> to vector<1x1x256xf32>
      %c39 = arith.constant 39 : index
      %350 = memref.load %arg2[%c39] : memref<98xf32, #tpu.memory_space<smem>>
      %351 = vector.broadcast %350 : f32 to vector<1x1x256xf32>
      %352 = arith.mulf %351, %349 : vector<1x1x256xf32>
      %353 = arith.addf %348, %352 : vector<1x1x256xf32>
      %354 = vector.extract_strided_slice %19 {offsets = [0, 0, 100], sizes = [1, 1, 256], strides = [1, 1, 1]} : vector<1x1x358xf32> to vector<1x1x256xf32>
      %c46 = arith.constant 46 : index
      %355 = memref.load %arg2[%c46] : memref<98xf32, #tpu.memory_space<smem>>
      %356 = vector.broadcast %355 : f32 to vector<1x1x256xf32>
      %357 = arith.mulf %356, %354 : vector<1x1x256xf32>
      %358 = arith.addf %353, %357 : vector<1x1x256xf32>
      %359 = vector.extract_strided_slice %21 {offsets = [0, 0, 4], sizes = [1, 1, 256], strides = [1, 1, 1]} : vector<1x1x358xf32> to vector<1x1x256xf32>
      %c53 = arith.constant 53 : index
      %360 = memref.load %arg2[%c53] : memref<98xf32, #tpu.memory_space<smem>>
      %361 = vector.broadcast %360 : f32 to vector<1x1x256xf32>
      %362 = arith.mulf %361, %359 : vector<1x1x256xf32>
      %363 = arith.addf %358, %362 : vector<1x1x256xf32>
      %364 = vector.extract_strided_slice %21 {offsets = [0, 0, 20], sizes = [1, 1, 256], strides = [1, 1, 1]} : vector<1x1x358xf32> to vector<1x1x256xf32>
      %c60 = arith.constant 60 : index
      %365 = memref.load %arg2[%c60] : memref<98xf32, #tpu.memory_space<smem>>
      %366 = vector.broadcast %365 : f32 to vector<1x1x256xf32>
      %367 = arith.mulf %366, %364 : vector<1x1x256xf32>
      %368 = arith.addf %363, %367 : vector<1x1x256xf32>
      %369 = vector.extract_strided_slice %21 {offsets = [0, 0, 36], sizes = [1, 1, 256], strides = [1, 1, 1]} : vector<1x1x358xf32> to vector<1x1x256xf32>
      %c67 = arith.constant 67 : index
      %370 = memref.load %arg2[%c67] : memref<98xf32, #tpu.memory_space<smem>>
      %371 = vector.broadcast %370 : f32 to vector<1x1x256xf32>
      %372 = arith.mulf %371, %369 : vector<1x1x256xf32>
      %373 = arith.addf %368, %372 : vector<1x1x256xf32>
      %374 = vector.extract_strided_slice %21 {offsets = [0, 0, 52], sizes = [1, 1, 256], strides = [1, 1, 1]} : vector<1x1x358xf32> to vector<1x1x256xf32>
      %c74 = arith.constant 74 : index
      %375 = memref.load %arg2[%c74] : memref<98xf32, #tpu.memory_space<smem>>
      %376 = vector.broadcast %375 : f32 to vector<1x1x256xf32>
      %377 = arith.mulf %376, %374 : vector<1x1x256xf32>
      %378 = arith.addf %373, %377 : vector<1x1x256xf32>
      %379 = vector.extract_strided_slice %21 {offsets = [0, 0, 68], sizes = [1, 1, 256], strides = [1, 1, 1]} : vector<1x1x358xf32> to vector<1x1x256xf32>
      %c81 = arith.constant 81 : index
      %380 = memref.load %arg2[%c81] : memref<98xf32, #tpu.memory_space<smem>>
      %381 = vector.broadcast %380 : f32 to vector<1x1x256xf32>
      %382 = arith.mulf %381, %379 : vector<1x1x256xf32>
      %383 = arith.addf %378, %382 : vector<1x1x256xf32>
      %384 = vector.extract_strided_slice %21 {offsets = [0, 0, 84], sizes = [1, 1, 256], strides = [1, 1, 1]} : vector<1x1x358xf32> to vector<1x1x256xf32>
      %c88 = arith.constant 88 : index
      %385 = memref.load %arg2[%c88] : memref<98xf32, #tpu.memory_space<smem>>
      %386 = vector.broadcast %385 : f32 to vector<1x1x256xf32>
      %387 = arith.mulf %386, %384 : vector<1x1x256xf32>
      %388 = arith.addf %383, %387 : vector<1x1x256xf32>
      %389 = vector.extract_strided_slice %21 {offsets = [0, 0, 100], sizes = [1, 1, 256], strides = [1, 1, 1]} : vector<1x1x358xf32> to vector<1x1x256xf32>
      %c95 = arith.constant 95 : index
      %390 = memref.load %arg2[%c95] : memref<98xf32, #tpu.memory_space<smem>>
      %391 = vector.broadcast %390 : f32 to vector<1x1x256xf32>
      %392 = arith.mulf %391, %389 : vector<1x1x256xf32>
      %393 = arith.addf %388, %392 : vector<1x1x256xf32>
      %c4_40 = arith.constant 4 : index
      %c0_41 = arith.constant 0 : index
      %394 = vector.load %arg3[%c4_40, %c0_41] : memref<7x256xf32, #tpu.memory_space<vmem>>, vector<1x256xf32>
      %395 = vector.shape_cast %394 : vector<1x256xf32> to vector<1x1x256xf32>
      %396 = arith.mulf %393, %395 : vector<1x1x256xf32>
      %397 = arith.addf %322, %396 : vector<1x1x256xf32>
      %cst_42 = arith.constant 0.000000e+00 : f32
      %398 = vector.broadcast %cst_42 : f32 to vector<1x1x256xf32>
      %399 = vector.extract_strided_slice %19 {offsets = [0, 0, 5], sizes = [1, 1, 256], strides = [1, 1, 1]} : vector<1x1x358xf32> to vector<1x1x256xf32>
      %c5 = arith.constant 5 : index
      %400 = memref.load %arg2[%c5] : memref<98xf32, #tpu.memory_space<smem>>
      %401 = vector.broadcast %400 : f32 to vector<1x1x256xf32>
      %402 = arith.mulf %401, %399 : vector<1x1x256xf32>
      %403 = arith.addf %398, %402 : vector<1x1x256xf32>
      %404 = vector.extract_strided_slice %19 {offsets = [0, 0, 21], sizes = [1, 1, 256], strides = [1, 1, 1]} : vector<1x1x358xf32> to vector<1x1x256xf32>
      %c12 = arith.constant 12 : index
      %405 = memref.load %arg2[%c12] : memref<98xf32, #tpu.memory_space<smem>>
      %406 = vector.broadcast %405 : f32 to vector<1x1x256xf32>
      %407 = arith.mulf %406, %404 : vector<1x1x256xf32>
      %408 = arith.addf %403, %407 : vector<1x1x256xf32>
      %409 = vector.extract_strided_slice %19 {offsets = [0, 0, 37], sizes = [1, 1, 256], strides = [1, 1, 1]} : vector<1x1x358xf32> to vector<1x1x256xf32>
      %c19 = arith.constant 19 : index
      %410 = memref.load %arg2[%c19] : memref<98xf32, #tpu.memory_space<smem>>
      %411 = vector.broadcast %410 : f32 to vector<1x1x256xf32>
      %412 = arith.mulf %411, %409 : vector<1x1x256xf32>
      %413 = arith.addf %408, %412 : vector<1x1x256xf32>
      %414 = vector.extract_strided_slice %19 {offsets = [0, 0, 53], sizes = [1, 1, 256], strides = [1, 1, 1]} : vector<1x1x358xf32> to vector<1x1x256xf32>
      %c26 = arith.constant 26 : index
      %415 = memref.load %arg2[%c26] : memref<98xf32, #tpu.memory_space<smem>>
      %416 = vector.broadcast %415 : f32 to vector<1x1x256xf32>
      %417 = arith.mulf %416, %414 : vector<1x1x256xf32>
      %418 = arith.addf %413, %417 : vector<1x1x256xf32>
      %419 = vector.extract_strided_slice %19 {offsets = [0, 0, 69], sizes = [1, 1, 256], strides = [1, 1, 1]} : vector<1x1x358xf32> to vector<1x1x256xf32>
      %c33 = arith.constant 33 : index
      %420 = memref.load %arg2[%c33] : memref<98xf32, #tpu.memory_space<smem>>
      %421 = vector.broadcast %420 : f32 to vector<1x1x256xf32>
      %422 = arith.mulf %421, %419 : vector<1x1x256xf32>
      %423 = arith.addf %418, %422 : vector<1x1x256xf32>
      %424 = vector.extract_strided_slice %19 {offsets = [0, 0, 85], sizes = [1, 1, 256], strides = [1, 1, 1]} : vector<1x1x358xf32> to vector<1x1x256xf32>
      %c40 = arith.constant 40 : index
      %425 = memref.load %arg2[%c40] : memref<98xf32, #tpu.memory_space<smem>>
      %426 = vector.broadcast %425 : f32 to vector<1x1x256xf32>
      %427 = arith.mulf %426, %424 : vector<1x1x256xf32>
      %428 = arith.addf %423, %427 : vector<1x1x256xf32>
      %429 = vector.extract_strided_slice %19 {offsets = [0, 0, 101], sizes = [1, 1, 256], strides = [1, 1, 1]} : vector<1x1x358xf32> to vector<1x1x256xf32>
      %c47 = arith.constant 47 : index
      %430 = memref.load %arg2[%c47] : memref<98xf32, #tpu.memory_space<smem>>
      %431 = vector.broadcast %430 : f32 to vector<1x1x256xf32>
      %432 = arith.mulf %431, %429 : vector<1x1x256xf32>
      %433 = arith.addf %428, %432 : vector<1x1x256xf32>
      %434 = vector.extract_strided_slice %21 {offsets = [0, 0, 5], sizes = [1, 1, 256], strides = [1, 1, 1]} : vector<1x1x358xf32> to vector<1x1x256xf32>
      %c54 = arith.constant 54 : index
      %435 = memref.load %arg2[%c54] : memref<98xf32, #tpu.memory_space<smem>>
      %436 = vector.broadcast %435 : f32 to vector<1x1x256xf32>
      %437 = arith.mulf %436, %434 : vector<1x1x256xf32>
      %438 = arith.addf %433, %437 : vector<1x1x256xf32>
      %439 = vector.extract_strided_slice %21 {offsets = [0, 0, 21], sizes = [1, 1, 256], strides = [1, 1, 1]} : vector<1x1x358xf32> to vector<1x1x256xf32>
      %c61 = arith.constant 61 : index
      %440 = memref.load %arg2[%c61] : memref<98xf32, #tpu.memory_space<smem>>
      %441 = vector.broadcast %440 : f32 to vector<1x1x256xf32>
      %442 = arith.mulf %441, %439 : vector<1x1x256xf32>
      %443 = arith.addf %438, %442 : vector<1x1x256xf32>
      %444 = vector.extract_strided_slice %21 {offsets = [0, 0, 37], sizes = [1, 1, 256], strides = [1, 1, 1]} : vector<1x1x358xf32> to vector<1x1x256xf32>
      %c68 = arith.constant 68 : index
      %445 = memref.load %arg2[%c68] : memref<98xf32, #tpu.memory_space<smem>>
      %446 = vector.broadcast %445 : f32 to vector<1x1x256xf32>
      %447 = arith.mulf %446, %444 : vector<1x1x256xf32>
      %448 = arith.addf %443, %447 : vector<1x1x256xf32>
      %449 = vector.extract_strided_slice %21 {offsets = [0, 0, 53], sizes = [1, 1, 256], strides = [1, 1, 1]} : vector<1x1x358xf32> to vector<1x1x256xf32>
      %c75 = arith.constant 75 : index
      %450 = memref.load %arg2[%c75] : memref<98xf32, #tpu.memory_space<smem>>
      %451 = vector.broadcast %450 : f32 to vector<1x1x256xf32>
      %452 = arith.mulf %451, %449 : vector<1x1x256xf32>
      %453 = arith.addf %448, %452 : vector<1x1x256xf32>
      %454 = vector.extract_strided_slice %21 {offsets = [0, 0, 69], sizes = [1, 1, 256], strides = [1, 1, 1]} : vector<1x1x358xf32> to vector<1x1x256xf32>
      %c82 = arith.constant 82 : index
      %455 = memref.load %arg2[%c82] : memref<98xf32, #tpu.memory_space<smem>>
      %456 = vector.broadcast %455 : f32 to vector<1x1x256xf32>
      %457 = arith.mulf %456, %454 : vector<1x1x256xf32>
      %458 = arith.addf %453, %457 : vector<1x1x256xf32>
      %459 = vector.extract_strided_slice %21 {offsets = [0, 0, 85], sizes = [1, 1, 256], strides = [1, 1, 1]} : vector<1x1x358xf32> to vector<1x1x256xf32>
      %c89 = arith.constant 89 : index
      %460 = memref.load %arg2[%c89] : memref<98xf32, #tpu.memory_space<smem>>
      %461 = vector.broadcast %460 : f32 to vector<1x1x256xf32>
      %462 = arith.mulf %461, %459 : vector<1x1x256xf32>
      %463 = arith.addf %458, %462 : vector<1x1x256xf32>
      %464 = vector.extract_strided_slice %21 {offsets = [0, 0, 101], sizes = [1, 1, 256], strides = [1, 1, 1]} : vector<1x1x358xf32> to vector<1x1x256xf32>
      %c96 = arith.constant 96 : index
      %465 = memref.load %arg2[%c96] : memref<98xf32, #tpu.memory_space<smem>>
      %466 = vector.broadcast %465 : f32 to vector<1x1x256xf32>
      %467 = arith.mulf %466, %464 : vector<1x1x256xf32>
      %468 = arith.addf %463, %467 : vector<1x1x256xf32>
      %c5_43 = arith.constant 5 : index
      %c0_44 = arith.constant 0 : index
      %469 = vector.load %arg3[%c5_43, %c0_44] : memref<7x256xf32, #tpu.memory_space<vmem>>, vector<1x256xf32>
      %470 = vector.shape_cast %469 : vector<1x256xf32> to vector<1x1x256xf32>
      %471 = arith.mulf %468, %470 : vector<1x1x256xf32>
      %472 = arith.addf %397, %471 : vector<1x1x256xf32>
      %cst_45 = arith.constant 0.000000e+00 : f32
      %473 = vector.broadcast %cst_45 : f32 to vector<1x1x256xf32>
      %474 = vector.extract_strided_slice %19 {offsets = [0, 0, 6], sizes = [1, 1, 256], strides = [1, 1, 1]} : vector<1x1x358xf32> to vector<1x1x256xf32>
      %c6 = arith.constant 6 : index
      %475 = memref.load %arg2[%c6] : memref<98xf32, #tpu.memory_space<smem>>
      %476 = vector.broadcast %475 : f32 to vector<1x1x256xf32>
      %477 = arith.mulf %476, %474 : vector<1x1x256xf32>
      %478 = arith.addf %473, %477 : vector<1x1x256xf32>
      %479 = vector.extract_strided_slice %19 {offsets = [0, 0, 22], sizes = [1, 1, 256], strides = [1, 1, 1]} : vector<1x1x358xf32> to vector<1x1x256xf32>
      %c13 = arith.constant 13 : index
      %480 = memref.load %arg2[%c13] : memref<98xf32, #tpu.memory_space<smem>>
      %481 = vector.broadcast %480 : f32 to vector<1x1x256xf32>
      %482 = arith.mulf %481, %479 : vector<1x1x256xf32>
      %483 = arith.addf %478, %482 : vector<1x1x256xf32>
      %484 = vector.extract_strided_slice %19 {offsets = [0, 0, 38], sizes = [1, 1, 256], strides = [1, 1, 1]} : vector<1x1x358xf32> to vector<1x1x256xf32>
      %c20 = arith.constant 20 : index
      %485 = memref.load %arg2[%c20] : memref<98xf32, #tpu.memory_space<smem>>
      %486 = vector.broadcast %485 : f32 to vector<1x1x256xf32>
      %487 = arith.mulf %486, %484 : vector<1x1x256xf32>
      %488 = arith.addf %483, %487 : vector<1x1x256xf32>
      %489 = vector.extract_strided_slice %19 {offsets = [0, 0, 54], sizes = [1, 1, 256], strides = [1, 1, 1]} : vector<1x1x358xf32> to vector<1x1x256xf32>
      %c27 = arith.constant 27 : index
      %490 = memref.load %arg2[%c27] : memref<98xf32, #tpu.memory_space<smem>>
      %491 = vector.broadcast %490 : f32 to vector<1x1x256xf32>
      %492 = arith.mulf %491, %489 : vector<1x1x256xf32>
      %493 = arith.addf %488, %492 : vector<1x1x256xf32>
      %494 = vector.extract_strided_slice %19 {offsets = [0, 0, 70], sizes = [1, 1, 256], strides = [1, 1, 1]} : vector<1x1x358xf32> to vector<1x1x256xf32>
      %c34 = arith.constant 34 : index
      %495 = memref.load %arg2[%c34] : memref<98xf32, #tpu.memory_space<smem>>
      %496 = vector.broadcast %495 : f32 to vector<1x1x256xf32>
      %497 = arith.mulf %496, %494 : vector<1x1x256xf32>
      %498 = arith.addf %493, %497 : vector<1x1x256xf32>
      %499 = vector.extract_strided_slice %19 {offsets = [0, 0, 86], sizes = [1, 1, 256], strides = [1, 1, 1]} : vector<1x1x358xf32> to vector<1x1x256xf32>
      %c41 = arith.constant 41 : index
      %500 = memref.load %arg2[%c41] : memref<98xf32, #tpu.memory_space<smem>>
      %501 = vector.broadcast %500 : f32 to vector<1x1x256xf32>
      %502 = arith.mulf %501, %499 : vector<1x1x256xf32>
      %503 = arith.addf %498, %502 : vector<1x1x256xf32>
      %504 = vector.extract_strided_slice %19 {offsets = [0, 0, 102], sizes = [1, 1, 256], strides = [1, 1, 1]} : vector<1x1x358xf32> to vector<1x1x256xf32>
      %c48 = arith.constant 48 : index
      %505 = memref.load %arg2[%c48] : memref<98xf32, #tpu.memory_space<smem>>
      %506 = vector.broadcast %505 : f32 to vector<1x1x256xf32>
      %507 = arith.mulf %506, %504 : vector<1x1x256xf32>
      %508 = arith.addf %503, %507 : vector<1x1x256xf32>
      %509 = vector.extract_strided_slice %21 {offsets = [0, 0, 6], sizes = [1, 1, 256], strides = [1, 1, 1]} : vector<1x1x358xf32> to vector<1x1x256xf32>
      %c55 = arith.constant 55 : index
      %510 = memref.load %arg2[%c55] : memref<98xf32, #tpu.memory_space<smem>>
      %511 = vector.broadcast %510 : f32 to vector<1x1x256xf32>
      %512 = arith.mulf %511, %509 : vector<1x1x256xf32>
      %513 = arith.addf %508, %512 : vector<1x1x256xf32>
      %514 = vector.extract_strided_slice %21 {offsets = [0, 0, 22], sizes = [1, 1, 256], strides = [1, 1, 1]} : vector<1x1x358xf32> to vector<1x1x256xf32>
      %c62 = arith.constant 62 : index
      %515 = memref.load %arg2[%c62] : memref<98xf32, #tpu.memory_space<smem>>
      %516 = vector.broadcast %515 : f32 to vector<1x1x256xf32>
      %517 = arith.mulf %516, %514 : vector<1x1x256xf32>
      %518 = arith.addf %513, %517 : vector<1x1x256xf32>
      %519 = vector.extract_strided_slice %21 {offsets = [0, 0, 38], sizes = [1, 1, 256], strides = [1, 1, 1]} : vector<1x1x358xf32> to vector<1x1x256xf32>
      %c69 = arith.constant 69 : index
      %520 = memref.load %arg2[%c69] : memref<98xf32, #tpu.memory_space<smem>>
      %521 = vector.broadcast %520 : f32 to vector<1x1x256xf32>
      %522 = arith.mulf %521, %519 : vector<1x1x256xf32>
      %523 = arith.addf %518, %522 : vector<1x1x256xf32>
      %524 = vector.extract_strided_slice %21 {offsets = [0, 0, 54], sizes = [1, 1, 256], strides = [1, 1, 1]} : vector<1x1x358xf32> to vector<1x1x256xf32>
      %c76 = arith.constant 76 : index
      %525 = memref.load %arg2[%c76] : memref<98xf32, #tpu.memory_space<smem>>
      %526 = vector.broadcast %525 : f32 to vector<1x1x256xf32>
      %527 = arith.mulf %526, %524 : vector<1x1x256xf32>
      %528 = arith.addf %523, %527 : vector<1x1x256xf32>
      %529 = vector.extract_strided_slice %21 {offsets = [0, 0, 70], sizes = [1, 1, 256], strides = [1, 1, 1]} : vector<1x1x358xf32> to vector<1x1x256xf32>
      %c83 = arith.constant 83 : index
      %530 = memref.load %arg2[%c83] : memref<98xf32, #tpu.memory_space<smem>>
      %531 = vector.broadcast %530 : f32 to vector<1x1x256xf32>
      %532 = arith.mulf %531, %529 : vector<1x1x256xf32>
      %533 = arith.addf %528, %532 : vector<1x1x256xf32>
      %534 = vector.extract_strided_slice %21 {offsets = [0, 0, 86], sizes = [1, 1, 256], strides = [1, 1, 1]} : vector<1x1x358xf32> to vector<1x1x256xf32>
      %c90 = arith.constant 90 : index
      %535 = memref.load %arg2[%c90] : memref<98xf32, #tpu.memory_space<smem>>
      %536 = vector.broadcast %535 : f32 to vector<1x1x256xf32>
      %537 = arith.mulf %536, %534 : vector<1x1x256xf32>
      %538 = arith.addf %533, %537 : vector<1x1x256xf32>
      %539 = vector.extract_strided_slice %21 {offsets = [0, 0, 102], sizes = [1, 1, 256], strides = [1, 1, 1]} : vector<1x1x358xf32> to vector<1x1x256xf32>
      %c97 = arith.constant 97 : index
      %540 = memref.load %arg2[%c97] : memref<98xf32, #tpu.memory_space<smem>>
      %541 = vector.broadcast %540 : f32 to vector<1x1x256xf32>
      %542 = arith.mulf %541, %539 : vector<1x1x256xf32>
      %543 = arith.addf %538, %542 : vector<1x1x256xf32>
      %c6_46 = arith.constant 6 : index
      %c0_47 = arith.constant 0 : index
      %544 = vector.load %arg3[%c6_46, %c0_47] : memref<7x256xf32, #tpu.memory_space<vmem>>, vector<1x256xf32>
      %545 = vector.shape_cast %544 : vector<1x256xf32> to vector<1x1x256xf32>
      %546 = arith.mulf %543, %545 : vector<1x1x256xf32>
      %547 = arith.addf %472, %546 : vector<1x1x256xf32>
      %548 = arith.negf %547 : vector<1x1x256xf32>
      %549 = math.exp %548 : vector<1x1x256xf32>
      %cst_48 = arith.constant 1.000000e+00 : f32
      %550 = vector.broadcast %cst_48 : f32 to vector<1x1x256xf32>
      %551 = arith.addf %550, %549 : vector<1x1x256xf32>
      %552 = arith.divf %550, %551 : vector<1x1x256xf32>
      %c0_49 = arith.constant 0 : index
      %c0_50 = arith.constant 0 : index
      %c0_51 = arith.constant 0 : index
      %553 = vector.load %arg5[%c0_49, %c0_50, %c0_51] : memref<1x1x256xf32, #tpu.memory_space<vmem>>, vector<1x1x256xf32>
      tpu.vector_store %arg5[%c0_49, %c0_50, %c0_51], %552 {strides = array<i32>} : memref<1x1x256xf32, #tpu.memory_space<vmem>>, vector<1x1x256xf32>,
    } else {
    }
    return
  }
  func.func @transform_0(%arg0: i32, %arg1: i32) -> i32 {
    %c0_i32 = arith.constant 0 : i32
    %c0_i32_0 = arith.constant 0 : i32
    return %c0_i32 : i32
  }
  func.func @transform_1(%arg0: i32, %arg1: i32) -> (i32, i32) {
    %c0_i32 = arith.constant 0 : i32
    %c0_i32_0 = arith.constant 0 : i32
    %c0_i32_1 = arith.constant 0 : i32
    return %c0_i32, %c0_i32_0 : i32, i32
  }
  func.func @transform_2(%arg0: i32, %arg1: i32) -> (i32, i32, i32) {
    %c0_i32 = arith.constant 0 : i32
    %c0_i32_0 = arith.constant 0 : i32
    return %arg0, %arg1, %c0_i32 : i32, i32, i32
  }
  func.func @transform_3(%arg0: i32, %arg1: i32) -> (i32, i32, i32) {
    %c0_i32 = arith.constant 0 : i32
    %c0_i32_0 = arith.constant 0 : i32
    %c0_i32_1 = arith.constant 0 : i32
    return %arg0, %c0_i32, %c0_i32_0 : i32, i32, i32
  }
}

</mosaic_0001>

<bundles_post_ra>
// kernel: tpu_custom_call.1
= control target key start
LH: loop header
LB: loop body
LE: loop exit
PB: predicated region body
PF: predicated region fallthrough
CT: control target
= control target key end

     0   :  { %8 = vsyncpa [#allocation7], 0  ;;  %s4626_s0 = inlined_call_operand.hbm [shape: f32[98], index: 0, kind: input, shape index: {}]   ;;  %s4627_s1 = inlined_call_operand.hbm [shape: f32[7,256], index: 1, kind: input, shape index: {}]   ;;  %s4628_s2 = inlined_call_operand.hbm [shape: f32[2,4,256], index: 2, kind: input, shape index: {}]   ;;  %s4629_s3 = inlined_call_operand.hbm [shape: f32[2,1,256], index: 3, kind: output, shape index: {}]  }
   0x1   :  { %9 = vsyncpa [#allocation5], 0 }
   0x2   :  { %10 = vsyncpa [#allocation10], 0 }
   0x3   :  { %12 = vsyncpa [#allocation10 + $0x1], 0 }
   0x4   :  { %13 = vsyncpa [#allocation6], 0 }
   0x5   :  { %15 = vsyncpa [#allocation6 + $0x1], 0  ;;  %s3135_s12 = smov 0   ;;  %s3137_s13 = smov 0  }
   0x6   :  { %s3139_s14 = smov 0   ;;  %s3141_s15 = smov 0  }
   0x7   :  { %s3143_s16 = smov 0   ;;  %s3145_s17 = smov 0  }
   0x8 LB: > { %s2700_s18 = sadd.s32 4294967295, %s3087_s17   ;;  %s2701_s19 = sadd.s32 4294967294, %s3087_s17   ;;  %s3087_s17 = sphi %s3145_s17, %s21_s17   ;;  %s3083_s16 = sphi %s3143_s16, %s4763_s16   ;;  %s3079_s15 = sphi %s3141_s15, %s4762_s15   ;;  %s3075_s14 = sphi %s3139_s14, %s4761_s14   ;;  %s3071_s13 = sphi %s3137_s13, %s4760_s13   ;;  %s3067_s12 = sphi %s3135_s12, %s4759_s12  }
   0x9   : > { %p97_p0 = scmp.ne.s32.totalorder %s3071_s13, %s3067_s12  ;;  %p3169_p1 = scmp.eq.s32.totalorder %s2700_s18, 0 }
   0xa   : > { %p3173_p2 = scmp.eq.s32.totalorder %s2700_s18, 1  ;;  %p127_p3 = scmp.eq.s32.totalorder %s2701_s19, 1 }
   0xb   : > { %p3179_p4 = por %p3169_p1, %p97_p0  ;;  %p2702_p5 = scmp.ge.s32.totalorder %s3087_s17, 1 }
   0xc   : > { %p3184_p6 = por %p127_p3, %p97_p0  ;;  %p134_p7 = scmp.lt.s32.totalorder %s3087_s17, 3 }
   0xd   : > { %s3089_s25 = smov [#allocation8]   ;;  %s33_s28 = sadd.s32 1, %s3083_s16 }
   0xe   : > { %s4657_s23 = scalar_select %p3184_p6, 1, 0 }
   0xf   : > { %p3189_p8 = pnand %p2702_p5, %p134_p7  ;;  %s156_s26 = sshll.u32 %s3089_s25, 4  ;;  %s157_s26 = int_to_ptr.vmem [resolvable:$true] %s156_s26 }
  0x10   : > { %p3203_p12 = scmp.ge.s32.totalorder %s33_s28, 2  ;;  %s3090_s30 = smov [#allocation4]  }
  0x11   : > { %p2832_p10 = pneg %p3189_p8  ;;  %s2956_s6 = scalar_lea.vmem %s157_s26, 256 }
  0x12   : > { %p2957_p0 = scmp.ne.s32.totalorder %s157_s26, %s2956_s6  ;;  %p2964_p7 = scmp.lt.s32.totalorder %s157_s26, %s157_s26 }
  0x13   : > { %p3198_p11 = pnand %p2832_p10, %p3169_p1  ;;  %p2965_p10 = scmp.lt.s32.totalorder %s2956_s6, %s2956_s6 }
  0x15   : > { %2835 = dma.hbm_to_smem (!%p3198_p11), %s4626_s0, 16, %s3090_s30, [#allocation7]  }
  0x16   : > { %p2947_p13 = pneg %p3198_p11  ;;  %p2966_p9 = por %p2965_p10, %p2964_p7 }
  0x18   : > { %p2959_p3 = pnand %p2957_p0, %p2947_p13 }
  0x1a   : > { %p2960_p5 = pneg %p2959_p3 }
  0x1c   : > { %p2967_p6 = pnand %p2966_p9, %p2960_p5 }
  0x1e   : > { %2970 = shalt.err (!%p2967_p6)
}
  0x1f   : > { %2838 = dma.hbm_to_vmem [thread:$0]  (!%p3198_p11), %s4627_s1, 256, %s157_s26, [#allocation5]  }
  0x20   : > { %s4765_s28 = smov (%p3203_p12, %s33_s28), 0  ;;  %s84_s9 = sadd.s32 1, %s3075_s14 }
  0x21   : > { %p91_p6 = scmp.ne.s32.totalorder %s3075_s14, %s3071_s13  ;;  %s79_s10 = ssub.s32 %s3083_s16, %s4765_s28 }
  0x22   : > { %p92_p9 = scmp.eq.s32.totalorder %s3087_s17, 0  ;;  %p82_p13 = scmp.eq.s32.totalorder %s79_s10, 0 }
  0x23   : > { %p3231_p0 = por %p3173_p2, %p91_p6  ;;  %p2849_p5 = scmp.lt.s32.totalorder %s3087_s17, 2 }
  0x24   : > { %p93_p3 = por %p92_p9, %p91_p6  ;;  %s167_s19 = sand.u32 1, %s3075_s14  }
  0x25   : > { %s3237_s18 = scalar_select %p82_p13, %s3075_s14, %s84_s9  }
  0x26   : > { %s2818_s25 = sshll.u32 %s3083_s16, 7  ;;  %s2706_s26 = sshll.u32 %s167_s19, 3 }
  0x27   : > { %s179_s30 = scalar_lea.hbm %s4628_s2, %s2818_s25  ;;  %s171_s4 = scalar_lea.vmem [#allocation9], %s2706_s26 }
  0x28   : > { %s181_s5 = sshll.u32 %s171_s4, 4  ;;  %p3244_p11 = pnand %p2849_p5, %p93_p3  ;;  %s182_s5 = int_to_ptr.vmem [resolvable:$true] %s181_s5 }
  0x29   : > { %s168_s21 = scalar_lea.sflag [#allocation10], %s167_s19  ;;  %s2984_s7 = scalar_lea.vmem %s182_s5, 128 }
  0x2a   : > { %p2973_p2 = pneg %p3244_p11  ;;  %p2985_p12 = scmp.ne.s32.totalorder %s182_s5, %s2984_s7 }
  0x2b   : > { %s3091_s8 = smov [#allocation9]  }
  0x2c   : > { %p2987_p7 = pnand %p2985_p12, %p2973_p2  ;;  %s2989_s9 = sshll.u32 %s3091_s8, 4  ;;  %s2990_s9 = int_to_ptr.vmem [resolvable:$false] %s2989_s9 }
  0x2d   : > { %s2991_s10 = scalar_lea.vmem %s2990_s9, 256  ;;  %p2992_p6 = scmp.lt.s32.totalorder %s182_s5, %s2990_s9 }
  0x2e   : > { %p2988_p10 = pneg %p2987_p7  ;;  %p2993_p9 = scmp.lt.s32.totalorder %s2991_s10, %s2984_s7 }
  0x30   : > { %p2994_p13 = por %p2993_p9, %p2992_p6 }
  0x32   : > { %p2995_p3 = pnand %p2994_p13, %p2988_p10 }
  0x34   : > { %2998 = shalt.err (!%p2995_p3)
}
  0x35   : > { %2842 = dma.hbm_to_vmem [thread:$0]  (!%p3244_p11), %s179_s30, 128, %s182_s5, %s168_s21  }
  0x36   : > { %190 = sbr.rel (%p3189_p8) target bundleno = 1218 (0x4c2), region = 32 }
  0x3b   : > { %3050 = dma.done.wait (%p3169_p1), [#allocation7], 16  }
  0x3c   : > { %3052 = vsyncadd (%p3169_p1), [#allocation7], 4294967280 }
  0x3d   : > { %3054 = dma.done.wait (%p3169_p1), [#allocation5], 256  }
  0x3e   : > { %3056 = vsyncadd (%p3169_p1), [#allocation5], 4294967040  ;;  %s3263_s19 = sand.u32 1, %s3071_s13  }
  0x3f   : > { %s2712_s24 = sshll.u32 %s3263_s19, 3  ;;  %s201_s25 = scalar_lea.sflag [#allocation10], %s3263_s19 }
  0x40   : > { %s204_s26 = scalar_lea.vmem [#allocation9], %s2712_s24 }
  0x41   : > { %3058 = dma.done.wait (%p3179_p4), %s201_s25, 128  }
  0x42   : > { %3060 = vsyncadd (%p3179_p4), %s201_s25, 4294967168 }
  0x43   : > { %209 = sfence }
  0x44   : > { %v232_v0 = vlaneseq  ;;  %v238_v1 = vld [vmem:[%s204_s26] sm:$0xff]  ;;  %vm242_vm0 = vcmask 1043456   ;;  %v4663_v3 = vmov 0  ;;  %v916_v6 = vld [vmem:[#allocation8 + $0x1] ss:$8 sm:$0x3] }
  0x45   : > { %v240_v4 = vcombine.high %v238_v1, %v238_v1  ;;  %v243_v5 = vsel %vm242_vm0, %v238_v1, 0.0  ;;  %v3092_v7 = vmov 0.0   ;;  %v3093_v9 = vmov -inf   ;;  %s3095_s20 = smov 1   ;;  %s3096_s22 = smov 51  }
  0x46   : > { %v279_v2 = vshrl.u32 %v232_v0, 7  ;;  %vm3271_vm1 = vcmp.lt.s32.totalorder %v232_v0, 256  ;;  %v244_v8 = vrot.slane %v243_v5, 4  ;;  %v257_v10 = vsel %vm242_vm0, %v238_v1, -inf  ;;  %s2714_s27 = sld [smem:[#allocation4 + $0x7]]  ;;  %s3097_s4 = smov 112  }
  0x47   : > { %v4664_v3 = vsel %vm3271_vm1, 4294967295, %v4663_v3  ;;  %236 = vst.msk [vmem:[#allocation2] sm:$0x3] %vm3271_vm1, %v3092_v7  ;;  %237 = vst.msk [vmem:[#allocation3] sm:$0x3] %vm3271_vm1, %v3093_v9  ;;  %v250_v13 = vsel %vm242_vm0, %v240_v4, 0.0 }
  0x48   : > { %4665 = vst [vmem:[#allocation16_spill] sm:$0xff] %v4664_v3  ;;  %v3281_v11 = vsub.s32 1, %v279_v2  ;;  %v3283_v12 = vsub.s32 0, %v279_v2  ;;  %v258_v14 = vrot.slane %v257_v10, 4  ;;  %v245_v15 = vadd.f32 %v244_v8, %v243_v5  ;;  %s2715_s29 = sld [smem:[#allocation4 + $0xe]]  ;;  %s3098_s6 = smov 96  }
  0x49   : > { %v251_v16 = vrot.slane %v250_v13, 4  ;;  %v264_v17 = vsel %vm242_vm0, %v240_v4, -inf  ;;  %v3094_v22 = vmov 1966171168   ;;  %vm334_vm2 = vcmask 416768   ;;  %s2716_s30 = sld [smem:[#allocation4 + $0x15]] }
  0x4a   : > { %4666 = vst [vmem:[#allocation17_spill] sm:$0xff] %v3281_v11  ;;  %4667 = vst [vmem:[#allocation18_spill] sm:$0xff] %v3283_v12  ;;  %v925_v18 = vrot.slane %v916_v6, %v3281_v11  ;;  %v921_v19 = vrot.slane %v916_v6, %v3283_v12  ;;  %v259_v20 = vmax.f32 %v257_v10, %v258_v14  ;;  %v265_v21 = vrot.slane %v264_v17, 4  ;;  %s2717_s5 = sld [smem:[#allocation4 + $0x1c]]  ;;  %s3099_s7 = smov 80  }
  0x4b   : > { %v276_v23 = vunpack.c.l.s4 %v3094_v22  ;;  %v246_v24 = vrot.slane %v245_v15, 2  ;;  %v252_v25 = vadd.f32 %v251_v16, %v250_v13  ;;  %s2718_s21 = sld [smem:[#allocation4 + $0x23]]  ;;  %s3100_s9 = smov 64   ;;  %vm381_vm3 = vcmask 916480  }
  0x4c   : > { %928 = vrot.lane.b32.xlu1 %v925_v18, %s3095_s20  ;;  %926 = vrot.lane.b32.xlu0 %v921_v19, %s3095_s20  ;;  %v260_v26 = vrot.slane %v259_v20, 2  ;;  %v266_v27 = vmax.f32 %v264_v17, %v265_v21  ;;  %v368_v61 = vstv %s2714_s27  ;;  %s2719_s8 = sld [smem:[#allocation4 + $0x2a]]  ;;  %s3101_s24 = smov 48   ;;  %vm402_vm4 = vcmask 785408  }
  0x4d   : > { %v247_v28 = vadd.f32 %v246_v24, %v245_v15  ;;  %v253_v29 = vrot.slane %v252_v25, 2  ;;  %v277_v32 = vunpack.c.0.s8 %v276_v23  ;;  %s2721_s10 = sld [smem:[#allocation4 + $0x38]]  ;;  %s3102_s26 = smov 32   ;;  %vm423_vm5 = vcmask 654336  }
  0x4e   : > { %v261_v30 = vmax.f32 %v259_v20, %v260_v26  ;;  %v267_v31 = vrot.slane %v266_v27, 2  ;;  %v271_v47 = vld [vmem:[#allocation2] sm:$0x3]  ;;  %v296_v50 = vld [vmem:[#allocation3] sm:$0x3]  ;;  %v389_v7 = vstv %s2715_s29  ;;  %s2722_s25 = sld [smem:[#allocation4 + $0x3f]] }
  0x4f   : > { %v248_v33 = vrot.slane %v247_v28, 1  ;;  %v254_v34 = vadd.f32 %v253_v29, %v252_v25  ;;  %v3289_v41 = vsub.s32 %v277_v32, %v279_v2  ;;  %v410_v10 = vstv %s2716_s30  ;;  %s2723_s20 = sld [smem:[#allocation4 + $0x46]] }
  0x50   : > { %v262_v35 = vrot.slane %v261_v30, 1  ;;  %v268_v36 = vmax.f32 %v266_v27, %v267_v31  ;;  %v431_v17 = vstv %s2717_s5  ;;  %s2725_s27 = sld [smem:[#allocation4 + $0x54]]  ;;  %vm444_vm6 = vcmask 523264  }
  0x51   : > { %v249_v37 = vadd.f32 %v248_v33, %v247_v28  ;;  %v255_v38 = vrot.slane %v254_v34, 1  ;;  %4668 = vst [vmem:[#allocation19_spill] sm:$0xff] %v3289_v41  ;;  %v452_v20 = vstv %s2718_s21  ;;  %s2726_s29 = sld [smem:[#allocation4 + $0x5b]]  ;;  %vm465_vm7 = vcmask 392192  }
  0x52   : > { %v263_v39 = vmax.f32 %v261_v30, %v262_v35  ;;  %v269_v40 = vrot.slane %v268_v36, 1  ;;  %v473_v27 = vstv %s2719_s8  ;;  %s2728_s30 = sld [smem:[#allocation4 + $0x8]]  ;;  %vm486_vm8 = vcmask 261120  }
  0x53   : > { %v256_v42 = vadd.f32 %v255_v38, %v254_v34  ;;  %v500_v29 = vstv %s2721_s10  ;;  %s2729_s5 = sld [smem:[#allocation4 + $0xf]]  ;;  %vm930_vm9 = vcmask 7168   ;;  %vm1249_vm10 = vcmask 15360  }
  0x54   : > { %v270_v43 = vmax.f32 %v268_v36, %v269_v40  ;;  %s2730_s21 = sld [smem:[#allocation4 + $0x16]]  ;;  %vm1568_vm11 = vcmask 23552   ;;  %vm1887_vm12 = vcmask 31744   ;;  %vm2206_vm13 = vcmask 39936  }
  0x55   : > { %v274_v44 = vcombine.low %v249_v37, %v256_v42  ;;  %s2731_s8 = sld [smem:[#allocation4 + $0x1d]]  ;;  %vm2525_vm14 = vcmask 48128   ;;  %vm947_vm15 = vcmask 1039360   ;;  %vm1266_vm0 = vcmask 1031168  }
  0x56   : > { %v299_v45 = vcombine.low %v263_v39, %v270_v43  ;;  %v520_v39 = vstv %s2722_s25  ;;  %v540_v43 = vstv %s2723_s20  ;;  %s2732_s10 = sld [smem:[#allocation4 + $0x24]] }
  0x57   : > { %v281_v46 = vrot.slane %v274_v44, %v3289_v41  ;;  %s2733_s25 = sld [smem:[#allocation4 + $0x2b]] }
  0x58   : > { %v306_v48 = vrot.slane %v299_v45, %v3289_v41  ;;  %s2735_s20 = sld [smem:[#allocation4 + $0x39]] }
  0x59   : > { %v288_v49 = vrot.slane %v281_v46, %v3289_v41 }
  0x5a   : > { %v313_v51 = vrot.slane %v306_v48, %v3289_v41 }
  0x5b   : > { %v290_v52 = vadd.f32 %v288_v49, %v271_v47 }
  0x5c   : > { %v315_v53 = vmax.f32 %v296_v50, %v313_v51  ;;  %v580_v51 = vstv %s2725_s27  ;;  %s2737_s27 = sld [smem:[#allocation4 + $0x47]] }
  0x5d   : > { %295 = vst.msk [vmem:[#allocation2] sm:$0x3] %vm3271_vm1, %v290_v52 }
  0x5e   : > { %316 = vst.msk [vmem:[#allocation3] sm:$0x3] %vm3271_vm1, %v315_v53 }
  0x64   : > { %v320_v54 = vld [vmem:[#allocation2] sm:$0x3] }
  0x65   : > { %v325_v55 = vrot.slane %v320_v54, %v3283_v12  ;;  %v341_v56 = vld [vmem:[#allocation3] sm:$0x3]  ;;  %v329_v58 = vrot.slane %v320_v54, %v3281_v11 }
  0x66   : > { %v346_v57 = vrot.slane %v341_v56, %v3283_v12  ;;  %v350_v59 = vrot.slane %v341_v56, %v3281_v11  ;;  %v600_v56 = vstv %s2726_s29  ;;  %s2738_s29 = sld [smem:[#allocation4 + $0x4e]] }
  0x67   : > { %330 = vrot.lane.b32.xlu0 %v325_v55, %s3096_s22 }
  0x68   : > { %351 = vrot.lane.b32.xlu1 %v346_v57, %s3096_s22 }
  0x6b   : > { %332 = vrot.lane.b32.xlu0 %v329_v58, %s3096_s22 }
  0x6c   : > { %353 = vrot.lane.b32.xlu1 %v350_v59, %s3096_s22  ;;  %s2724_s22 = sld [smem:[#allocation4 + $0x4d]]  ;;  %v644_v59 = vstv %s2728_s30 }
  0x6d   : > { %s2739_s30 = sld [smem:[#allocation4 + $0x55]] }
  0x72   : > { %v560_v48 = vstv %s2724_s22  ;;  %s2736_s22 = sld [smem:[#allocation4 + $0x40]] }
  0xbe   : > { %v3303_v60 = vpop.permute.xlu0 %926  ;;  %v3336_v21 = vpop.permute.xlu1 %928 }
  0xd9   : > { %v331_v62 = vpop.permute.xlu0 %330 }
  0xda   : > { %v3306_v63 = vsel %vm334_vm2, 0.0, %v331_v62  ;;  %v352_v24 = vpop.permute.xlu1 %351 }
  0xdb   : > { %v369_v0 = vmul.f32 %v368_v61, %v3306_v63  ;;  %v390_v9 = vmul.f32 %v389_v7, %v3306_v63  ;;  %v411_v13 = vmul.f32 %v410_v10, %v3306_v63  ;;  %v432_v19 = vmul.f32 %v431_v17, %v3306_v63 }
  0xdc   : > { %v453_v22 = vmul.f32 %v452_v20, %v3306_v63  ;;  %v3347_v28 = vsel %vm334_vm2, 0.0, %v352_v24  ;;  %v474_v31 = vmul.f32 %v473_v27, %v3306_v63 }
  0xdd   : > { %375 = vrot.lane.b32.xlu0 %v369_v0, %s3097_s4  ;;  %v333_v1 = vpop.permute.xlu0 %332  ;;  %v501_v33 = vmul.f32 %v500_v29, %v3347_v28  ;;  %v521_v42 = vmul.f32 %v520_v39, %v3347_v28  ;;  %v541_v44 = vmul.f32 %v540_v43, %v3347_v28  ;;  %v561_v50 = vmul.f32 %v560_v48, %v3347_v28 }
  0xde   : > { %v3311_v2 = vsel %vm334_vm2, %v331_v62, %v333_v1  ;;  %v3314_v4 = vsel %vm334_vm2, %v333_v1, 0.0  ;;  %v354_v32 = vpop.permute.xlu1 %353  ;;  %v581_v52 = vmul.f32 %v580_v51, %v3347_v28  ;;  %v601_v58 = vmul.f32 %v600_v56, %v3347_v28 }
  0xdf   : > { %4669 = vst [vmem:[#allocation20_spill] sm:$0xff] %v3314_v4  ;;  %v371_v5 = vmul.f32 %v368_v61, %v3314_v4  ;;  %v370_v6 = vmul.f32 %v368_v61, %v3311_v2  ;;  %v391_v8 = vmul.f32 %v389_v7, %v3311_v2  ;;  %v392_v14 = vmul.f32 %v389_v7, %v3314_v4 }
  0xe0   : > { %v413_v15 = vmul.f32 %v410_v10, %v3314_v4  ;;  %v412_v16 = vmul.f32 %v410_v10, %v3311_v2  ;;  %v433_v18 = vmul.f32 %v431_v17, %v3311_v2  ;;  %v434_v23 = vmul.f32 %v431_v17, %v3314_v4 }
  0xe1   : > { %379 = vrot.lane.b32.xlu0 %v371_v5, %s3097_s4  ;;  %377 = vrot.lane.b32.xlu1 %v370_v6, %s3097_s4  ;;  %v455_v25 = vmul.f32 %v452_v20, %v3314_v4  ;;  %v454_v26 = vmul.f32 %v452_v20, %v3311_v2  ;;  %v475_v30 = vmul.f32 %v473_v27, %v3311_v2  ;;  %v3355_v34 = vsel %vm334_vm2, %v354_v32, 0.0 }
  0xe2   : > { %v476_v35 = vmul.f32 %v473_v27, %v3314_v4  ;;  %v3359_v36 = vsel %vm334_vm2, %v352_v24, %v354_v32  ;;  %v503_v37 = vmul.f32 %v500_v29, %v3355_v34  ;;  %v523_v45 = vmul.f32 %v520_v39, %v3355_v34 }
  0xe3   : > { %v502_v38 = vmul.f32 %v500_v29, %v3359_v36  ;;  %v522_v40 = vmul.f32 %v520_v39, %v3359_v36  ;;  %v543_v46 = vmul.f32 %v540_v43, %v3355_v34  ;;  %v542_v47 = vmul.f32 %v540_v43, %v3359_v36 }
  0xe4   : > { %v562_v49 = vmul.f32 %v560_v48, %v3359_v36  ;;  %v563_v53 = vmul.f32 %v560_v48, %v3355_v34  ;;  %v583_v54 = vmul.f32 %v580_v51, %v3355_v34  ;;  %v582_v55 = vmul.f32 %v580_v51, %v3359_v36 }
  0xe5   : > { %398 = vrot.lane.b32.xlu0 %v391_v8, %s3098_s6  ;;  %396 = vrot.lane.b32.xlu1 %v390_v9, %s3098_s6  ;;  %v602_v57 = vmul.f32 %v600_v56, %v3359_v36  ;;  %v645_v61 = vmul.f32 %v644_v59, %v3306_v63  ;;  %v603_v62 = vmul.f32 %v600_v56, %v3355_v34  ;;  %v666_v5 = vstv %s2729_s5  ;;  %s2740_s5 = sld [smem:[#allocation4 + $0x5c]] }
  0xe6   : > { %v647_v0 = vmul.f32 %v644_v59, %v3314_v4  ;;  %v646_v1 = vmul.f32 %v644_v59, %v3311_v2  ;;  %v668_v6 = vmul.f32 %v666_v5, %v3311_v2  ;;  %v667_v7 = vmul.f32 %v666_v5, %v3306_v63 }
  0xe7   : > { %v688_v8 = vstv %s2730_s21  ;;  %v669_v10 = vmul.f32 %v666_v5, %v3314_v4  ;;  %v754_v24 = vstv %s2733_s25  ;;  %v784_v27 = vstv %s2735_s20  ;;  %s2742_s21 = sld [smem:[#allocation4 + $0x9]] }
  0xe8   : > { %v689_v9 = vmul.f32 %v688_v8, %v3306_v63  ;;  %v785_v29 = vmul.f32 %v784_v27, %v3347_v28  ;;  %v786_v32 = vmul.f32 %v784_v27, %v3359_v36  ;;  %v828_v39 = vstv %s2737_s27  ;;  %s2745_s25 = sld [smem:[#allocation4 + $0x1e]] }
  0xe9   : > { %417 = vrot.lane.b32.xlu0 %v411_v13, %s3099_s7  ;;  %400 = vrot.lane.b32.xlu1 %v392_v14, %s3098_s6  ;;  %v691_v13 = vmul.f32 %v688_v8, %v3314_v4  ;;  %v690_v14 = vmul.f32 %v688_v8, %v3311_v2  ;;  %v829_v43 = vmul.f32 %v828_v39, %v3347_v28  ;;  %s2746_s20 = sld [smem:[#allocation4 + $0x25]]  ;;  %vm1585_vm2 = vcmask 1022976  }
  0xea   : > { %v830_v48 = vmul.f32 %v828_v39, %v3359_v36  ;;  %s2749_s27 = sld [smem:[#allocation4 + $0x3a]] }
  0xed   : > { %421 = vrot.lane.b32.xlu0 %v413_v15, %s3099_s7  ;;  %419 = vrot.lane.b32.xlu1 %v412_v16, %s3099_s7  ;;  %v710_v15 = vstv %s2731_s8  ;;  %s2743_s8 = sld [smem:[#allocation4 + $0x10]] }
  0xee   : > { %v712_v16 = vmul.f32 %v710_v15, %v3311_v2  ;;  %v711_v17 = vmul.f32 %v710_v15, %v3306_v63  ;;  %v713_v20 = vmul.f32 %v710_v15, %v3314_v4 }
  0xf1   : > { %440 = vrot.lane.b32.xlu0 %v433_v18, %s3100_s9  ;;  %438 = vrot.lane.b32.xlu1 %v432_v19, %s3100_s9  ;;  %v732_v18 = vstv %s2732_s10  ;;  %s2744_s10 = sld [smem:[#allocation4 + $0x17]] }
  0xf2   : > { %v733_v19 = vmul.f32 %v732_v18, %v3306_v63 }
  0xf5   : > { %459 = vrot.lane.b32.xlu0 %v453_v22, %s3101_s24  ;;  %442 = vrot.lane.b32.xlu1 %v434_v23, %s3100_s9  ;;  %v735_v22 = vmul.f32 %v732_v18, %v3314_v4  ;;  %v734_v23 = vmul.f32 %v732_v18, %v3311_v2 }
  0xf9   : > { %463 = vrot.lane.b32.xlu0 %v455_v25, %s3101_s24  ;;  %461 = vrot.lane.b32.xlu1 %v454_v26, %s3101_s24  ;;  %v756_v25 = vmul.f32 %v754_v24, %v3311_v2  ;;  %v755_v26 = vmul.f32 %v754_v24, %v3306_v63 }
  0xfd   : > { %482 = vrot.lane.b32.xlu0 %v475_v30, %s3102_s26  ;;  %480 = vrot.lane.b32.xlu1 %v474_v31, %s3102_s26  ;;  %v757_v30 = vmul.f32 %v754_v24, %v3314_v4  ;;  %v787_v31 = vmul.f32 %v784_v27, %v3355_v34 }
 0x101   : > { %507 = vrot.lane.b32.xlu0 %v501_v33, %s3097_s4  ;;  %484 = vrot.lane.b32.xlu1 %v476_v35, %s3102_s26  ;;  %v806_v33 = vstv %s2736_s22  ;;  %s2747_s22 = sld [smem:[#allocation4 + $0x2c]] }
 0x105   : > { %511 = vrot.lane.b32.xlu0 %v503_v37, %s3097_s4  ;;  %509 = vrot.lane.b32.xlu1 %v502_v38, %s3097_s4  ;;  %v808_v37 = vmul.f32 %v806_v33, %v3359_v36  ;;  %v807_v38 = vmul.f32 %v806_v33, %v3347_v28 }
 0x109   : > { %529 = vrot.lane.b32.xlu0 %v522_v40, %s3098_s6  ;;  %527 = vrot.lane.b32.xlu1 %v521_v42, %s3098_s6 }
 0x10d   : > { %547 = vrot.lane.b32.xlu0 %v541_v44, %s3099_s7  ;;  %531 = vrot.lane.b32.xlu1 %v523_v45, %s3098_s6  ;;  %v809_v44 = vmul.f32 %v806_v33, %v3355_v34 }
 0x111   : > { %551 = vrot.lane.b32.xlu0 %v543_v46, %s3099_s7  ;;  %549 = vrot.lane.b32.xlu1 %v542_v47, %s3099_s7  ;;  %v831_v47 = vmul.f32 %v828_v39, %v3355_v34 }
 0x115   : > { %569 = vrot.lane.b32.xlu0 %v562_v49, %s3100_s9  ;;  %567 = vrot.lane.b32.xlu1 %v561_v50, %s3100_s9  ;;  %v850_v49 = vstv %s2738_s29  ;;  %s2750_s29 = sld [smem:[#allocation4 + $0x41]] }
 0x119   : > { %587 = vrot.lane.b32.xlu0 %v581_v52, %s3101_s24  ;;  %571 = vrot.lane.b32.xlu1 %v563_v53, %s3100_s9  ;;  %v852_v52 = vmul.f32 %v850_v49, %v3359_v36  ;;  %v851_v53 = vmul.f32 %v850_v49, %v3347_v28 }
 0x11d   : > { %591 = vrot.lane.b32.xlu0 %v583_v54, %s3101_s24  ;;  %589 = vrot.lane.b32.xlu1 %v582_v55, %s3101_s24  ;;  %v872_v54 = vstv %s2739_s30  ;;  %s2751_s30 = sld [smem:[#allocation4 + $0x48]] }
 0x121   : > { %609 = vrot.lane.b32.xlu0 %v602_v57, %s3102_s26  ;;  %607 = vrot.lane.b32.xlu1 %v601_v58, %s3102_s26  ;;  %v873_v57 = vmul.f32 %v872_v54, %v3347_v28  ;;  %v853_v58 = vmul.f32 %v850_v49, %v3355_v34  ;;  %v1051_v49 = vstv %s2746_s20  ;;  %s3103_s20 = smov 2  }
 0x125   : > { %651 = vrot.lane.b32.xlu0 %v645_v61, %s3097_s4  ;;  %611 = vrot.lane.b32.xlu1 %v603_v62, %s3102_s26  ;;  %v875_v62 = vmul.f32 %v872_v54, %v3355_v34 }
 0x129   : > { %655 = vrot.lane.b32.xlu0 %v647_v0, %s3097_s4  ;;  %653 = vrot.lane.b32.xlu1 %v646_v1, %s3097_s4  ;;  %v874_v0 = vmul.f32 %v872_v54, %v3359_v36  ;;  %v894_v1 = vstv %s2740_s5  ;;  %v1053_v54 = vmul.f32 %v1051_v49, %v3311_v2  ;;  %s2752_s5 = sld [smem:[#allocation4 + $0x4f]] }
 0x12a   : > { %v895_v8 = vmul.f32 %v894_v1, %v3347_v28  ;;  %v897_v15 = vmul.f32 %v894_v1, %v3355_v34 }
 0x12d   : > { %675 = vrot.lane.b32.xlu0 %v668_v6, %s3098_s6  ;;  %673 = vrot.lane.b32.xlu1 %v667_v7, %s3098_s6  ;;  %v896_v7 = vmul.f32 %v894_v1, %v3359_v36 }
 0x131   : > { %695 = vrot.lane.b32.xlu0 %v689_v9, %s3099_s7  ;;  %677 = vrot.lane.b32.xlu1 %v669_v10, %s3098_s6  ;;  %v963_v9 = vstv %s2742_s21  ;;  %s2753_s21 = sld [smem:[#allocation4 + $0x56]] }
 0x135   : > { %699 = vrot.lane.b32.xlu0 %v691_v13, %s3099_s7  ;;  %697 = vrot.lane.b32.xlu1 %v690_v14, %s3099_s7  ;;  %v965_v14 = vmul.f32 %v963_v9, %v3311_v2 }
 0x139   : > { %719 = vrot.lane.b32.xlu0 %v712_v16, %s3100_s9  ;;  %717 = vrot.lane.b32.xlu1 %v711_v17, %s3100_s9  ;;  %v985_v16 = vstv %s2743_s8  ;;  %s2754_s8 = sld [smem:[#allocation4 + $0x5d]] }
 0x13a   : > { %v988_v24 = vmul.f32 %v985_v16, %v3314_v4 }
 0x13d   : > { %739 = vrot.lane.b32.xlu0 %v733_v19, %s3101_s24  ;;  %721 = vrot.lane.b32.xlu1 %v713_v20, %s3100_s9  ;;  %v986_v19 = vmul.f32 %v985_v16, %v3306_v63  ;;  %v964_v20 = vmul.f32 %v963_v9, %v3306_v63 }
 0x13f   : > { %v1213_v3 = vstv %s2754_s8  ;;  %s3708_s8 = sld [smem:[#allocation4 + $0x32]] }
 0x141   : > { %743 = vrot.lane.b32.xlu0 %v735_v22, %s3101_s24  ;;  %741 = vrot.lane.b32.xlu1 %v734_v23, %s3101_s24 }
 0x145   : > { %763 = vrot.lane.b32.xlu0 %v756_v25, %s3102_s26  ;;  %761 = vrot.lane.b32.xlu1 %v755_v26, %s3102_s26  ;;  %v966_v25 = vmul.f32 %v963_v9, %v3314_v4  ;;  %v1007_v26 = vstv %s2744_s10  ;;  %s2756_s10 = sld [smem:[#allocation4 + $0xa]] }
 0x146   : > { %v1008_v39 = vmul.f32 %v1007_v26, %v3306_v63 }
 0x149   : > { %791 = vrot.lane.b32.xlu0 %v785_v29, %s3097_s4  ;;  %765 = vrot.lane.b32.xlu1 %v757_v30, %s3102_s26  ;;  %v1009_v30 = vmul.f32 %v1007_v26, %v3311_v2 }
 0x14d   : > { %795 = vrot.lane.b32.xlu0 %v787_v31, %s3097_s4  ;;  %793 = vrot.lane.b32.xlu1 %v786_v32, %s3097_s4  ;;  %v987_v31 = vmul.f32 %v985_v16, %v3311_v2  ;;  %v1029_v32 = vstv %s2745_s25  ;;  %v1103_v16 = vstv %s2749_s27  ;;  %s2757_s25 = sld [smem:[#allocation4 + $0x11]] }
 0x14e   : > { %s2759_s27 = sld [smem:[#allocation4 + $0x1f]] }
 0x14f   : > { %v3439_v35 = vpop.permute.xlu0 %375 }
 0x150   : > { %4670 = vst [vmem:[#allocation21_spill] sm:$0xff] %v3439_v35 }
 0x151   : > { %815 = vrot.lane.b32.xlu0 %v808_v37, %s3098_s6  ;;  %813 = vrot.lane.b32.xlu1 %v807_v38, %s3098_s6  ;;  %v1030_v38 = vmul.f32 %v1029_v32, %v3306_v63 }
 0x153   : > { %v3445_v40 = vpop.permute.xlu1 %377  ;;  %v3447_v42 = vpop.permute.xlu0 %379 }
 0x154   : > { %4671 = vst [vmem:[#allocation22_spill] sm:$0xff] %v3445_v40  ;;  %4672 = vst [vmem:[#allocation23_spill] sm:$0xff] %v3447_v42 }
 0x155   : > { %835 = vrot.lane.b32.xlu0 %v829_v43, %s3099_s7  ;;  %817 = vrot.lane.b32.xlu1 %v809_v44, %s3098_s6 }
 0x157   : > { %v3453_v45 = vpop.permute.xlu1 %396  ;;  %v3455_v46 = vpop.permute.xlu0 %398 }
 0x158   : > { %4673 = vst [vmem:[#allocation24_spill] sm:$0xff] %v3453_v45  ;;  %4674 = vst [vmem:[#allocation25_spill] sm:$0xff] %v3455_v46 }
 0x159   : > { %839 = vrot.lane.b32.xlu0 %v831_v47, %s3099_s7  ;;  %837 = vrot.lane.b32.xlu1 %v830_v48, %s3099_s7  ;;  %v1032_v47 = vmul.f32 %v1029_v32, %v3314_v4  ;;  %v1010_v48 = vmul.f32 %v1007_v26, %v3314_v4  ;;  %v1125_v26 = vstv %s2750_s29  ;;  %s2727_s29 = sld [smem:[#allocation4 + $0x1]] }
 0x15b   : > { %v3461_v50 = vpop.permute.xlu1 %400  ;;  %v3463_v51 = vpop.permute.xlu0 %417 }
 0x15c   : > { %4675 = vst [vmem:[#allocation26_spill] sm:$0xff] %v3461_v50  ;;  %4676 = vst [vmem:[#allocation27_spill] sm:$0xff] %v3463_v51 }
 0x15d   : > { %859 = vrot.lane.b32.xlu0 %v852_v52, %s3100_s9  ;;  %857 = vrot.lane.b32.xlu1 %v851_v53, %s3100_s9 }
 0x15f   : > { %v3469_v55 = vpop.permute.xlu1 %419  ;;  %v3471_v56 = vpop.permute.xlu0 %421 }
 0x160   : > { %4677 = vst [vmem:[#allocation28_spill] sm:$0xff] %v3469_v55  ;;  %4678 = vst [vmem:[#allocation29_spill] sm:$0xff] %v3471_v56 }
 0x161   : > { %879 = vrot.lane.b32.xlu0 %v873_v57, %s3101_s24  ;;  %861 = vrot.lane.b32.xlu1 %v853_v58, %s3100_s9  ;;  %v1031_v57 = vmul.f32 %v1029_v32, %v3311_v2  ;;  %v1073_v58 = vstv %s2747_s22  ;;  %v1126_v32 = vmul.f32 %v1125_v26, %v3347_v28  ;;  %s2758_s22 = sld [smem:[#allocation4 + $0x18]] }
 0x162   : > { %v1074_v1 = vmul.f32 %v1073_v58, %v3306_v63 }
 0x163   : > { %v3477_v59 = vpop.permute.xlu1 %438  ;;  %v3479_v61 = vpop.permute.xlu0 %440 }
 0x164   : > { %4679 = vst [vmem:[#allocation30_spill] sm:$0xff] %v3477_v59  ;;  %4680 = vst [vmem:[#allocation31_spill] sm:$0xff] %v3479_v61 }
 0x165   : > { %883 = vrot.lane.b32.xlu0 %v875_v62, %s3101_s24  ;;  %881 = vrot.lane.b32.xlu1 %v874_v0, %s3101_s24 }
 0x167   : > { %v3485_v5 = vpop.permute.xlu1 %442  ;;  %v3487_v6 = vpop.permute.xlu0 %459 }
 0x168   : > { %4681 = vst [vmem:[#allocation32_spill] sm:$0xff] %v3485_v5  ;;  %4682 = vst [vmem:[#allocation33_spill] sm:$0xff] %v3487_v6 }
 0x169   : > { %903 = vrot.lane.b32.xlu0 %v896_v7, %s3102_s26  ;;  %901 = vrot.lane.b32.xlu1 %v895_v8, %s3102_s26  ;;  %v1052_v7 = vmul.f32 %v1051_v49, %v3306_v63 }
 0x16b   : > { %v3493_v10 = vpop.permute.xlu1 %461  ;;  %v3495_v13 = vpop.permute.xlu0 %463 }
 0x16c   : > { %4683 = vst [vmem:[#allocation34_spill] sm:$0xff] %v3493_v10  ;;  %4684 = vst [vmem:[#allocation35_spill] sm:$0xff] %v3495_v13 }
 0x16d   : > { %972 = vrot.lane.b32.xlu0 %v965_v14, %s3097_s4  ;;  %905 = vrot.lane.b32.xlu1 %v897_v15, %s3102_s26  ;;  %v1076_v14 = vmul.f32 %v1073_v58, %v3314_v4  ;;  %v1054_v15 = vmul.f32 %v1051_v49, %v3314_v4  ;;  %v1106_v49 = vmul.f32 %v1103_v16, %v3355_v34 }
 0x16f   : > { %v3501_v17 = vpop.permute.xlu1 %480  ;;  %v3503_v18 = vpop.permute.xlu0 %482 }
 0x170   : > { %4685 = vst [vmem:[#allocation36_spill] sm:$0xff] %v3501_v17  ;;  %4686 = vst [vmem:[#allocation37_spill] sm:$0xff] %v3503_v18 }
 0x171   : > { %992 = vrot.lane.b32.xlu0 %v986_v19, %s3098_s6  ;;  %970 = vrot.lane.b32.xlu1 %v964_v20, %s3097_s4 }
 0x173   : > { %v3509_v22 = vpop.permute.xlu1 %484  ;;  %v3511_v23 = vpop.permute.xlu0 %507 }
 0x174   : > { %4687 = vst [vmem:[#allocation38_spill] sm:$0xff] %v3509_v22  ;;  %4688 = vst [vmem:[#allocation39_spill] sm:$0xff] %v3511_v23 }
 0x175   : > { %996 = vrot.lane.b32.xlu0 %v988_v24, %s3098_s6  ;;  %974 = vrot.lane.b32.xlu1 %v966_v25, %s3097_s4  ;;  %v1105_v24 = vmul.f32 %v1103_v16, %v3359_v36  ;;  %v1075_v25 = vmul.f32 %v1073_v58, %v3311_v2 }
 0x177   : > { %v3517_v27 = vpop.permute.xlu1 %509  ;;  %v3519_v29 = vpop.permute.xlu0 %511 }
 0x178   : > { %4689 = vst [vmem:[#allocation40_spill] sm:$0xff] %v3517_v27  ;;  %4690 = vst [vmem:[#allocation41_spill] sm:$0xff] %v3519_v29  ;;  %v3689_v29 = vstv %s2727_s29  ;;  %s2748_s29 = sld [smem:[#allocation4 + $0x33]] }
 0x179   : > { %1016 = vrot.lane.b32.xlu0 %v1009_v30, %s3099_s7  ;;  %994 = vrot.lane.b32.xlu1 %v987_v31, %s3098_s6 }
 0x17b   : > { %v3525_v33 = vpop.permute.xlu1 %527  ;;  %v3527_v37 = vpop.permute.xlu0 %529 }
 0x17c   : > { %4691 = vst [vmem:[#allocation42_spill] sm:$0xff] %v3525_v33  ;;  %4692 = vst [vmem:[#allocation43_spill] sm:$0xff] %v3527_v37  ;;  %v1348_v33 = vstv %s2759_s27  ;;  %s2741_s27 = sld [smem:[#allocation4 + $0x2]] }
 0x17d   : > { %1036 = vrot.lane.b32.xlu0 %v1030_v38, %s3100_s9  ;;  %1014 = vrot.lane.b32.xlu1 %v1008_v39, %s3099_s7  ;;  %v1104_v38 = vmul.f32 %v1103_v16, %v3347_v28  ;;  %v1351_v17 = vmul.f32 %v1348_v33, %v3314_v4 }
 0x17f   : > { %v3533_v43 = vpop.permute.xlu1 %531  ;;  %v3535_v44 = vpop.permute.xlu0 %547 }
 0x180   : > { %4693 = vst [vmem:[#allocation44_spill] sm:$0xff] %v3533_v43  ;;  %4694 = vst [vmem:[#allocation45_spill] sm:$0xff] %v3535_v44 }
 0x181   : > { %1040 = vrot.lane.b32.xlu0 %v1032_v47, %s3100_s9  ;;  %1018 = vrot.lane.b32.xlu1 %v1010_v48, %s3099_s7  ;;  %v1128_v48 = vmul.f32 %v1125_v26, %v3355_v34 }
 0x183   : > { %v3541_v52 = vpop.permute.xlu1 %549  ;;  %v3543_v53 = vpop.permute.xlu0 %551 }
 0x184   : > { %4695 = vst [vmem:[#allocation46_spill] sm:$0xff] %v3541_v52  ;;  %4696 = vst [vmem:[#allocation47_spill] sm:$0xff] %v3543_v53  ;;  %v1326_v53 = vstv %s2758_s22  ;;  %s3104_s22 = smov 127  }
 0x185   : > { %1060 = vrot.lane.b32.xlu0 %v1053_v54, %s3101_s24  ;;  %1038 = vrot.lane.b32.xlu1 %v1031_v57, %s3100_s9  ;;  %v1147_v54 = vstv %s2751_s30  ;;  %v1327_v44 = vmul.f32 %v1326_v53, %v3306_v63  ;;  %s2760_s30 = sld [smem:[#allocation4 + $0x26]] }
 0x187   : > { %v3549_v62 = vpop.permute.xlu1 %567  ;;  %v3551_v0 = vpop.permute.xlu0 %569 }
 0x188   : > { %4697 = vst [vmem:[#allocation48_spill] sm:$0xff] %v3549_v62  ;;  %4698 = vst [vmem:[#allocation49_spill] sm:$0xff] %v3551_v0  ;;  %v1304_v62 = vstv %s2757_s25  ;;  %s2765_s25 = sld [smem:[#allocation4 + $0x49]] }
 0x189   : > { %1080 = vrot.lane.b32.xlu0 %v1074_v1, %s3102_s26  ;;  %1058 = vrot.lane.b32.xlu1 %v1052_v7, %s3101_s24  ;;  %v1149_v1 = vmul.f32 %v1147_v54, %v3359_v36  ;;  %v1127_v7 = vmul.f32 %v1125_v26, %v3359_v36 }
 0x18b   : > { %v3557_v8 = vpop.permute.xlu1 %571  ;;  %v3559_v9 = vpop.permute.xlu0 %587  ;;  %v1370_v23 = vstv %s2760_s30  ;;  %s3105_s30 = smov 126  }
 0x18c   : > { %4699 = vst [vmem:[#allocation50_spill] sm:$0xff] %v3557_v8  ;;  %4700 = vst [vmem:[#allocation51_spill] sm:$0xff] %v3559_v9  ;;  %v1282_v9 = vstv %s2756_s10  ;;  %v1371_v18 = vmul.f32 %v1370_v23, %v3306_v63  ;;  %s2764_s10 = sld [smem:[#allocation4 + $0x42]] }
 0x18d   : > { %1084 = vrot.lane.b32.xlu0 %v1076_v14, %s3102_s26  ;;  %1062 = vrot.lane.b32.xlu1 %v1054_v15, %s3101_s24  ;;  %v1169_v14 = vstv %s2752_s5  ;;  %s2761_s5 = sld [smem:[#allocation4 + $0x2d]] }
 0x18f   : > { %v3565_v19 = vpop.permute.xlu1 %589  ;;  %v3567_v20 = vpop.permute.xlu0 %591 }
 0x190   : > { %4701 = vst [vmem:[#allocation52_spill] sm:$0xff] %v3565_v19  ;;  %4702 = vst [vmem:[#allocation53_spill] sm:$0xff] %v3567_v20 }
 0x191   : > { %1112 = vrot.lane.b32.xlu0 %v1105_v24, %s3097_s4  ;;  %1082 = vrot.lane.b32.xlu1 %v1075_v25, %s3102_s26  ;;  %v1148_v24 = vmul.f32 %v1147_v54, %v3347_v28  ;;  %v1170_v25 = vmul.f32 %v1169_v14, %v3347_v28 }
 0x192   : > { %v1444_v56 = vstv %s2764_s10  ;;  %s2755_s10 = sld [smem:[#allocation4 + $0x3]] }
 0x193   : > { %v3573_v30 = vpop.permute.xlu1 %607  ;;  %v3575_v31 = vpop.permute.xlu0 %609 }
 0x194   : > { %4703 = vst [vmem:[#allocation54_spill] sm:$0xff] %v3573_v30  ;;  %4704 = vst [vmem:[#allocation55_spill] sm:$0xff] %v3575_v31 }
 0x195   : > { %1132 = vrot.lane.b32.xlu0 %v1126_v32, %s3098_s6  ;;  %1110 = vrot.lane.b32.xlu1 %v1104_v38, %s3097_s4  ;;  %v1150_v38 = vmul.f32 %v1147_v54, %v3355_v34 }
 0x197   : > { %v3581_v39 = vpop.permute.xlu1 %611  ;;  %v3583_v47 = vpop.permute.xlu0 %651 }
 0x198   : > { %4705 = vst [vmem:[#allocation56_spill] sm:$0xff] %v3581_v39 }
 0x199   : > { %1136 = vrot.lane.b32.xlu0 %v1128_v48, %s3098_s6  ;;  %1114 = vrot.lane.b32.xlu1 %v1106_v49, %s3097_s4  ;;  %v1172_v48 = vmul.f32 %v1169_v14, %v3355_v34  ;;  %v1191_v49 = vstv %s2753_s21  ;;  %s2763_s21 = sld [smem:[#allocation4 + $0x3b]] }
 0x19b   : > { %v3589_v57 = vpop.permute.xlu1 %653  ;;  %v3591_v58 = vpop.permute.xlu0 %655 }
 0x19c   : > { %v658_v42 = vsel %vm381_vm3, %v3589_v57, %v3591_v58 }
 0x19d   : > { %1156 = vrot.lane.b32.xlu0 %v1149_v1, %s3099_s7  ;;  %1134 = vrot.lane.b32.xlu1 %v1127_v7, %s3098_s6 }
 0x19f   : > { %v3597_v15 = vpop.permute.xlu1 %673  ;;  %v3599_v16 = vpop.permute.xlu0 %675 }
 0x1a1   : > { %1154 = vrot.lane.b32.xlu1 %v1148_v24, %s3099_s7  ;;  %1176 = vrot.lane.b32.xlu0 %v1170_v25, %s3100_s9  ;;  %v1171_v24 = vmul.f32 %v1169_v14, %v3359_v36  ;;  %v1193_v25 = vmul.f32 %v1191_v49, %v3359_v36  ;;  %v1235_v14 = vld [vmem:[#allocation8 + $0x2] ss:$8 sm:$0x3] }
 0x1a2   : > { %v1244_v31 = vrot.slane %v1235_v14, %v3281_v11  ;;  %v638_v11 = vmul.f32 %v3689_v29, %v3311_v2 }
 0x1a3   : > { %v3605_v26 = vpop.permute.xlu1 %677  ;;  %v3607_v32 = vpop.permute.xlu0 %695 }
 0x1a5   : > { %1158 = vrot.lane.b32.xlu1 %v1150_v38, %s3099_s7  ;;  %1180 = vrot.lane.b32.xlu0 %v1172_v48, %s3100_s9  ;;  %v1192_v38 = vmul.f32 %v1191_v49, %v3347_v28  ;;  %v1214_v48 = vmul.f32 %v1213_v3, %v3347_v28 }
 0x1a7   : > { %v3613_v1 = vpop.permute.xlu1 %697  ;;  %v3615_v7 = vpop.permute.xlu0 %699 }
 0x1a9   : > { %1178 = vrot.lane.b32.xlu1 %v1171_v24, %s3100_s9  ;;  %1200 = vrot.lane.b32.xlu0 %v1193_v25, %s3101_s24  ;;  %v1194_v24 = vmul.f32 %v1191_v49, %v3355_v34  ;;  %v1216_v25 = vmul.f32 %v1213_v3, %v3355_v34  ;;  %v1240_v49 = vrot.slane %v1235_v14, %v3283_v12 }
 0x1aa   : > { %v663_v12 = vadd.f32 %v658_v42, %v638_v11 }
 0x1ab   : > { %v3621_v54 = vpop.permute.xlu1 %717  ;;  %v3623_v41 = vpop.permute.xlu0 %719 }
 0x1ad   : > { %1198 = vrot.lane.b32.xlu1 %v1192_v38, %s3101_s24  ;;  %1220 = vrot.lane.b32.xlu0 %v1214_v48, %s3102_s26  ;;  %v1215_v48 = vmul.f32 %v1213_v3, %v3359_v36 }
 0x1af   : > { %v3629_v39 = vpop.permute.xlu1 %721  ;;  %v3631_v30 = vpop.permute.xlu0 %739 }
 0x1b0   : > { %v724_v11 = vsel %vm444_vm6, %v3623_v41, %v3629_v39 }
 0x1b1   : > { %1202 = vrot.lane.b32.xlu1 %v1194_v24, %s3101_s24  ;;  %1224 = vrot.lane.b32.xlu0 %v1216_v25, %s3102_s26  ;;  %v1283_v25 = vmul.f32 %v1282_v9, %v3306_v63 }
 0x1b3   : > { %v3638_v20 = vpop.permute.xlu1 %741  ;;  %v3640_v38 = vpop.permute.xlu0 %743 }
 0x1b5   : > { %1222 = vrot.lane.b32.xlu1 %v1215_v48, %s3102_s26  ;;  %1247 = vrot.lane.b32.xlu0 %v1244_v31, %s3103_s20  ;;  %v1284_v48 = vmul.f32 %v1282_v9, %v3311_v2  ;;  %v1285_v31 = vmul.f32 %v1282_v9, %v3314_v4 }
 0x1b7   : > { %v3645_v19 = vpop.permute.xlu1 %761  ;;  %v3647_v24 = vpop.permute.xlu0 %763 }
 0x1b9   : > { %1245 = vrot.lane.b32.xlu1 %v1240_v49, %s3103_s20  ;;  %1289 = vrot.lane.b32.xlu0 %v1283_v25, %s3097_s4  ;;  %v1305_v49 = vmul.f32 %v1304_v62, %v3306_v63  ;;  %v1306_v25 = vmul.f32 %v1304_v62, %v3311_v2  ;;  %s2766_s20 = sld [smem:[#allocation4 + $0x50]] }
 0x1bb   : > { %v3651_v8 = vpop.permute.xlu1 %765  ;;  %v3653_v3 = vpop.permute.xlu0 %791 }
 0x1bd   : > { %1291 = vrot.lane.b32.xlu1 %v1284_v48, %s3097_s4  ;;  %1293 = vrot.lane.b32.xlu0 %v1285_v31, %s3097_s4  ;;  %v1307_v31 = vmul.f32 %v1304_v62, %v3314_v4 }
 0x1bf   : > { %v3659_v14 = vpop.permute.xlu1 %793  ;;  %v3661_v0 = vpop.permute.xlu0 %795 }
 0x1c1   : > { %1311 = vrot.lane.b32.xlu1 %v1305_v49, %s3098_s6  ;;  %1313 = vrot.lane.b32.xlu0 %v1306_v25, %s3098_s6  ;;  %v1328_v49 = vmul.f32 %v1326_v53, %v3311_v2  ;;  %v1329_v25 = vmul.f32 %v1326_v53, %v3314_v4  ;;  %v639_v53 = vmul.f32 %v3689_v29, %v3314_v4 }
 0x1c3   : > { %v3667_v9 = vpop.permute.xlu1 %813  ;;  %v3669_v48 = vpop.permute.xlu0 %815 }
 0x1c5   : > { %1315 = vrot.lane.b32.xlu1 %v1307_v31, %s3098_s6  ;;  %1333 = vrot.lane.b32.xlu0 %v1327_v44, %s3099_s7  ;;  %v1349_v31 = vmul.f32 %v1348_v33, %v3306_v63  ;;  %v1350_v44 = vmul.f32 %v1348_v33, %v3311_v2  ;;  %v637_v33 = vmul.f32 %v3689_v29, %v3306_v63 }
 0x1c7   : > { %v3675_v52 = vpop.permute.xlu1 %817  ;;  %v3677_v43 = vpop.permute.xlu0 %835 }
 0x1c9   : > { %1335 = vrot.lane.b32.xlu1 %v1328_v49, %s3099_s7  ;;  %1337 = vrot.lane.b32.xlu0 %v1329_v25, %s3099_s7  ;;  %v664_v49 = vadd.f32 %v3591_v58, %v639_v53 }
 0x1cb   : > { %v3683_v62 = vpop.permute.xlu1 %837  ;;  %v3685_v37 = vpop.permute.xlu0 %839  ;;  %v686_v22 = vadd.f32 %v3605_v26, %v664_v49  ;;  %v679_v49 = vsel %vm402_vm4, %v3597_v15, %v3599_v16 }
 0x1cd   : > { %1355 = vrot.lane.b32.xlu1 %v1349_v31, %s3100_s9  ;;  %1357 = vrot.lane.b32.xlu0 %v1350_v44, %s3100_s9  ;;  %v657_v31 = vsel %vm381_vm3, %v3583_v47, %v3589_v57  ;;  %v708_v44 = vadd.f32 %v3615_v7, %v686_v22  ;;  %v1392_v47 = vstv %s2761_s5  ;;  %v701_v22 = vsel %vm423_vm5, %v3607_v32, %v3613_v1  ;;  %s2767_s5 = sld [smem:[#allocation4 + $0x57]] }
 0x1ce   : > { %v662_v10 = vadd.f32 %v657_v31, %v637_v33  ;;  %v1393_v31 = vmul.f32 %v1392_v47, %v3306_v63  ;;  %v1394_v33 = vmul.f32 %v1392_v47, %v3311_v2 }
 0x1cf   : > { %v3696_v25 = vpop.permute.xlu1 %857  ;;  %v3698_v27 = vpop.permute.xlu0 %859  ;;  %v730_v13 = vadd.f32 %v3629_v39, %v708_v44  ;;  %v723_v44 = vsel %vm444_vm6, %v3621_v54, %v3623_v41 }
 0x1d0   : > { %v684_v59 = vadd.f32 %v679_v49, %v662_v10 }
 0x1d1   : > { %1359 = vrot.lane.b32.xlu1 %v1351_v17, %s3100_s9  ;;  %1377 = vrot.lane.b32.xlu0 %v1371_v18, %s3101_s24  ;;  %v1372_v17 = vmul.f32 %v1370_v23, %v3311_v2  ;;  %v1373_v18 = vmul.f32 %v1370_v23, %v3314_v4  ;;  %v752_v23 = vadd.f32 %v3640_v38, %v730_v13 }
 0x1d2   : > { %v706_v32 = vadd.f32 %v701_v22, %v684_v59  ;;  %v745_v13 = vsel %vm465_vm7, %v3631_v30, %v3638_v20  ;;  %v1395_v59 = vmul.f32 %v1392_v47, %v3314_v4 }
 0x1d3   : > { %v3713_v53 = vpop.permute.xlu1 %861  ;;  %v3715_v6 = vpop.permute.xlu0 %879  ;;  %v774_v10 = vadd.f32 %v3651_v8, %v752_v23  ;;  %v767_v23 = vsel %vm486_vm8, %v3645_v19, %v3647_v24 }
 0x1d4   : > { %v728_v49 = vadd.f32 %v723_v44, %v706_v32 }
 0x1d5   : > { %1379 = vrot.lane.b32.xlu1 %v1372_v17, %s3101_s24  ;;  %1381 = vrot.lane.b32.xlu0 %v1373_v18, %s3101_s24  ;;  %v1422_v17 = vstv %s2763_s21  ;;  %v3745_v18 = vstv %s3708_s8  ;;  %s2768_s21 = sld [smem:[#allocation4 + $0x5e]]  ;;  %s3106_s8 = smov 3  }
 0x1d6   : > { %v779_v54 = vmul.f32 %v3745_v18, %v3355_v34  ;;  %v1423_v22 = vmul.f32 %v1422_v17, %v3347_v28  ;;  %v1424_v47 = vmul.f32 %v1422_v17, %v3359_v36  ;;  %v1425_v55 = vmul.f32 %v1422_v17, %v3355_v34 }
 0x1d7   : > { %v3729_v61 = vpop.permute.xlu1 %881  ;;  %v3731_v15 = vpop.permute.xlu0 %883  ;;  %v777_v19 = vmul.f32 %v3745_v18, %v3347_v28 }
 0x1d8   : > { %v782_v30 = vadd.f32 %v779_v54, %v774_v10  ;;  %v797_v10 = vsel %vm381_vm3, %v3653_v3, %v3659_v14 }
 0x1d9   : > { %1399 = vrot.lane.b32.xlu1 %v1393_v31, %s3102_s26  ;;  %1401 = vrot.lane.b32.xlu0 %v1394_v33, %s3102_s26  ;;  %v750_v31 = vadd.f32 %v745_v13, %v728_v49 }
 0x1da   : > { %v804_v13 = vadd.f32 %v3661_v0, %v782_v30 }
 0x1db   : > { %v902_v5 = vpop.permute.xlu1 %901  ;;  %v3749_v51 = vpop.permute.xlu0 %903  ;;  %v772_v33 = vadd.f32 %v767_v23, %v750_v31  ;;  %v1446_v23 = vmul.f32 %v1444_v56, %v3359_v36  ;;  %v819_v31 = vsel %vm402_vm4, %v3667_v9, %v3669_v48  ;;  %v1447_v9 = vmul.f32 %v1444_v56, %v3355_v34 }
 0x1dc   : > { %v826_v54 = vadd.f32 %v3675_v52, %v804_v13 }
 0x1dd   : > { %1403 = vrot.lane.b32.xlu1 %v1395_v59, %s3102_s26  ;;  %1429 = vrot.lane.b32.xlu0 %v1423_v22, %s3097_s4  ;;  %v780_v49 = vadd.f32 %v777_v19, %v772_v33  ;;  %v1445_v22 = vmul.f32 %v1444_v56, %v3347_v28  ;;  %v841_v33 = vsel %vm423_vm5, %v3677_v43, %v3683_v62 }
 0x1de   : > { %v848_v3 = vadd.f32 %v3685_v37, %v826_v54  ;;  %v885_v43 = vsel %vm465_vm7, %v3715_v6, %v3729_v61 }
 0x1df   : > { %v3758_v44 = vpop.permute.xlu1 %905  ;;  %v3760_v32 = vpop.permute.xlu0 %972  ;;  %v802_v30 = vadd.f32 %v797_v10, %v780_v49  ;;  %v863_v49 = vsel %vm444_vm6, %v3696_v25, %v3698_v27 }
 0x1e0   : > { %v870_v19 = vadd.f32 %v3713_v53, %v848_v3 }
 0x1e1   : > { %1431 = vrot.lane.b32.xlu1 %v1424_v47, %s3097_s4  ;;  %1433 = vrot.lane.b32.xlu0 %v1425_v55, %s3097_s4  ;;  %v1466_v55 = vstv %s2765_s25  ;;  %v824_v47 = vadd.f32 %v819_v31, %v802_v30  ;;  %s2762_s25 = sld [smem:[#allocation4 + $0x34]] }
 0x1e2   : > { %v1467_v10 = vmul.f32 %v1466_v55, %v3347_v28  ;;  %v1468_v3 = vmul.f32 %v1466_v55, %v3359_v36  ;;  %v1469_v25 = vmul.f32 %v1466_v55, %v3355_v34 }
 0x1e3   : > { %v3773_v59 = vpop.permute.xlu1 %970  ;;  %v3775_v17 = vpop.permute.xlu0 %992  ;;  %v846_v54 = vadd.f32 %v841_v33, %v824_v47  ;;  %v907_v33 = vsel %vm486_vm8, %v902_v5, %v3749_v51  ;;  %v3809_v47 = vstv %s2766_s20  ;;  %s2770_s20 = sld [smem:[#allocation4 + $0xb]] }
 0x1e4   : > { %4706 = vst [vmem:[#allocation57_spill] sm:$0xff] %v3809_v47  ;;  %v976_v57 = vsel %vm381_vm3, %v3773_v59, %v3760_v32 }
 0x1e5   : > { %1451 = vrot.lane.b32.xlu1 %v1445_v22, %s3098_s6  ;;  %1453 = vrot.lane.b32.xlu0 %v1446_v23, %s3098_s6  ;;  %v892_v22 = vadd.f32 %v3731_v15, %v870_v19  ;;  %v868_v23 = vadd.f32 %v863_v49, %v846_v54  ;;  %v1489_v54 = vmul.f32 %v3809_v47, %v3347_v28 }
 0x1e7   : > { %v975_v13 = vpop.permute.xlu1 %974  ;;  %v3789_v45 = vpop.permute.xlu0 %996  ;;  %v914_v56 = vadd.f32 %v3758_v44, %v892_v22  ;;  %v890_v19 = vadd.f32 %v885_v43, %v868_v23 }
 0x1e9   : > { %1455 = vrot.lane.b32.xlu1 %v1447_v9, %s3098_s6  ;;  %1473 = vrot.lane.b32.xlu0 %v1467_v10, %s3099_s7  ;;  %v912_v6 = vadd.f32 %v907_v33, %v890_v19  ;;  %v937_v9 = vmul.f32 %v3336_v21, %v914_v56 }
 0x1eb   : > { %v995_v31 = vpop.permute.xlu1 %994  ;;  %v3803_v30 = vpop.permute.xlu0 %1016  ;;  %v935_v5 = vmul.f32 %v3303_v60, %v912_v6 }
 0x1ed   : > { %1475 = vrot.lane.b32.xlu1 %v1468_v3, %s3099_s7  ;;  %1477 = vrot.lane.b32.xlu0 %v1469_v25, %s3099_s7  ;;  %v955_v25 = vstv %s2741_s27  ;;  %s3107_s27 = smov 125  }
 0x1ee   : > { %v958_v46 = vmul.f32 %v955_v25, %v3314_v4  ;;  %v956_v58 = vmul.f32 %v955_v25, %v3306_v63  ;;  %v957_v42 = vmul.f32 %v955_v25, %v3311_v2 }
 0x1ef   : > { %v1015_v10 = vpop.permute.xlu1 %1014  ;;  %v1037_v49 = vpop.permute.xlu0 %1036 }
 0x1f0   : > { %v1020_v41 = vsel %vm423_vm5, %v1015_v10, %v3803_v30 }
 0x1f1   : > { %1495 = vrot.lane.b32.xlu1 %v1489_v54, %s3100_s9  ;;  %945 = vrot.lane.b32.xlu0 %v937_v9, %s3104_s22  ;;  %v983_v54 = vadd.f32 %v975_v13, %v958_v46  ;;  %v680_v46 = vsel %vm402_vm4, %v3599_v16, %v3605_v26  ;;  %v977_v16 = vsel %vm381_vm3, %v3760_v32, %v975_v13 }
 0x1f2   : > { %v685_v29 = vadd.f32 %v680_v46, %v663_v12  ;;  %v981_v12 = vadd.f32 %v976_v57, %v956_v58  ;;  %v999_v46 = vsel %vm402_vm4, %v995_v31, %v3789_v45  ;;  %v746_v32 = vsel %vm465_vm7, %v3638_v20, %v3640_v38 }
 0x1f3   : > { %v1019_v55 = vpop.permute.xlu1 %1018  ;;  %v1041_v22 = vpop.permute.xlu0 %1040  ;;  %v1005_v6 = vadd.f32 %v3789_v45, %v983_v54  ;;  %v982_v13 = vadd.f32 %v977_v16, %v957_v42 }
 0x1f5   : > { %941 = vrot.lane.b32.xlu0 %v935_v5, %s3104_s22  ;;  %v1027_v5 = vadd.f32 %v1019_v55, %v1005_v6  ;;  %v702_v6 = vsel %vm423_vm5, %v3613_v1, %v3615_v7  ;;  %v998_v1 = vsel %vm402_vm4, %v3775_v17, %v995_v31  ;;  %v1021_v17 = vsel %vm423_vm5, %v3803_v30, %v1019_v55 }
 0x1f6   : > { %v707_v59 = vadd.f32 %v702_v6, %v685_v29  ;;  %v768_v6 = vsel %vm486_vm8, %v3647_v24, %v3651_v8  ;;  %v1004_v57 = vadd.f32 %v999_v46, %v982_v13  ;;  %v1095_v31 = vstv %s2748_s29  ;;  %s2772_s29 = sld [smem:[#allocation4 + $0x19]] }
 0x1f7   : > { %v1039_v43 = vpop.permute.xlu1 %1038  ;;  %v1061_v23 = vpop.permute.xlu0 %1060  ;;  %v1049_v47 = vadd.f32 %v1041_v22, %v1027_v5  ;;  %v1098_v16 = vmul.f32 %v1095_v31, %v3355_v34 }
 0x1f8   : > { %v729_v39 = vadd.f32 %v724_v11, %v707_v59  ;;  %v1042_v45 = vsel %vm444_vm6, %v1037_v49, %v1039_v43  ;;  %v1043_v10 = vsel %vm444_vm6, %v1039_v43, %v1041_v22  ;;  %v1026_v11 = vadd.f32 %v1021_v17, %v1004_v57 }
 0x1fa   : > { %v751_v38 = vadd.f32 %v746_v32, %v729_v39  ;;  %v1048_v24 = vadd.f32 %v1043_v10, %v1026_v11  ;;  %v1096_v39 = vmul.f32 %v1095_v31, %v3347_v28  ;;  %v886_v10 = vsel %vm465_vm7, %v3729_v61, %v3731_v15 }
 0x1fb   : > { %v1059_v56 = vpop.permute.xlu1 %1058  ;;  %v1081_v3 = vpop.permute.xlu0 %1080 }
 0x1fc   : > { %v1064_v30 = vsel %vm465_vm7, %v1059_v56, %v1061_v23  ;;  %v773_v55 = vadd.f32 %v768_v6, %v751_v38 }
 0x1ff   : > { %v1063_v33 = vpop.permute.xlu1 %1062  ;;  %v1085_v19 = vpop.permute.xlu0 %1084 }
 0x200   : > { %v1071_v26 = vadd.f32 %v1063_v33, %v1049_v47  ;;  %v1003_v47 = vadd.f32 %v998_v1, %v981_v12  ;;  %v1065_v42 = vsel %vm465_vm7, %v1061_v23, %v1063_v33  ;;  %v778_v12 = vmul.f32 %v3745_v18, %v3359_v36 }
 0x201   : > { %v1070_v32 = vadd.f32 %v1065_v42, %v1048_v24  ;;  %v798_v23 = vsel %vm381_vm3, %v3659_v14, %v3661_v0  ;;  %v1097_v18 = vmul.f32 %v1095_v31, %v3359_v36  ;;  %v842_v14 = vsel %vm423_vm5, %v3683_v62, %v3685_v37 }
 0x202   : > { %v1093_v25 = vadd.f32 %v1085_v19, %v1071_v26  ;;  %v1025_v58 = vadd.f32 %v1020_v41, %v1003_v47  ;;  %v781_v56 = vadd.f32 %v778_v12, %v773_v55  ;;  %v908_v55 = vsel %vm486_vm8, %v3749_v51, %v3758_v44 }
 0x203   : > { %v1083_v50 = vpop.permute.xlu1 %1082  ;;  %v3821_v35 = vpop.permute.xlu0 %1112 }
 0x204   : > { %v1047_v26 = vadd.f32 %v1042_v45, %v1025_v58  ;;  %v1101_v8 = vadd.f32 %v1098_v16, %v1093_v25  ;;  %v1086_v49 = vsel %vm486_vm8, %v1081_v3, %v1083_v50  ;;  %v1087_v22 = vsel %vm486_vm8, %v1083_v50, %v1085_v19 }
 0x205   : > { %v1092_v33 = vadd.f32 %v1087_v22, %v1070_v32  ;;  %v820_v50 = vsel %vm402_vm4, %v3669_v48, %v3675_v52  ;;  %v803_v19 = vadd.f32 %v798_v23, %v781_v56 }
 0x206   : > { %v1069_v46 = vadd.f32 %v1064_v30, %v1047_v26 }
 0x207   : > { %v3824_v9 = vpop.permute.xlu1 %1110  ;;  %v3826_v40 = vpop.permute.xlu0 %1132  ;;  %v1100_v57 = vadd.f32 %v1097_v18, %v1092_v33  ;;  %v825_v48 = vadd.f32 %v820_v50, %v803_v19  ;;  %v1510_v50 = vstv %s2767_s5  ;;  %s2774_s5 = sld [smem:[#allocation4 + $0x27]] }
 0x208   : > { %v1091_v13 = vadd.f32 %v1086_v49, %v1069_v46  ;;  %v1116_v6 = vsel %vm381_vm3, %v3824_v9, %v3821_v35  ;;  %v1512_v18 = vmul.f32 %v1510_v50, %v3359_v36  ;;  %v1513_v19 = vmul.f32 %v1510_v50, %v3355_v34 }
 0x209   : > { %v847_v37 = vadd.f32 %v842_v14, %v825_v48 }
 0x20a   : > { %v1099_v17 = vadd.f32 %v1096_v39, %v1091_v13  ;;  %v4707_v39 = vld [vmem:[#allocation57_spill] sm:$0xff] }
 0x20b   : > { %v3836_v4 = vpop.permute.xlu1 %1114  ;;  %v3838_v54 = vpop.permute.xlu0 %1136 }
 0x20c   : > { %v1123_v43 = vadd.f32 %v3836_v4, %v1101_v8  ;;  %v1117_v25 = vsel %vm381_vm3, %v3821_v35, %v3836_v4  ;;  %v864_v4 = vsel %vm444_vm6, %v3698_v27, %v3713_v53  ;;  %v1121_v62 = vadd.f32 %v1116_v6, %v1099_v17  ;;  %v4708_v6 = vld [vmem:[#allocation18_spill] sm:$0xff] }
 0x20d   : > { %v1122_v38 = vadd.f32 %v1117_v25, %v1100_v57  ;;  %v869_v53 = vadd.f32 %v864_v4, %v847_v37  ;;  %v1532_v17 = vstv %s2768_s21  ;;  %s2775_s21 = sld [smem:[#allocation4 + $0x2e]] }
 0x20e   : > { %v1145_v47 = vadd.f32 %v3838_v54, %v1123_v43  ;;  %v931_v43 = vsel %vm930_vm9, %v3303_v60, %v3336_v21  ;;  %v1491_v60 = vmul.f32 %v4707_v39, %v3355_v34  ;;  %v1511_v21 = vmul.f32 %v1510_v50, %v3347_v28 }
 0x20f   : > { %v1135_v7 = vpop.permute.xlu1 %1134  ;;  %v3855_v5 = vpop.permute.xlu0 %1156  ;;  %v891_v8 = vadd.f32 %v886_v10, %v869_v53  ;;  %v1533_v25 = vmul.f32 %v1532_v17, %v3347_v28  ;;  %v1534_v14 = vmul.f32 %v1532_v17, %v3359_v36 }
 0x210   : > { %v1139_v31 = vsel %vm402_vm4, %v1135_v7, %v3838_v54  ;;  %v1138_v58 = vsel %vm402_vm4, %v3826_v40, %v1135_v7 }
 0x211   : > { %v1144_v16 = vadd.f32 %v1139_v31, %v1122_v38  ;;  %v1143_v30 = vadd.f32 %v1138_v58, %v1121_v62 }
 0x213   : > { %v1155_v29 = vpop.permute.xlu1 %1154  ;;  %v1177_v20 = vpop.permute.xlu0 %1176 }
 0x214   : > { %v1160_v54 = vsel %vm423_vm5, %v1155_v29, %v3855_v5 }
 0x215   : > { %v1165_v61 = vadd.f32 %v1160_v54, %v1143_v30 }
 0x217   : > { %v1159_v1 = vpop.permute.xlu1 %1158  ;;  %v1181_v59 = vpop.permute.xlu0 %1180 }
 0x218   : > { %v1167_v0 = vadd.f32 %v1159_v1, %v1145_v47  ;;  %v1161_v35 = vsel %vm423_vm5, %v3855_v5, %v1159_v1  ;;  %v1490_v47 = vmul.f32 %v4707_v39, %v3359_v36 }
 0x219   : > { %v1166_v26 = vadd.f32 %v1161_v35, %v1144_v16 }
 0x21a   : > { %v1189_v9 = vadd.f32 %v1181_v59, %v1167_v0  ;;  %v1554_v0 = vld [vmem:[#allocation8 + $0x3] ss:$8 sm:$0x3] }
 0x21b   : > { %v1179_v41 = vpop.permute.xlu1 %1178  ;;  %v1201_v3 = vpop.permute.xlu0 %1200  ;;  %v1559_v57 = vrot.slane %v1554_v0, %v4708_v6 }
 0x21c   : > { %v1183_v40 = vsel %vm444_vm6, %v1179_v41, %v1181_v59  ;;  %v1182_v42 = vsel %vm444_vm6, %v1177_v20, %v1179_v41  ;;  %v913_v59 = vadd.f32 %v908_v55, %v891_v8 }
 0x21d   : > { %v1188_v5 = vadd.f32 %v1183_v40, %v1166_v26  ;;  %v1187_v12 = vadd.f32 %v1182_v42, %v1165_v61 }
 0x21e   : > { %v936_v13 = vmul.f32 %v931_v43, %v913_v59 }
 0x21f   : > { %v1199_v45 = vpop.permute.xlu1 %1198  ;;  %v1221_v52 = vpop.permute.xlu0 %1220 }
 0x220   : > { %v1204_v29 = vsel %vm465_vm7, %v1199_v45, %v1201_v3  ;;  %v1535_v45 = vmul.f32 %v1532_v17, %v3355_v34 }
 0x221   : > { %v1209_v20 = vadd.f32 %v1204_v29, %v1187_v12 }
 0x223   : > { %v1203_v11 = vpop.permute.xlu1 %1202  ;;  %v1225_v27 = vpop.permute.xlu0 %1224 }
 0x224   : > { %v1211_v7 = vadd.f32 %v1203_v11, %v1189_v9  ;;  %v1205_v15 = vsel %vm465_vm7, %v1201_v3, %v1203_v11 }
 0x225   : > { %v1210_v51 = vadd.f32 %v1205_v15, %v1188_v5 }
 0x226   : > { %v1233_v24 = vadd.f32 %v1225_v27, %v1211_v7 }
 0x227   : > { %v1223_v49 = vpop.permute.xlu1 %1222  ;;  %v1248_v1 = vpop.permute.xlu0 %1247 }
 0x228   : > { %v1227_v46 = vsel %vm486_vm8, %v1223_v49, %v1225_v27  ;;  %v1256_v22 = vmul.f32 %v1248_v1, %v1233_v24  ;;  %v1226_v44 = vsel %vm486_vm8, %v1221_v52, %v1223_v49  ;;  %v4709_v52 = vld [vmem:[#allocation17_spill] sm:$0xff] }
 0x229   : > { %v1232_v32 = vadd.f32 %v1227_v46, %v1210_v51  ;;  %v1231_v23 = vadd.f32 %v1226_v44, %v1209_v20  ;;  %v1563_v48 = vrot.slane %v1554_v0, %v4709_v52  ;;  %v4710_v20 = vld [vmem:[#allocation20_spill] sm:$0xff] }
 0x22a   : > { %1264 = vrot.lane.b32.xlu1 %v1256_v22, %s3105_s30 }
 0x22b   : > { %v1246_v56 = vpop.permute.xlu1 %1245  ;;  %v1290_v31 = vpop.permute.xlu0 %1289 }
 0x22c   : > { %v1250_v33 = vsel %vm1249_vm10, %v1246_v56, %v1248_v1  ;;  %v1254_v3 = vmul.f32 %v1246_v56, %v1231_v23  ;;  %v1274_v1 = vstv %s2755_s10  ;;  %s2778_s10 = sld [smem:[#allocation4 + $0x43]] }
 0x22d   : > { %v1255_v41 = vmul.f32 %v1250_v33, %v1232_v32  ;;  %v1275_v12 = vmul.f32 %v1274_v1, %v3306_v63  ;;  %v1277_v43 = vmul.f32 %v1274_v1, %v4710_v20  ;;  %v1276_v56 = vmul.f32 %v1274_v1, %v3311_v2 }
 0x22e   : > { %943 = vrot.lane.b32.xlu1 %v936_v13, %s3104_s22  ;;  %s2771_s22 = sld [smem:[#allocation4 + $0x12]] }
 0x22f   : > { %1262 = vrot.lane.b32.xlu0 %v1255_v41, %s3105_s30  ;;  %v1294_v4 = vpop.permute.xlu0 %1293  ;;  %v1292_v38 = vpop.permute.xlu1 %1291 }
 0x230   : > { %v1295_v59 = vsel %vm381_vm3, %v1290_v31, %v1292_v38  ;;  %v1296_v32 = vsel %vm381_vm3, %v1292_v38, %v1294_v4  ;;  %v1302_v23 = vadd.f32 %v1294_v4, %v1277_v43 }
 0x231   : > { %v1300_v44 = vadd.f32 %v1295_v59, %v1275_v12 }
 0x232   : > { %1260 = vrot.lane.b32.xlu1 %v1254_v3, %s3105_s30  ;;  %v1301_v3 = vadd.f32 %v1296_v32, %v1276_v56  ;;  %s2773_s30 = sld [smem:[#allocation4 + $0x20]] }
 0x233   : > { %1497 = vrot.lane.b32.xlu0 %v1490_v47, %s3100_s9  ;;  %v1314_v58 = vpop.permute.xlu0 %1313  ;;  %v1312_v37 = vpop.permute.xlu1 %1311 }
 0x234   : > { %v1317_v22 = vsel %vm402_vm4, %v1312_v37, %v1314_v58 }
 0x235   : > { %v1322_v33 = vadd.f32 %v1317_v22, %v1300_v44 }
 0x236   : > { %1499 = vrot.lane.b32.xlu1 %v1491_v60, %s3100_s9 }
 0x237   : > { %1517 = vrot.lane.b32.xlu0 %v1511_v21, %s3101_s24  ;;  %v1334_v62 = vpop.permute.xlu0 %1333  ;;  %v1316_v35 = vpop.permute.xlu1 %1315 }
 0x238   : > { %v1318_v41 = vsel %vm402_vm4, %v1314_v58, %v1316_v35  ;;  %v1324_v50 = vadd.f32 %v1316_v35, %v1302_v23 }
 0x23a   : > { %1519 = vrot.lane.b32.xlu1 %v1512_v18, %s3101_s24 }
 0x23b   : > { %1521 = vrot.lane.b32.xlu0 %v1513_v19, %s3101_s24  ;;  %v1338_v9 = vpop.permute.xlu0 %1337  ;;  %v1336_v10 = vpop.permute.xlu1 %1335  ;;  %v1323_v19 = vadd.f32 %v1318_v41, %v1301_v3 }
 0x23c   : > { %v1339_v13 = vsel %vm423_vm5, %v1334_v62, %v1336_v10  ;;  %v1340_v21 = vsel %vm423_vm5, %v1336_v10, %v1338_v9  ;;  %v1414_v62 = vstv %s2762_s25  ;;  %s2779_s25 = sld [smem:[#allocation4 + $0x4a]] }
 0x23d   : > { %v1344_v60 = vadd.f32 %v1339_v13, %v1322_v33  ;;  %v1417_v12 = vmul.f32 %v1414_v62, %v3355_v34  ;;  %v1416_v22 = vmul.f32 %v1414_v62, %v3359_v36 }
 0x23e   : > { %1539 = vrot.lane.b32.xlu1 %v1533_v25, %s3102_s26  ;;  %v1346_v25 = vadd.f32 %v1338_v9, %v1324_v50 }
 0x23f   : > { %1541 = vrot.lane.b32.xlu0 %v1534_v14, %s3102_s26  ;;  %v1358_v16 = vpop.permute.xlu0 %1357  ;;  %v1356_v54 = vpop.permute.xlu1 %1355 }
 0x240   : > { %v1361_v39 = vsel %vm444_vm6, %v1356_v54, %v1358_v16 }
 0x241   : > { %v1366_v0 = vadd.f32 %v1361_v39, %v1344_v60 }
 0x242   : > { %1543 = vrot.lane.b32.xlu1 %v1535_v45, %s3102_s26 }
 0x243   : > { %1564 = vrot.lane.b32.xlu0 %v1559_v57, %s3106_s8  ;;  %v1378_v11 = vpop.permute.xlu0 %1377  ;;  %v1360_v27 = vpop.permute.xlu1 %1359  ;;  %v1345_v57 = vadd.f32 %v1340_v21, %v1323_v19 }
 0x244   : > { %v1362_v14 = vsel %vm444_vm6, %v1358_v16, %v1360_v27  ;;  %v1368_v31 = vadd.f32 %v1360_v27, %v1346_v25 }
 0x245   : > { %v1367_v37 = vadd.f32 %v1362_v14, %v1345_v57 }
 0x246   : > { %1566 = vrot.lane.b32.xlu1 %v1563_v48, %s3106_s8  ;;  %s2777_s8 = sld [smem:[#allocation4 + $0x3c]] }
 0x247   : > { %v1382_v53 = vpop.permute.xlu0 %1381  ;;  %v1380_v30 = vpop.permute.xlu1 %1379 }
 0x248   : > { %v1383_v17 = vsel %vm465_vm7, %v1378_v11, %v1380_v30  ;;  %v1384_v38 = vsel %vm465_vm7, %v1380_v30, %v1382_v53  ;;  %v1390_v35 = vadd.f32 %v1382_v53, %v1368_v31 }
 0x249   : > { %v1388_v4 = vadd.f32 %v1383_v17, %v1366_v0  ;;  %v1389_v54 = vadd.f32 %v1384_v38, %v1367_v37 }
 0x24b   : > { %v1402_v40 = vpop.permute.xlu0 %1401  ;;  %v1400_v7 = vpop.permute.xlu1 %1399 }
 0x24c   : > { %v1405_v45 = vsel %vm486_vm8, %v1400_v7, %v1402_v40  ;;  %v1415_v7 = vmul.f32 %v1414_v62, %v3347_v28 }
 0x24d   : > { %v1410_v10 = vadd.f32 %v1405_v45, %v1388_v4 }
 0x24f   : > { %v1430_v55 = vpop.permute.xlu0 %1429  ;;  %v1404_v26 = vpop.permute.xlu1 %1403  ;;  %v1418_v30 = vadd.f32 %v1415_v7, %v1410_v10 }
 0x250   : > { %v1406_v9 = vsel %vm486_vm8, %v1402_v40, %v1404_v26  ;;  %v1412_v16 = vadd.f32 %v1404_v26, %v1390_v35 }
 0x251   : > { %v1411_v59 = vadd.f32 %v1406_v9, %v1389_v54 }
 0x252   : > { %v1420_v43 = vadd.f32 %v1417_v12, %v1412_v16 }
 0x253   : > { %v3944_v42 = vpop.permute.xlu0 %1433  ;;  %v3946_v8 = vpop.permute.xlu1 %1431  ;;  %v1419_v26 = vadd.f32 %v1416_v22, %v1411_v59 }
 0x254   : > { %v1435_v27 = vsel %vm381_vm3, %v1430_v55, %v3946_v8  ;;  %v1436_v55 = vsel %vm381_vm3, %v3946_v8, %v3944_v42  ;;  %v1442_v41 = vadd.f32 %v3944_v42, %v1420_v43 }
 0x255   : > { %v1440_v44 = vadd.f32 %v1435_v27, %v1418_v30  ;;  %v1441_v50 = vadd.f32 %v1436_v55, %v1419_v26  ;;  %v1623_v30 = vstv %s2771_s22  ;;  %v1667_v26 = vstv %s2773_s30  ;;  %s2784_s22 = sld [smem:[#allocation4 + $0xc]] }
 0x256   : > { %v1624_v12 = vmul.f32 %v1623_v30, %v3306_v63  ;;  %s2786_s30 = sld [smem:[#allocation4 + $0x1a]] }
 0x257   : > { %v3948_v61 = vpop.permute.xlu0 %1453  ;;  %v1452_v15 = vpop.permute.xlu1 %1451 }
 0x258   : > { %v1457_v53 = vsel %vm402_vm4, %v1452_v15, %v3948_v61 }
 0x259   : > { %v1462_v13 = vadd.f32 %v1457_v53, %v1440_v44  ;;  %v1626_v53 = vmul.f32 %v1623_v30, %v4710_v20  ;;  %v1645_v44 = vstv %s2772_s29  ;;  %s2798_s29 = sld [smem:[#allocation4 + $0xd]] }
 0x25a   : > { %v1647_v43 = vmul.f32 %v1645_v44, %v3311_v2  ;;  %v1648_v55 = vmul.f32 %v1645_v44, %v4710_v20 }
 0x25b   : > { %v1474_v24 = vpop.permute.xlu0 %1473  ;;  %v3950_v5 = vpop.permute.xlu1 %1455 }
 0x25c   : > { %v1458_v15 = vsel %vm402_vm4, %v3948_v61, %v3950_v5 }
 0x25f   : > { %v3952_v29 = vpop.permute.xlu0 %1477  ;;  %v3954_v49 = vpop.permute.xlu1 %1475 }
 0x260   : > { %v1479_v56 = vsel %vm423_vm5, %v1474_v24, %v3954_v49  ;;  %v1464_v24 = vadd.f32 %v3950_v5, %v1442_v41  ;;  %v1480_v8 = vsel %vm423_vm5, %v3954_v49, %v3952_v29 }
 0x261   : > { %v1484_v3 = vadd.f32 %v1479_v56, %v1462_v13  ;;  %v1668_v56 = vmul.f32 %v1667_v26, %v3306_v63  ;;  %v1670_v13 = vmul.f32 %v1667_v26, %v4710_v20 }
 0x262   : > { %v1486_v42 = vadd.f32 %v3952_v29, %v1464_v24 }
 0x263   : > { %v3958_v46 = vpop.permute.xlu0 %945  ;;  %v1496_v51 = vpop.permute.xlu1 %1495 }
 0x267   : > { %v3970_v18 = vpop.permute.xlu0 %941 }
 0x29c   : > { %v3967_v47 = vpop.permute.xlu1 %1264 }
 0x29d   : > { %4711 = vst [vmem:[#allocation57_spill] sm:$0xff] %v3967_v47 }
 0x2a0   : > { %v3975_v48 = vpop.permute.xlu1 %943 }
 0x2a1   : > { %v3978_v58 = vpop.permute.xlu0 %1262 }
 0x2a4   : > { %v3981_v11 = vpop.permute.xlu1 %1260 }
 0x2a5   : > { %v1498_v1 = vpop.permute.xlu0 %1497 }
 0x2a6   : > { %v1501_v23 = vsel %vm444_vm6, %v1496_v51, %v1498_v1  ;;  %v1463_v51 = vadd.f32 %v1458_v15, %v1441_v50 }
 0x2a7   : > { %v1506_v21 = vadd.f32 %v1501_v23, %v1484_v3  ;;  %v1669_v23 = vmul.f32 %v1667_v26, %v3311_v2  ;;  %v1711_v3 = vstv %s2775_s21  ;;  %s2787_s21 = sld [smem:[#allocation4 + $0x21]] }
 0x2a8   : > { %v1500_v40 = vpop.permute.xlu1 %1499  ;;  %v1485_v0 = vadd.f32 %v1480_v8, %v1463_v51  ;;  %v1713_v24 = vmul.f32 %v1711_v3, %v3311_v2  ;;  %v1741_v8 = vstv %s2777_s8  ;;  %s2800_s8 = sld [smem:[#allocation4 + $0x1b]] }
 0x2a9   : > { %v1518_v32 = vpop.permute.xlu0 %1517  ;;  %v1502_v17 = vsel %vm444_vm6, %v1498_v1, %v1500_v40  ;;  %v1508_v57 = vadd.f32 %v1500_v40, %v1486_v42  ;;  %v1601_v1 = vstv %s2770_s20  ;;  %v1625_v40 = vmul.f32 %v1623_v30, %v3311_v2  ;;  %s2780_s20 = sld [smem:[#allocation4 + $0x51]] }
 0x2aa   : > { %v1507_v31 = vadd.f32 %v1502_v17, %v1485_v0  ;;  %v1603_v59 = vmul.f32 %v1601_v1, %v3311_v2  ;;  %v1602_v27 = vmul.f32 %v1601_v1, %v3306_v63  ;;  %v1604_v22 = vmul.f32 %v1601_v1, %v4710_v20 }
 0x2ab   : > { %v1742_v51 = vmul.f32 %v1741_v8, %v3347_v28  ;;  %v1744_v17 = vmul.f32 %v1741_v8, %v3355_v34  ;;  %v1785_v0 = vstv %s2779_s25  ;;  %s2801_s25 = sld [smem:[#allocation4 + $0x22]] }
 0x2ac   : > { %v1520_v33 = vpop.permute.xlu1 %1519 }
 0x2ad   : > { %v1522_v39 = vpop.permute.xlu0 %1521  ;;  %v1523_v60 = vsel %vm465_vm7, %v1518_v32, %v1520_v33  ;;  %v1646_v32 = vmul.f32 %v1645_v44, %v3306_v63 }
 0x2ae   : > { %v1528_v25 = vadd.f32 %v1523_v60, %v1506_v21  ;;  %v1524_v45 = vsel %vm465_vm7, %v1520_v33, %v1522_v39  ;;  %v1530_v49 = vadd.f32 %v1522_v39, %v1508_v57  ;;  %v1689_v33 = vstv %s2774_s5  ;;  %s2799_s5 = sld [smem:[#allocation4 + $0x14]] }
 0x2af   : > { %v1529_v62 = vadd.f32 %v1524_v45, %v1507_v31  ;;  %v1691_v41 = vmul.f32 %v1689_v33, %v3311_v2  ;;  %v1690_v15 = vmul.f32 %v1689_v33, %v3306_v63  ;;  %v1712_v39 = vmul.f32 %v1711_v3, %v3306_v63 }
 0x2b0   : > { %v1540_v19 = vpop.permute.xlu1 %1539  ;;  %v1692_v50 = vmul.f32 %v1689_v33, %v4710_v20  ;;  %v1714_v60 = vmul.f32 %v1711_v3, %v4710_v20  ;;  %v1743_v21 = vmul.f32 %v1741_v8, %v3359_v36  ;;  %v1786_v57 = vmul.f32 %v1785_v0, %v3347_v28 }
 0x2b1   : > { %v1542_v61 = vpop.permute.xlu0 %1541  ;;  %v4060_v45 = vstv %s2780_s20  ;;  %v1788_v31 = vmul.f32 %v1785_v0, %v3355_v34  ;;  %s2789_s20 = sld [smem:[#allocation4 + $0x2f]] }
 0x2b2   : > { %v1545_v14 = vsel %vm486_vm8, %v1540_v19, %v1542_v61  ;;  %v1763_v19 = vstv %s2778_s10  ;;  %s2788_s10 = sld [smem:[#allocation4 + $0x28]] }
 0x2b3   : > { %v1550_v5 = vadd.f32 %v1545_v14, %v1528_v25  ;;  %v1764_v42 = vmul.f32 %v1763_v19, %v3347_v28  ;;  %v1766_v25 = vmul.f32 %v1763_v19, %v3355_v34  ;;  %v1787_v14 = vmul.f32 %v1785_v0, %v3359_v36 }
 0x2b4   : > { %v1544_v4 = vpop.permute.xlu1 %1543 }
 0x2b5   : > { %v1546_v38 = vsel %vm486_vm8, %v1542_v61, %v1544_v4  ;;  %v1565_v37 = vpop.permute.xlu0 %1564  ;;  %v1552_v35 = vadd.f32 %v1544_v4, %v1530_v49  ;;  %v1765_v61 = vmul.f32 %v1763_v19, %v3359_v36  ;;  %v1920_v4 = vstv %s2784_s22  ;;  %s2802_s22 = sld [smem:[#allocation4 + $0x29]] }
 0x2b6   : > { %v1573_v29 = vmul.f32 %v1565_v37, %v1550_v5  ;;  %v1551_v10 = vadd.f32 %v1546_v38, %v1529_v62  ;;  %v1808_v5 = vmul.f32 %v4060_v45, %v3347_v28  ;;  %v1921_v49 = vmul.f32 %v1920_v4, %v3306_v63 }
 0x2b7   : > { %v1809_v38 = vmul.f32 %v4060_v45, %v3359_v36  ;;  %v1922_v62 = vmul.f32 %v1920_v4, %v3311_v2 }
 0x2b8   : > { %v1567_v9 = vpop.permute.xlu1 %1566  ;;  %1579 = vrot.lane.b32.xlu0 %v1573_v29, %s3107_s27 }
 0x2b9   : > { %v1569_v54 = vsel %vm1568_vm11, %v1565_v37, %v1567_v9  ;;  %v1575_v16 = vmul.f32 %v1567_v9, %v1552_v35  ;;  %v1923_v37 = vmul.f32 %v1920_v4, %v4710_v20  ;;  %v2239_v9 = vstv %s2798_s29  ;;  %s2791_s29 = sld [smem:[#allocation4 + $0x3d]] }
 0x2ba   : > { %v1574_v7 = vmul.f32 %v1569_v54, %v1551_v10  ;;  %v2240_v54 = vmul.f32 %v2239_v9, %v3306_v63  ;;  %v2241_v1 = vmul.f32 %v2239_v9, %v3311_v2 }
 0x2bc   : > { %1583 = vrot.lane.b32.xlu0 %v1575_v16, %s3107_s27  ;;  %1581 = vrot.lane.b32.xlu1 %v1574_v7, %s3107_s27  ;;  %s2785_s27 = sld [smem:[#allocation4 + $0x13]]  ;;  %v2242_v7 = vmul.f32 %v2239_v9, %v4710_v20 }
 0x2bf   : > { %v2060_v9 = vstv %s2791_s29  ;;  %s2795_s29 = sld [smem:[#allocation4 + $0x59]] }
 0x2c0   : > { %1610 = vrot.lane.b32.xlu0 %v1603_v59, %s3097_s4  ;;  %1608 = vrot.lane.b32.xlu1 %v1602_v27, %s3097_s4  ;;  %v1964_v59 = vstv %s2786_s30  ;;  %s2792_s30 = sld [smem:[#allocation4 + $0x44]] }
 0x2c1   : > { %v1966_v27 = vmul.f32 %v1964_v59, %v3311_v2  ;;  %v1965_v30 = vmul.f32 %v1964_v59, %v3306_v63 }
 0x2c2   : > { %v1942_v29 = vstv %s2785_s27  ;;  %s2803_s27 = sld [smem:[#allocation4 + $0x30]] }
 0x2c3   : > { %v1944_v35 = vmul.f32 %v1942_v29, %v3311_v2  ;;  %v1943_v10 = vmul.f32 %v1942_v29, %v3306_v63  ;;  %v1945_v16 = vmul.f32 %v1942_v29, %v4710_v20 }
 0x2c4   : > { %1630 = vrot.lane.b32.xlu0 %v1624_v12, %s3098_s6  ;;  %1612 = vrot.lane.b32.xlu1 %v1604_v22, %s3097_s4  ;;  %v2261_v12 = vstv %s2799_s5  ;;  %s2805_s5 = sld [smem:[#allocation4 + $0x3e]] }
 0x2c5   : > { %v2262_v22 = vmul.f32 %v2261_v12, %v3306_v63  ;;  %v2263_v44 = vmul.f32 %v2261_v12, %v3311_v2 }
 0x2c8   : > { %1634 = vrot.lane.b32.xlu0 %v1626_v53, %s3098_s6  ;;  %1632 = vrot.lane.b32.xlu1 %v1625_v40, %s3098_s6  ;;  %v1967_v53 = vmul.f32 %v1964_v59, %v4710_v20  ;;  %v2264_v40 = vmul.f32 %v2261_v12, %v4710_v20  ;;  %v2062_v12 = vmul.f32 %v2060_v9, %v3359_v36 }
 0x2cc   : > { %1654 = vrot.lane.b32.xlu0 %v1647_v43, %s3099_s7  ;;  %1652 = vrot.lane.b32.xlu1 %v1646_v32, %s3099_s7  ;;  %v1986_v43 = vstv %s2787_s21  ;;  %s2769_s21 = sld [smem:[#allocation4 + $0x4]] }
 0x2cd   : > { %v1988_v32 = vmul.f32 %v1986_v43, %v3311_v2  ;;  %v1987_v26 = vmul.f32 %v1986_v43, %v3306_v63 }
 0x2d0   : > { %1674 = vrot.lane.b32.xlu0 %v1668_v56, %s3100_s9  ;;  %1656 = vrot.lane.b32.xlu1 %v1648_v55, %s3099_s7  ;;  %v2283_v56 = vstv %s2800_s8  ;;  %s2793_s8 = sld [smem:[#allocation4 + $0x4b]] }
 0x2d1   : > { %v2284_v55 = vmul.f32 %v2283_v56, %v3306_v63  ;;  %v2285_v33 = vmul.f32 %v2283_v56, %v3311_v2 }
 0x2d4   : > { %1678 = vrot.lane.b32.xlu0 %v1670_v13, %s3100_s9  ;;  %1676 = vrot.lane.b32.xlu1 %v1669_v23, %s3100_s9  ;;  %v1989_v13 = vmul.f32 %v1986_v43, %v4710_v20  ;;  %v2286_v23 = vmul.f32 %v2283_v56, %v4710_v20 }
 0x2d8   : > { %1698 = vrot.lane.b32.xlu0 %v1691_v41, %s3101_s24  ;;  %1696 = vrot.lane.b32.xlu1 %v1690_v15, %s3101_s24  ;;  %v2008_v41 = vstv %s2788_s10  ;;  %s2806_s10 = sld [smem:[#allocation4 + $0x45]] }
 0x2d9   : > { %v2010_v15 = vmul.f32 %v2008_v41, %v3311_v2  ;;  %v2009_v3 = vmul.f32 %v2008_v41, %v3306_v63 }
 0x2dc   : > { %1718 = vrot.lane.b32.xlu0 %v1712_v39, %s3102_s26  ;;  %1700 = vrot.lane.b32.xlu1 %v1692_v50, %s3101_s24  ;;  %v2305_v39 = vstv %s2801_s25  ;;  %s2781_s25 = sld [smem:[#allocation4 + $0x58]] }
 0x2dd   : > { %v2306_v50 = vmul.f32 %v2305_v39, %v3306_v63  ;;  %v2308_v8 = vmul.f32 %v2305_v39, %v4710_v20 }
 0x2e0   : > { %1722 = vrot.lane.b32.xlu0 %v1714_v60, %s3102_s26  ;;  %1720 = vrot.lane.b32.xlu1 %v1713_v24, %s3102_s26  ;;  %v2011_v60 = vmul.f32 %v2008_v41, %v4710_v20 }
 0x2e4   : > { %1750 = vrot.lane.b32.xlu0 %v1743_v21, %s3097_s4  ;;  %1748 = vrot.lane.b32.xlu1 %v1742_v51, %s3097_s4  ;;  %v2307_v21 = vmul.f32 %v2305_v39, %v3311_v2  ;;  %v2030_v51 = vstv %s2789_s20  ;;  %v2104_v39 = vstv %s2793_s8  ;;  %s2794_s20 = sld [smem:[#allocation4 + $0x52]]  ;;  %s3108_s8 = smov 4  }
 0x2e8   : > { %1770 = vrot.lane.b32.xlu0 %v1764_v42, %s3098_s6  ;;  %1752 = vrot.lane.b32.xlu1 %v1744_v17, %s3097_s4  ;;  %v2032_v17 = vmul.f32 %v2030_v51, %v3311_v2 }
 0x2ec   : > { %1774 = vrot.lane.b32.xlu0 %v1766_v25, %s3098_s6  ;;  %1772 = vrot.lane.b32.xlu1 %v1765_v61, %s3098_s6  ;;  %v2031_v25 = vmul.f32 %v2030_v51, %v3306_v63  ;;  %v2327_v61 = vstv %s2802_s22  ;;  %s2807_s22 = sld [smem:[#allocation4 + $0x4c]] }
 0x2f0   : > { %1794 = vrot.lane.b32.xlu0 %v1787_v14, %s3099_s7  ;;  %1792 = vrot.lane.b32.xlu1 %v1786_v57, %s3099_s7  ;;  %v2328_v57 = vmul.f32 %v2327_v61, %v3306_v63 }
 0x2f4   : > { %1814 = vrot.lane.b32.xlu0 %v1808_v5, %s3100_s9  ;;  %1796 = vrot.lane.b32.xlu1 %v1788_v31, %s3099_s7  ;;  %v2033_v5 = vmul.f32 %v2030_v51, %v4710_v20  ;;  %v2105_v51 = vmul.f32 %v2104_v39, %v3347_v28 }
 0x2f8   : > { %1927 = vrot.lane.b32.xlu0 %v1921_v49, %s3097_s4  ;;  %1816 = vrot.lane.b32.xlu1 %v1809_v38, %s3100_s9  ;;  %v2330_v49 = vmul.f32 %v2327_v61, %v4710_v20  ;;  %v2329_v38 = vmul.f32 %v2327_v61, %v3311_v2 }
 0x2fc   : > { %1931 = vrot.lane.b32.xlu0 %v1923_v37, %s3097_s4  ;;  %1929 = vrot.lane.b32.xlu1 %v1922_v62, %s3097_s4  ;;  %v2349_v37 = vstv %s2803_s27  ;;  %s2783_s27 = sld [smem:[#allocation4 + $0x5]] }
 0x300   : > { %1951 = vrot.lane.b32.xlu0 %v1944_v35, %s3098_s6  ;;  %1949 = vrot.lane.b32.xlu1 %v1943_v10, %s3098_s6  ;;  %v2351_v35 = vmul.f32 %v2349_v37, %v3311_v2  ;;  %v2350_v10 = vmul.f32 %v2349_v37, %v3306_v63 }
 0x304   : > { %2246 = vrot.lane.b32.xlu0 %v2240_v54, %s3097_s4  ;;  %1953 = vrot.lane.b32.xlu1 %v1945_v16, %s3098_s6 }
 0x308   : > { %2250 = vrot.lane.b32.xlu0 %v2242_v7, %s3097_s4  ;;  %2248 = vrot.lane.b32.xlu1 %v2241_v1, %s3097_s4  ;;  %v2061_v7 = vmul.f32 %v2060_v9, %v3347_v28  ;;  %v2352_v1 = vmul.f32 %v2349_v37, %v4710_v20  ;;  %v2401_v37 = vstv %s2806_s10  ;;  %s3109_s10 = smov 5  }
 0x30c   : > { %1973 = vrot.lane.b32.xlu0 %v1966_v27, %s3099_s7  ;;  %1971 = vrot.lane.b32.xlu1 %v1965_v30, %s3099_s7  ;;  %v2063_v30 = vmul.f32 %v2060_v9, %v3355_v34 }
 0x310   : > { %2268 = vrot.lane.b32.xlu0 %v2262_v22, %s3098_s6  ;;  %1975 = vrot.lane.b32.xlu1 %v1967_v53, %s3099_s7  ;;  %v2082_v22 = vstv %s2792_s30  ;;  %s2808_s30 = sld [smem:[#allocation4 + $0x53]] }
 0x311   : > { %v2083_v43 = vmul.f32 %v2082_v22, %v3347_v28 }
 0x314   : > { %2272 = vrot.lane.b32.xlu0 %v2264_v40, %s3098_s6  ;;  %2270 = vrot.lane.b32.xlu1 %v2263_v44, %s3098_s6  ;;  %v2084_v44 = vmul.f32 %v2082_v22, %v3359_v36 }
 0x318   : > { %1995 = vrot.lane.b32.xlu0 %v1988_v32, %s3100_s9  ;;  %1993 = vrot.lane.b32.xlu1 %v1987_v26, %s3100_s9  ;;  %v2379_v32 = vstv %s2805_s5  ;;  %s2796_s5 = sld [smem:[#allocation4 + $0x60]] }
 0x319   : > { %v2382_v41 = vmul.f32 %v2379_v32, %v3355_v34 }
 0x31c   : > { %2290 = vrot.lane.b32.xlu0 %v2284_v55, %s3099_s7  ;;  %1997 = vrot.lane.b32.xlu1 %v1989_v13, %s3100_s9  ;;  %v2380_v55 = vmul.f32 %v2379_v32, %v3347_v28  ;;  %v2085_v13 = vmul.f32 %v2082_v22, %v3355_v34 }
 0x320   : > { %2294 = vrot.lane.b32.xlu0 %v2286_v23, %s3099_s7  ;;  %2292 = vrot.lane.b32.xlu1 %v2285_v33, %s3099_s7 }
 0x324   : > { %2017 = vrot.lane.b32.xlu0 %v2010_v15, %s3101_s24  ;;  %2015 = vrot.lane.b32.xlu1 %v2009_v3, %s3101_s24  ;;  %v2381_v15 = vmul.f32 %v2379_v32, %v3359_v36  ;;  %v4186_v3 = vstv %s2769_s21  ;;  %s2809_s21 = sld [smem:[#allocation4 + $0x5a]] }
 0x328   : > { %2312 = vrot.lane.b32.xlu0 %v2306_v50, %s3100_s9  ;;  %2019 = vrot.lane.b32.xlu1 %v2011_v60, %s3101_s24  ;;  %v1594_v60 = vmul.f32 %v4186_v3, %v3306_v63 }
 0x32a   : > { %v4122_v24 = vpop.permute.xlu0 %1579 }
 0x32b   : > { %4712 = vst [vmem:[#allocation18_spill] sm:$0xff] %v4122_v24 }
 0x32c   : > { %2316 = vrot.lane.b32.xlu0 %v2308_v8, %s3100_s9  ;;  %2314 = vrot.lane.b32.xlu1 %v2307_v21, %s3100_s9 }
 0x32e   : > { %v4128_v19 = vpop.permute.xlu0 %1583  ;;  %v4130_v42 = vpop.permute.xlu1 %1581 }
 0x32f   : > { %4713 = vst [vmem:[#allocation17_spill] sm:$0xff] %v4128_v19  ;;  %4714 = vst [vmem:[#allocation20_spill] sm:$0xff] %v4130_v42 }
 0x330   : > { %2039 = vrot.lane.b32.xlu0 %v2032_v17, %s3102_s26  ;;  %2037 = vrot.lane.b32.xlu1 %v2031_v25, %s3102_s26  ;;  %v1810_v17 = vmul.f32 %v4060_v45, %v3355_v34  ;;  %v2106_v45 = vmul.f32 %v2104_v39, %v3359_v36 }
 0x332   : > { %v4136_v0 = vpop.permute.xlu0 %1610  ;;  %v1609_v14 = vpop.permute.xlu1 %1608 }
 0x333   : > { %v1614_v50 = vsel %vm381_vm3, %v1609_v14, %v4136_v0 }
 0x334   : > { %2334 = vrot.lane.b32.xlu0 %v2328_v57, %s3101_s24  ;;  %2041 = vrot.lane.b32.xlu1 %v2033_v5, %s3102_s26  ;;  %v1619_v61 = vadd.f32 %v1614_v50, %v1594_v60 }
 0x336   : > { %v1631_v31 = vpop.permute.xlu0 %1630  ;;  %v4142_v4 = vpop.permute.xlu1 %1612 }
 0x338   : > { %2338 = vrot.lane.b32.xlu0 %v2330_v49, %s3101_s24  ;;  %2336 = vrot.lane.b32.xlu1 %v2329_v38, %s3101_s24  ;;  %v2107_v38 = vmul.f32 %v2104_v39, %v3355_v34 }
 0x33a   : > { %v4148_v62 = vpop.permute.xlu0 %1634  ;;  %v4150_v29 = vpop.permute.xlu1 %1632 }
 0x33b   : > { %v1636_v25 = vsel %vm402_vm4, %v1631_v31, %v4150_v29 }
 0x33c   : > { %2358 = vrot.lane.b32.xlu0 %v2351_v35, %s3102_s26  ;;  %2356 = vrot.lane.b32.xlu1 %v2350_v10, %s3102_s26  ;;  %v1641_v57 = vadd.f32 %v1636_v25, %v1619_v61 }
 0x33e   : > { %v4156_v54 = vpop.permute.xlu0 %1654  ;;  %v1653_v16 = vpop.permute.xlu1 %1652 }
 0x33f   : > { %v1658_v14 = vsel %vm423_vm5, %v1653_v16, %v4156_v54 }
 0x340   : > { %2067 = vrot.lane.b32.xlu0 %v2061_v7, %s3097_s4  ;;  %2360 = vrot.lane.b32.xlu1 %v2352_v1, %s3102_s26  ;;  %v1663_v35 = vadd.f32 %v1658_v14, %v1641_v57  ;;  %v2403_v1 = vmul.f32 %v2401_v37, %v3359_v36 }
 0x342   : > { %v1675_v59 = vpop.permute.xlu0 %1674  ;;  %v4162_v27 = vpop.permute.xlu1 %1656 }
 0x344   : > { %2071 = vrot.lane.b32.xlu0 %v2063_v30, %s3097_s4  ;;  %2069 = vrot.lane.b32.xlu1 %v2062_v12, %s3097_s4  ;;  %v2402_v30 = vmul.f32 %v2401_v37, %v3347_v28  ;;  %v1829_v12 = vstv %s2781_s25  ;;  %s2804_s25 = sld [smem:[#allocation4 + $0x37]] }
 0x345   : > { %v1832_v50 = vmul.f32 %v1829_v12, %v3355_v34  ;;  %v1831_v60 = vmul.f32 %v1829_v12, %v3359_v36 }
 0x346   : > { %v4168_v53 = vpop.permute.xlu0 %1678  ;;  %v4170_v40 = vpop.permute.xlu1 %1676 }
 0x347   : > { %v1680_v31 = vsel %vm444_vm6, %v1675_v59, %v4170_v40 }
 0x348   : > { %2091 = vrot.lane.b32.xlu0 %v2084_v44, %s3098_s6  ;;  %2089 = vrot.lane.b32.xlu1 %v2083_v43, %s3098_s6  ;;  %v1685_v9 = vadd.f32 %v1680_v31, %v1663_v35 }
 0x34a   : > { %v4176_v26 = vpop.permute.xlu0 %1698  ;;  %v1697_v56 = vpop.permute.xlu1 %1696 }
 0x34b   : > { %v1702_v10 = vsel %vm465_vm7, %v1697_v56, %v4176_v26 }
 0x34c   : > { %2386 = vrot.lane.b32.xlu0 %v2380_v55, %s3097_s4  ;;  %2093 = vrot.lane.b32.xlu1 %v2085_v13, %s3098_s6  ;;  %v1707_v22 = vadd.f32 %v1702_v10, %v1685_v9  ;;  %v1830_v55 = vmul.f32 %v1829_v12, %v3347_v28  ;;  %v2404_v13 = vmul.f32 %v2401_v37, %v3355_v34  ;;  %v2423_v37 = vstv %s2807_s22  ;;  %s3113_s22 = smov 122  }
 0x34e   : > { %v1719_v23 = vpop.permute.xlu0 %1718  ;;  %v4182_v33 = vpop.permute.xlu1 %1700 }
 0x350   : > { %2390 = vrot.lane.b32.xlu0 %v2382_v41, %s3097_s4  ;;  %2388 = vrot.lane.b32.xlu1 %v2381_v15, %s3097_s4  ;;  %s2776_s4 = sld [smem:[#allocation4 + $0x35]] }
 0x352   : > { %v4194_v8 = vpop.permute.xlu0 %1722  ;;  %v4196_v21 = vpop.permute.xlu1 %1720 }
 0x353   : > { %v1724_v59 = vsel %vm486_vm8, %v1719_v23, %v4196_v21 }
 0x354   : > { %2111 = vrot.lane.b32.xlu0 %v2105_v51, %s3099_s7  ;;  %1818 = vrot.lane.b32.xlu1 %v1810_v17, %s3100_s9  ;;  %v1729_v43 = vadd.f32 %v1724_v59, %v1707_v22  ;;  %v2126_v17 = vstv %s2794_s20  ;;  %v1912_v22 = vstv %s2783_s27  ;;  %s3112_s20 = smov 123   ;;  %s361_s27 = sld [smem:[#allocation4]] }
 0x356   : > { %v4207_v5 = vpop.permute.xlu0 %1750  ;;  %v1749_v49 = vpop.permute.xlu1 %1748  ;;  %v4225_v44 = vstv %s2776_s4  ;;  %s3111_s4 = smov 124  }
 0x357   : > { %v1734_v23 = vmul.f32 %v4225_v44, %v3347_v28  ;;  %v1754_v51 = vsel %vm381_vm3, %v1749_v49, %v4207_v5 }
 0x358   : > { %2115 = vrot.lane.b32.xlu0 %v2107_v38, %s3099_s7  ;;  %2113 = vrot.lane.b32.xlu1 %v2106_v45, %s3099_s7  ;;  %v2128_v38 = vmul.f32 %v2126_v17, %v3359_v36  ;;  %v2127_v45 = vmul.f32 %v2126_v17, %v3347_v28 }
 0x359   : > { %v1737_v41 = vadd.f32 %v1734_v23, %v1729_v43  ;;  %v2425_v23 = vmul.f32 %v2423_v37, %v3359_v36 }
 0x35a   : > { %v1771_v16 = vpop.permute.xlu0 %1770  ;;  %v4217_v7 = vpop.permute.xlu1 %1752 }
 0x35b   : > { %v1759_v61 = vadd.f32 %v1754_v51, %v1737_v41 }
 0x35c   : > { %2410 = vrot.lane.b32.xlu0 %v2403_v1, %s3098_s6  ;;  %2408 = vrot.lane.b32.xlu1 %v2402_v30, %s3098_s6  ;;  %v2424_v1 = vmul.f32 %v2423_v37, %v3347_v28  ;;  %v2129_v30 = vmul.f32 %v2126_v17, %v3355_v34 }
 0x35e   : > { %v4227_v32 = vpop.permute.xlu0 %1774  ;;  %v4229_v56 = vpop.permute.xlu1 %1772 }
 0x35f   : > { %v1776_v25 = vsel %vm402_vm4, %v1771_v16, %v4229_v56 }
 0x360   : > { %1836 = vrot.lane.b32.xlu0 %v1830_v55, %s3101_s24  ;;  %2412 = vrot.lane.b32.xlu1 %v2404_v13, %s3098_s6  ;;  %s2782_s6 = sld [smem:[#allocation4 + $0x5f]]  ;;  %v1781_v35 = vadd.f32 %v1776_v25, %v1759_v61  ;;  %v2426_v13 = vmul.f32 %v2423_v37, %v3355_v34 }
 0x362   : > { %v1795_v15 = vpop.permute.xlu0 %1794  ;;  %v1793_v39 = vpop.permute.xlu1 %1792 }
 0x363   : > { %v1798_v31 = vsel %vm423_vm5, %v1793_v39, %v1795_v15 }
 0x364   : > { %1840 = vrot.lane.b32.xlu0 %v1832_v50, %s3101_s24  ;;  %1838 = vrot.lane.b32.xlu1 %v1831_v60, %s3101_s24  ;;  %v1803_v10 = vadd.f32 %v1798_v31, %v1781_v35  ;;  %v1913_v50 = vmul.f32 %v1912_v22, %v3306_v63  ;;  %v1914_v31 = vmul.f32 %v1912_v22, %v3311_v2 }
 0x366   : > { %v1815_v14 = vpop.permute.xlu0 %1814  ;;  %v4245_v57 = vpop.permute.xlu1 %1796  ;;  %v1851_v39 = vstv %s2782_s6  ;;  %s2720_s6 = sld [smem:[#allocation4 + $0x31]] }
 0x367   : > { %v4252_v49 = vsel %vm423_vm5, %v1795_v15, %v4245_v57  ;;  %v1853_v25 = vmul.f32 %v1851_v39, %v3359_v36  ;;  %v1852_v61 = vmul.f32 %v1851_v39, %v3347_v28 }
 0x368   : > { %2135 = vrot.lane.b32.xlu0 %v2128_v38, %s3100_s9  ;;  %2133 = vrot.lane.b32.xlu1 %v2127_v45, %s3100_s9  ;;  %v2148_v45 = vstv %s2795_s29  ;;  %s2713_s29 = sshll.u32 %s3263_s19, 1 }
 0x36a   : > { %v1928_v9 = vpop.permute.xlu0 %1927  ;;  %v4256_v16 = vpop.permute.xlu1 %1816 }
 0x36b   : > { %v1820_v59 = vsel %vm444_vm6, %v1815_v14, %v4256_v16  ;;  %v1915_v14 = vmul.f32 %v1912_v22, %v4710_v20 }
 0x36c   : > { %v4262_v12 = vadd.f32 %v1820_v59, %v1803_v10  ;;  %2430 = vrot.lane.b32.xlu0 %v2424_v1, %s3099_s7  ;;  %2137 = vrot.lane.b32.xlu1 %v2129_v30, %s3100_s9  ;;  %v2149_v30 = vmul.f32 %v2148_v45, %v3347_v28  ;;  %v1854_v59 = vmul.f32 %v1851_v39, %v3355_v34 }
 0x36e   : > { %v1932_v43 = vpop.permute.xlu0 %1931  ;;  %v1930_v55 = vpop.permute.xlu1 %1929 }
 0x36f   : > { %v1933_v41 = vsel %vm381_vm3, %v1928_v9, %v1930_v55  ;;  %v1934_v15 = vsel %vm381_vm3, %v1930_v55, %v1932_v43  ;;  %v1940_v35 = vadd.f32 %v1932_v43, %v1915_v14  ;;  %v2151_v43 = vmul.f32 %v2148_v45, %v3355_v34 }
 0x370   : > { %2434 = vrot.lane.b32.xlu0 %v2426_v13, %s3099_s7  ;;  %2432 = vrot.lane.b32.xlu1 %v2425_v23, %s3099_s7  ;;  %v1938_v60 = vadd.f32 %v1933_v41, %v1913_v50  ;;  %v1939_v10 = vadd.f32 %v1934_v15, %v1914_v31  ;;  %s2797_s7 = sld [smem:[#allocation4 + $0x6]]  ;;  %v2150_v15 = vmul.f32 %v2148_v45, %v3359_v36 }
 0x372   : > { %v1952_v51 = vpop.permute.xlu0 %1951  ;;  %v1950_v17 = vpop.permute.xlu1 %1949 }
 0x373   : > { %v1955_v38 = vsel %vm402_vm4, %v1950_v17, %v1952_v51 }
 0x374   : > { %v1960_v37 = vadd.f32 %v1955_v38, %v1938_v60  ;;  %1860 = vrot.lane.b32.xlu0 %v1853_v25, %s3102_s26  ;;  %1858 = vrot.lane.b32.xlu1 %v1852_v61, %s3102_s26  ;;  %v2445_v60 = vstv %s2808_s30  ;;  %s2819_s30 = sshll.u32 %s3079_s15, 5  ;;  %s3114_s15 = smov [#allocation11]  }
 0x375   : > { %v2447_v61 = vmul.f32 %v2445_v60, %v3359_v36  ;;  %v2446_v14 = vmul.f32 %v2445_v60, %v3347_v28 }
 0x376   : > { %v2247_v9 = vpop.permute.xlu0 %2246  ;;  %v1954_v1 = vpop.permute.xlu1 %1953  ;;  %v2231_v45 = vstv %s2797_s7  ;;  %s227_s7 = scalar_lea.vmem [#allocation11], %s2713_s29 }
 0x377   : > { %v1956_v55 = vsel %vm402_vm4, %v1952_v51, %v1954_v1  ;;  %v1962_v13 = vadd.f32 %v1954_v1, %v1940_v35  ;;  %v1873_v51 = vld [vmem:[#allocation8 + $0x4] ss:$8 sm:$0x3]  ;;  %v2448_v1 = vmul.f32 %v2445_v60, %v3355_v34 }
 0x378   : > { %v1961_v23 = vadd.f32 %v1956_v55, %v1939_v10  ;;  %2155 = vrot.lane.b32.xlu0 %v2149_v30, %s3101_s24  ;;  %1862 = vrot.lane.b32.xlu1 %v1854_v59, %s3102_s26  ;;  %v1878_v35 = vrot.slane %v1873_v51, %v4708_v6  ;;  %v2170_v30 = vstv %s2796_s5  ;;  %v2234_v59 = vmul.f32 %v2231_v45, %v4710_v20  ;;  %s2595_s5 = sshll.u32 %s227_s7, 4  ;;  %s2596_s5 = int_to_ptr.vmem [resolvable:$true] %s2595_s5 }
 0x379   : > { %v2232_v55 = vmul.f32 %v2231_v45, %v3306_v63  ;;  %v2171_v47 = vmul.f32 %v2170_v30, %v3347_v28 }
 0x37a   : > { %v2251_v22 = vpop.permute.xlu0 %2250  ;;  %v2249_v41 = vpop.permute.xlu1 %2248 }
 0x37b   : > { %v2252_v50 = vsel %vm381_vm3, %v2247_v9, %v2249_v41  ;;  %v2253_v39 = vsel %vm381_vm3, %v2249_v41, %v2251_v22 }
 0x37c   : > { %2159 = vrot.lane.b32.xlu0 %v2151_v43, %s3101_s24  ;;  %2157 = vrot.lane.b32.xlu1 %v2150_v15, %s3101_s24  ;;  %v2257_v60 = vadd.f32 %v2252_v50, %v2232_v55  ;;  %v2172_v50 = vmul.f32 %v2170_v30, %v3359_v36 }
 0x37e   : > { %v1974_v17 = vpop.permute.xlu0 %1973  ;;  %v1972_v25 = vpop.permute.xlu1 %1971 }
 0x37f   : > { %v1977_v38 = vsel %vm423_vm5, %v1972_v25, %v1974_v17  ;;  %v1882_v25 = vrot.slane %v1873_v51, %v4709_v52  ;;  %v2467_v51 = vstv %s2809_s21 }
 0x380   : > { %v1982_v31 = vadd.f32 %v1977_v38, %v1960_v37  ;;  %2454 = vrot.lane.b32.xlu0 %v2447_v61, %s3100_s9  ;;  %2452 = vrot.lane.b32.xlu1 %v2446_v14, %s3100_s9  ;;  %v2233_v37 = vmul.f32 %v2231_v45, %v3311_v2  ;;  %v2259_v61 = vadd.f32 %v2251_v22, %v2234_v59 }
 0x381   : > { %v2173_v22 = vmul.f32 %v2170_v30, %v3355_v34  ;;  %v2468_v55 = vmul.f32 %v2467_v51, %v3347_v28 }
 0x382   : > { %v2269_v10 = vpop.permute.xlu0 %2268  ;;  %v1976_v9 = vpop.permute.xlu1 %1975  ;;  %v2258_v14 = vadd.f32 %v2253_v39, %v2233_v37 }
 0x383   : > { %v1978_v41 = vsel %vm423_vm5, %v1974_v17, %v1976_v9  ;;  %v1984_v43 = vadd.f32 %v1976_v9, %v1962_v13 }
 0x384   : > { %v1983_v15 = vadd.f32 %v1978_v41, %v1961_v23  ;;  %1883 = vrot.lane.b32.xlu0 %v1878_v35, %s3108_s8  ;;  %2456 = vrot.lane.b32.xlu1 %v2448_v1, %s3100_s9  ;;  %s2810_s9 = sld [smem:[#allocation4 + $0x61]] }
 0x386   : > { %v2273_v38 = vpop.permute.xlu0 %2272  ;;  %v2271_v19 = vpop.permute.xlu1 %2270 }
 0x387   : > { %v2281_v24 = vadd.f32 %v2273_v38, %v2259_v61  ;;  %v2274_v13 = vsel %vm402_vm4, %v2269_v10, %v2271_v19  ;;  %v2275_v17 = vsel %vm402_vm4, %v2271_v19, %v2273_v38  ;;  %v2192_v19 = vld [vmem:[#allocation8 + $0x5] ss:$8 sm:$0x3] }
 0x388   : > { %v2279_v45 = vadd.f32 %v2274_v13, %v2257_v60  ;;  %v2280_v23 = vadd.f32 %v2275_v17, %v2258_v14  ;;  %2177 = vrot.lane.b32.xlu0 %v2171_v47, %s3102_s26  ;;  %1885 = vrot.lane.b32.xlu1 %v1882_v25, %s3108_s8  ;;  %v2469_v47 = vmul.f32 %v2467_v51, %v3359_v36 }
 0x389   : > { %v2470_v60 = vmul.f32 %v2467_v51, %v3355_v34  ;;  %v2511_v51 = vld [vmem:[#allocation8 + $0x6] ss:$8 sm:$0x3] }
 0x38a   : > { %v1996_v35 = vpop.permute.xlu0 %1995  ;;  %v1994_v9 = vpop.permute.xlu1 %1993  ;;  %v2489_v17 = vstv %s2810_s9  ;;  %s2593_s9 = scalar_lea.hbm %s4629_s3, %s2819_s30 }
 0x38b   : > { %v1999_v39 = vsel %vm444_vm6, %v1994_v9, %v1996_v35 }
 0x38c   : > { %v2004_v1 = vadd.f32 %v1999_v39, %v1982_v31  ;;  %2181 = vrot.lane.b32.xlu0 %v2173_v22, %s3102_s26  ;;  %2179 = vrot.lane.b32.xlu1 %v2172_v50, %s3102_s26  ;;  %v2197_v31 = vrot.slane %v2192_v19, %v4708_v6  ;;  %v2490_v50 = vmul.f32 %v2489_v17, %v3347_v28 }
 0x38e   : > { %v2291_v10 = vpop.permute.xlu0 %2290  ;;  %v1998_v59 = vpop.permute.xlu1 %1997 }
 0x38f   : > { %v2000_v41 = vsel %vm444_vm6, %v1996_v35, %v1998_v59  ;;  %v2006_v37 = vadd.f32 %v1998_v59, %v1984_v43  ;;  %v2201_v43 = vrot.slane %v2192_v19, %v4709_v52  ;;  %v2491_v59 = vmul.f32 %v2489_v17, %v3359_v36 }
 0x390   : > { %v2005_v30 = vadd.f32 %v2000_v41, %v1983_v15  ;;  %2476 = vrot.lane.b32.xlu0 %v2469_v47, %s3101_s24  ;;  %2474 = vrot.lane.b32.xlu1 %v2468_v55, %s3101_s24  ;;  %v2516_v41 = vrot.slane %v2511_v51, %v4708_v6 }
 0x392   : > { %v2295_v25 = vpop.permute.xlu0 %2294  ;;  %v2293_v61 = vpop.permute.xlu1 %2292 }
 0x393   : > { %v2303_v14 = vadd.f32 %v2295_v25, %v2281_v24  ;;  %v2296_v38 = vsel %vm423_vm5, %v2291_v10, %v2293_v61  ;;  %v2297_v13 = vsel %vm423_vm5, %v2293_v61, %v2295_v25 }
 0x394   : > { %v2301_v9 = vadd.f32 %v2296_v38, %v2279_v45  ;;  %v2302_v35 = vadd.f32 %v2297_v13, %v2280_v23  ;;  %2202 = vrot.lane.b32.xlu0 %v2197_v31, %s3109_s10  ;;  %2478 = vrot.lane.b32.xlu1 %v2470_v60, %s3101_s24  ;;  %v2492_v23 = vmul.f32 %v2489_v17, %v3355_v34  ;;  %s3110_s24 = smov 6  }
 0x396   : > { %v2018_v15 = vpop.permute.xlu0 %2017  ;;  %v2016_v22 = vpop.permute.xlu1 %2015 }
 0x397   : > { %v2021_v39 = vsel %vm465_vm7, %v2016_v22, %v2018_v15 }
 0x398   : > { %v2026_v24 = vadd.f32 %v2021_v39, %v2004_v1  ;;  %2496 = vrot.lane.b32.xlu0 %v2490_v50, %s3102_s26  ;;  %2204 = vrot.lane.b32.xlu1 %v2201_v43, %s3109_s10  ;;  %v2520_v1 = vrot.slane %v2511_v51, %v4709_v52  ;;  %s2581_s10 = scalar_lea.sflag [#allocation6], %s3263_s19 }
 0x39a   : > { %v2313_v10 = vpop.permute.xlu0 %2312  ;;  %v2020_v45 = vpop.permute.xlu1 %2019 }
 0x39b   : > { %v2022_v47 = vsel %vm465_vm7, %v2018_v15, %v2020_v45  ;;  %v2028_v19 = vadd.f32 %v2020_v45, %v2006_v37 }
 0x39c   : > { %v2027_v55 = vadd.f32 %v2022_v47, %v2005_v30  ;;  %2500 = vrot.lane.b32.xlu0 %v2492_v23, %s3102_s26  ;;  %2498 = vrot.lane.b32.xlu1 %v2491_v59, %s3102_s26  ;;  %s2790_s26 = sld [smem:[#allocation4 + $0x36]] }
 0x39e   : > { %v2317_v31 = vpop.permute.xlu0 %2316  ;;  %v2315_v25 = vpop.permute.xlu1 %2314 }
 0x39f   : > { %v2325_v61 = vadd.f32 %v2317_v31, %v2303_v14  ;;  %v2318_v60 = vsel %vm444_vm6, %v2313_v10, %v2315_v25  ;;  %v2319_v38 = vsel %vm444_vm6, %v2315_v25, %v2317_v31 }
 0x3a0   : > { %v2323_v13 = vadd.f32 %v2318_v60, %v2301_v9  ;;  %v2324_v17 = vadd.f32 %v2319_v38, %v2302_v35  ;;  %2523 = vrot.lane.b32.xlu0 %v2520_v1, %s3110_s24  ;;  %2521 = vrot.lane.b32.xlu1 %v2516_v41, %s3110_s24  ;;  %s2999_s24 = scalar_lea.vmem %s2596_s5, 32 }
 0x3a1   : > { %p3000_p1 = scmp.ne.s32.totalorder %s2596_s5, %s2999_s24 }
 0x3a2   : > { %v2040_v37 = vpop.permute.xlu0 %2039  ;;  %v2038_v30 = vpop.permute.xlu1 %2037  ;;  %v2052_v25 = vstv %s2790_s26  ;;  %s3003_s26 = sshll.u32 %s3114_s15, 4  ;;  %s3004_s26 = int_to_ptr.vmem [resolvable:$false] %s3003_s26 }
 0x3a3   : > { %v2043_v43 = vsel %vm486_vm8, %v2038_v30, %v2040_v37  ;;  %v2053_v30 = vmul.f32 %v2052_v25, %v3347_v28  ;;  %p3001_p4 = pnand %p3000_p1, %p3231_p0  ;;  %p3006_p5 = scmp.lt.s32.totalorder %s2596_s5, %s3004_s26 }
 0x3a4   : > { %v2048_v15 = vadd.f32 %v2043_v43, %v2026_v24  ;;  %v2054_v43 = vmul.f32 %v2052_v25, %v3359_v36 }
 0x3a5   : > { %p3002_p8 = pneg %p3001_p4 }
 0x3a6   : > { %v2335_v22 = vpop.permute.xlu0 %2334  ;;  %v2042_v50 = vpop.permute.xlu1 %2041 }
 0x3a7   : > { %v2044_v39 = vsel %vm486_vm8, %v2040_v37, %v2042_v50  ;;  %v2050_v51 = vadd.f32 %v2042_v50, %v2028_v19  ;;  %v2055_v37 = vmul.f32 %v2052_v25, %v3355_v34 }
 0x3a8   : > { %v2049_v14 = vadd.f32 %v2044_v39, %v2027_v55 }
 0x3aa   : > { %v2339_v10 = vpop.permute.xlu0 %2338  ;;  %v2337_v45 = vpop.permute.xlu1 %2336  ;;  %v2057_v50 = vadd.f32 %v2054_v43, %v2049_v14 }
 0x3ab   : > { %v2347_v23 = vadd.f32 %v2339_v10, %v2325_v61  ;;  %v2340_v9 = vsel %vm465_vm7, %v2335_v22, %v2337_v45  ;;  %v2341_v35 = vsel %vm465_vm7, %v2337_v45, %v2339_v10  ;;  %v2056_v22 = vadd.f32 %v2053_v30, %v2048_v15 }
 0x3ac   : > { %v2345_v59 = vadd.f32 %v2340_v9, %v2323_v13  ;;  %v2346_v47 = vadd.f32 %v2341_v35, %v2324_v17  ;;  %v2058_v13 = vadd.f32 %v2055_v37, %v2050_v51 }
 0x3ae   : > { %v2359_v1 = vpop.permute.xlu0 %2358  ;;  %v2357_v41 = vpop.permute.xlu1 %2356 }
 0x3af   : > { %v2362_v24 = vsel %vm486_vm8, %v2357_v41, %v2359_v1 }
 0x3b0   : > { %v2367_v31 = vadd.f32 %v2362_v24, %v2345_v59  ;;  %v2371_v24 = vstv %s2804_s25  ;;  %s3005_s25 = scalar_lea.vmem %s3004_s26, 64 }
 0x3b1   : > { %v2373_v37 = vmul.f32 %v2371_v24, %v3359_v36  ;;  %p3007_p11 = scmp.lt.s32.totalorder %s3005_s25, %s2999_s24 }
 0x3b2   : > { %v2068_v60 = vpop.permute.xlu0 %2067  ;;  %v2361_v38 = vpop.permute.xlu1 %2360 }
 0x3b3   : > { %v2363_v19 = vsel %vm486_vm8, %v2359_v1, %v2361_v38  ;;  %v2369_v55 = vadd.f32 %v2361_v38, %v2347_v23  ;;  %v2374_v38 = vmul.f32 %v2371_v24, %v3355_v34  ;;  %p3008_p2 = por %p3007_p11, %p3006_p5 }
 0x3b4   : > { %v2368_v61 = vadd.f32 %v2363_v19, %v2346_v47  ;;  %v2372_v19 = vmul.f32 %v2371_v24, %v3347_v28 }
 0x3b5   : > { %v2377_v30 = vadd.f32 %v2374_v38, %v2369_v55  ;;  %v1596_v38 = vmul.f32 %v4186_v3, %v4710_v20  ;;  %p3009_p12 = pnand %p3008_p2, %p3002_p8 }
 0x3b6   : > { %v2072_v17 = vpop.permute.xlu0 %2071  ;;  %v2070_v39 = vpop.permute.xlu1 %2069 }
 0x3b7   : > { %v2080_v10 = vadd.f32 %v2072_v17, %v2058_v13  ;;  %v2073_v45 = vsel %vm381_vm3, %v2068_v60, %v2070_v39  ;;  %v2074_v9 = vsel %vm381_vm3, %v2070_v39, %v2072_v17  ;;  %v2375_v13 = vadd.f32 %v2372_v19, %v2367_v31 }
 0x3b8   : > { %v2078_v35 = vadd.f32 %v2073_v45, %v2056_v22  ;;  %v2079_v23 = vadd.f32 %v2074_v9, %v2057_v50  ;;  %v2376_v17 = vadd.f32 %v2373_v37, %v2368_v61  ;;  %v1615_v19 = vsel %vm381_vm3, %v4136_v0, %v4142_v4 }
 0x3b9   : > { %v1595_v37 = vmul.f32 %v4186_v3, %v3311_v2  ;;  %v1659_v0 = vsel %vm423_vm5, %v4156_v54, %v4162_v27 }
 0x3ba   : > { %v2092_v59 = vpop.permute.xlu0 %2091  ;;  %v2090_v1 = vpop.permute.xlu1 %2089 }
 0x3bb   : > { %v2095_v47 = vsel %vm402_vm4, %v2090_v1, %v2092_v59 }
 0x3bc   : > { %v4348_v41 = vadd.f32 %v2095_v47, %v2078_v35 }
 0x3be   : > { %v2387_v51 = vpop.permute.xlu0 %2386  ;;  %v2094_v25 = vpop.permute.xlu1 %2093 }
 0x3bf   : > { %v2096_v15 = vsel %vm402_vm4, %v2092_v59, %v2094_v25  ;;  %v4351_v14 = vadd.f32 %v2094_v25, %v2080_v10 }
 0x3c0   : > { %v4354_v60 = vadd.f32 %v2096_v15, %v2079_v23 }
 0x3c2   : > { %v2391_v43 = vpop.permute.xlu0 %2390  ;;  %v2389_v22 = vpop.permute.xlu1 %2388 }
 0x3c3   : > { %v4358_v50 = vadd.f32 %v2391_v43, %v2377_v30  ;;  %v2392_v39 = vsel %vm381_vm3, %v2387_v51, %v2389_v22  ;;  %v2393_v10 = vsel %vm381_vm3, %v2389_v22, %v2391_v43  ;;  %v1620_v22 = vadd.f32 %v1615_v19, %v1595_v37 }
 0x3c4   : > { %v4362_v45 = vadd.f32 %v2392_v39, %v2375_v13  ;;  %v4364_v9 = vadd.f32 %v2393_v10, %v2376_v17  ;;  %v1621_v13 = vadd.f32 %v4142_v4, %v1596_v38  ;;  %v1637_v17 = vsel %vm402_vm4, %v4150_v29, %v4148_v62 }
 0x3c5   : > { %v1642_v39 = vadd.f32 %v1637_v17, %v1620_v22  ;;  %v1681_v4 = vsel %vm444_vm6, %v4170_v40, %v4168_v53 }
 0x3c6   : > { %v4366_v35 = vpop.permute.xlu0 %2111  ;;  %v1819_v23 = vpop.permute.xlu1 %1818  ;;  %v1643_v20 = vadd.f32 %v4148_v62, %v1621_v13  ;;  %v1703_v62 = vsel %vm465_vm7, %v4176_v26, %v4182_v33 }
 0x3c7   : > { %v1664_v38 = vadd.f32 %v1659_v0, %v1642_v39 }
 0x3c8   : > { %v1665_v42 = vadd.f32 %v4162_v27, %v1643_v20  ;;  %v1725_v27 = vsel %vm486_vm8, %v4196_v21, %v4194_v8 }
 0x3c9   : > { %v1686_v19 = vadd.f32 %v1681_v4, %v1664_v38 }
 0x3ca   : > { %v4368_v59 = vpop.permute.xlu0 %2115  ;;  %v4370_v55 = vpop.permute.xlu1 %2113  ;;  %v1687_v29 = vadd.f32 %v4168_v53, %v1665_v42  ;;  %v1736_v42 = vmul.f32 %v4225_v44, %v3355_v34  ;;  %v1735_v53 = vmul.f32 %v4225_v44, %v3359_v36 }
 0x3cb   : > { %v1708_v17 = vadd.f32 %v1703_v62, %v1686_v19 }
 0x3cc   : > { %v1709_v13 = vadd.f32 %v4182_v33, %v1687_v29  ;;  %v1755_v33 = vsel %vm381_vm3, %v4207_v5, %v4217_v7 }
 0x3cd   : > { %v1730_v40 = vadd.f32 %v1725_v27, %v1708_v17 }
 0x3ce   : > { %v4372_v31 = vpop.permute.xlu0 %2410  ;;  %v4374_v61 = vpop.permute.xlu1 %2408  ;;  %v1731_v22 = vadd.f32 %v4194_v8, %v1709_v13  ;;  %v1777_v8 = vsel %vm402_vm4, %v4229_v56, %v4227_v32 }
 0x3cf   : > { %v1738_v39 = vadd.f32 %v1735_v53, %v1730_v40 }
 0x3d0   : > { %v1739_v26 = vadd.f32 %v1736_v42, %v1731_v22 }
 0x3d1   : > { %v1760_v29 = vadd.f32 %v1755_v33, %v1738_v39 }
 0x3d2   : > { %v1837_v1 = vpop.permute.xlu0 %1836  ;;  %v4376_v47 = vpop.permute.xlu1 %2412  ;;  %v1761_v38 = vadd.f32 %v4217_v7, %v1739_v26  ;;  %v1821_v7 = vsel %vm444_vm6, %v4256_v16, %v1819_v23 }
 0x3d3   : > { %v1782_v44 = vadd.f32 %v1777_v8, %v1760_v29 }
 0x3d4   : > { %v1783_v62 = vadd.f32 %v4227_v32, %v1761_v38 }
 0x3d5   : > { %v1804_v56 = vadd.f32 %v4252_v49, %v1782_v44 }
 0x3d6   : > { %v1841_v24 = vpop.permute.xlu0 %1840  ;;  %v1839_v51 = vpop.permute.xlu1 %1838  ;;  %v1805_v27 = vadd.f32 %v4245_v57, %v1783_v62  ;;  %v2118_v62 = vsel %vm423_vm5, %v4370_v55, %v4368_v59 }
 0x3d7   : > { %v1842_v34 = vsel %vm465_vm7, %v1837_v1, %v1839_v51  ;;  %v1843_v1 = vsel %vm465_vm7, %v1839_v51, %v1841_v24  ;;  %v1826_v32 = vadd.f32 %v1821_v7, %v1804_v56  ;;  %v2117_v51 = vsel %vm423_vm5, %v4366_v35, %v4370_v55 }
 0x3d8   : > { %v1847_v17 = vadd.f32 %v1842_v34, %v4262_v12  ;;  %v1827_v22 = vadd.f32 %v1819_v23, %v1805_v27  ;;  %v2122_v29 = vadd.f32 %v2117_v51, %v4348_v41  ;;  %v2124_v7 = vadd.f32 %v4368_v59, %v4351_v14 }
 0x3d9   : > { %v1848_v57 = vadd.f32 %v1843_v1, %v1826_v32  ;;  %v2123_v41 = vadd.f32 %v2118_v62, %v4354_v60  ;;  %v2415_v14 = vsel %vm402_vm4, %v4372_v31, %v4376_v47 }
 0x3da   : > { %v4378_v25 = vpop.permute.xlu0 %2135  ;;  %v4380_v15 = vpop.permute.xlu1 %2133 }
 0x3de   : > { %v4389_v30 = vpop.permute.xlu0 %2430  ;;  %v4391_v43 = vpop.permute.xlu1 %2137 }
 0x3df   : > { %v2146_v55 = vadd.f32 %v4391_v43, %v2124_v7 }
 0x3e2   : > { %v4401_v10 = vpop.permute.xlu0 %2434  ;;  %v4403_v3 = vpop.permute.xlu1 %2432 }
 0x3e3   : > { %v2436_v60 = vsel %vm423_vm5, %v4389_v30, %v4403_v3  ;;  %v2420_v30 = vadd.f32 %v2415_v14, %v4364_v9 }
 0x3e6   : > { %v1861_v54 = vpop.permute.xlu0 %1860  ;;  %v1859_v37 = vpop.permute.xlu1 %1858 }
 0x3e7   : > { %v1864_v19 = vsel %vm486_vm8, %v1859_v37, %v1861_v54  ;;  %v1849_v37 = vadd.f32 %v1841_v24, %v1827_v22  ;;  %v2139_v24 = vsel %vm444_vm6, %v4380_v15, %v4378_v25  ;;  %v2140_v15 = vsel %vm444_vm6, %v4378_v25, %v4391_v43 }
 0x3e8   : > { %v1869_v40 = vadd.f32 %v1864_v19, %v1847_v17  ;;  %v2144_v44 = vadd.f32 %v2139_v24, %v2122_v29  ;;  %v2145_v59 = vadd.f32 %v2140_v15, %v2123_v41  ;;  %v4715_v41 = vld [vmem:[#allocation23_spill] sm:$0xff] }
 0x3ea   : > { %v2156_v20 = vpop.permute.xlu0 %2155  ;;  %v1863_v0 = vpop.permute.xlu1 %1862 }
 0x3eb   : > { %v1865_v26 = vsel %vm486_vm8, %v1861_v54, %v1863_v0  ;;  %v1871_v39 = vadd.f32 %v1863_v0, %v1849_v37 }
 0x3ec   : > { %v1870_v16 = vadd.f32 %v1865_v26, %v1848_v57 }
 0x3ee   : > { %v2160_v4 = vpop.permute.xlu0 %2159  ;;  %v2158_v21 = vpop.permute.xlu1 %2157 }
 0x3ef   : > { %v2161_v34 = vsel %vm465_vm7, %v2156_v20, %v2158_v21  ;;  %v2414_v20 = vsel %vm402_vm4, %v4374_v61, %v4372_v31  ;;  %v2162_v56 = vsel %vm465_vm7, %v2158_v21, %v2160_v4  ;;  %v2168_v25 = vadd.f32 %v2160_v4, %v2146_v55 }
 0x3f0   : > { %v2166_v17 = vadd.f32 %v2161_v34, %v2144_v44  ;;  %v2419_v43 = vadd.f32 %v2414_v20, %v4362_v45  ;;  %v2437_v21 = vsel %vm423_vm5, %v4403_v3, %v4401_v10  ;;  %v4716_v20 = vld [vmem:[#allocation22_spill] sm:$0xff] }
 0x3f1   : > { %v383_v55 = vsel %vm381_vm3, %v4716_v20, %v4715_v41  ;;  %v4737_v41 = vld [vmem:[#allocation42_spill] sm:$0xff] }
 0x3f2   : > { %v4432_v13 = vpop.permute.xlu0 %2454  ;;  %v2453_v5 = vpop.permute.xlu1 %2452  ;;  %v2441_v4 = vadd.f32 %v2436_v60, %v2419_v43  ;;  %v4721_v43 = vld [vmem:[#allocation29_spill] sm:$0xff] }
 0x3f3   : > { %v2458_v31 = vsel %vm444_vm6, %v2453_v5, %v4432_v13 }
 0x3f6   : > { %v1884_v42 = vpop.permute.xlu0 %1883  ;;  %v4440_v53 = vpop.permute.xlu1 %2456 }
 0x3f7   : > { %v1892_v33 = vmul.f32 %v1884_v42, %v1869_v40  ;;  %v2459_v45 = vsel %vm444_vm6, %v4432_v13, %v4440_v53 }
 0x3f9   : > { %1898 = vrot.lane.b32.xlu1 %v1892_v33, %s3111_s4 }
 0x3fa   : > { %v2178_v12 = vpop.permute.xlu0 %2177  ;;  %v1886_v49 = vpop.permute.xlu1 %1885 }
 0x3fb   : > { %v1888_v23 = vsel %vm1887_vm12, %v1884_v42, %v1886_v49  ;;  %v1894_v38 = vmul.f32 %v1886_v49, %v1871_v39  ;;  %v2167_v42 = vadd.f32 %v2162_v56, %v2145_v59  ;;  %v2463_v49 = vadd.f32 %v2458_v31, %v2441_v4  ;;  %v4718_v59 = vld [vmem:[#allocation26_spill] sm:$0xff]  ;;  %v4725_v4 = vld [vmem:[#allocation31_spill] sm:$0xff] }
 0x3fc   : > { %v1893_v8 = vmul.f32 %v1888_v23, %v1870_v16  ;;  %v2421_v23 = vadd.f32 %v4376_v47, %v4358_v50 }
 0x3fd   : > { %1902 = vrot.lane.b32.xlu1 %v1894_v38, %s3111_s4 }
 0x3fe   : > { %v2182_v54 = vpop.permute.xlu0 %2181  ;;  %1900 = vrot.lane.b32.xlu0 %v1893_v8, %s3111_s4  ;;  %v2180_v0 = vpop.permute.xlu1 %2179  ;;  %v2443_v13 = vadd.f32 %v4401_v10, %v2421_v23 }
 0x3ff   : > { %v2183_v35 = vsel %vm486_vm8, %v2178_v12, %v2180_v0  ;;  %v2184_v32 = vsel %vm486_vm8, %v2180_v0, %v2182_v54  ;;  %v2190_v37 = vadd.f32 %v2182_v54, %v2168_v25  ;;  %v2442_v12 = vadd.f32 %v2437_v21, %v2420_v30  ;;  %v4720_v25 = vld [vmem:[#allocation24_spill] sm:$0xff] }
 0x400   : > { %v2188_v22 = vadd.f32 %v2183_v35, %v2166_v17  ;;  %v2189_v26 = vadd.f32 %v2184_v32, %v2167_v42  ;;  %v2465_v62 = vadd.f32 %v4440_v53, %v2443_v13  ;;  %v362_v17 = vstv %s361_s27  ;;  %v4717_v53 = vld [vmem:[#allocation21_spill] sm:$0xff]  ;;  %v4722_v42 = vld [vmem:[#allocation28_spill] sm:$0xff] }
 0x401   : > { %v2464_v38 = vadd.f32 %v2459_v45, %v2442_v12  ;;  %v382_v56 = vsel %vm381_vm3, %v4717_v53, %v4716_v20  ;;  %v363_v14 = vmul.f32 %v362_v17, %v3306_v63  ;;  %v425_v21 = vsel %vm423_vm5, %v4722_v42, %v4721_v43  ;;  %v4724_v30 = vld [vmem:[#allocation32_spill] sm:$0xff] }
 0x402   : > { %v2477_v19 = vpop.permute.xlu0 %2476  ;;  %v2475_v27 = vpop.permute.xlu1 %2474  ;;  %v4732_v13 = vld [vmem:[#allocation36_spill] sm:$0xff] }
 0x403   : > { %v2480_v39 = vsel %vm465_vm7, %v2475_v27, %v2477_v19  ;;  %v4738_v53 = vld [vmem:[#allocation44_spill] sm:$0xff] }
 0x404   : > { %v2485_v51 = vadd.f32 %v2480_v39, %v2463_v49 }
 0x406   : > { %v2203_v1 = vpop.permute.xlu0 %2202  ;;  %v2479_v40 = vpop.permute.xlu1 %2478 }
 0x407   : > { %v2211_v61 = vmul.f32 %v2203_v1, %v2188_v22  ;;  %v2481_v9 = vsel %vm465_vm7, %v2477_v19, %v2479_v40  ;;  %v2487_v35 = vadd.f32 %v2479_v40, %v2465_v62  ;;  %v364_v22 = vmul.f32 %v362_v17, %v3311_v2  ;;  %v4723_v2 = vld [vmem:[#allocation27_spill] sm:$0xff] }
 0x408   : > { %v2486_v29 = vadd.f32 %v2481_v9, %v2464_v38  ;;  %v424_v63 = vsel %vm423_vm5, %v4723_v2, %v4722_v42  ;;  %v4730_v38 = vld [vmem:[#allocation38_spill] sm:$0xff]  ;;  %v4736_v17 = vld [vmem:[#allocation43_spill] sm:$0xff]  ;;  %v4745_v2 = vld [vmem:[#allocation52_spill] sm:$0xff] }
 0x409   : > { %2217 = vrot.lane.b32.xlu0 %v2211_v61, %s3112_s20  ;;  %v387_v60 = vadd.f32 %v383_v55, %v364_v22  ;;  %v386_v61 = vadd.f32 %v382_v56, %v363_v14  ;;  %v533_v20 = vsel %vm402_vm4, %v4737_v41, %v4736_v17  ;;  %v4739_v56 = vld [vmem:[#allocation46_spill] sm:$0xff]  ;;  %v4740_v22 = vld [vmem:[#allocation45_spill] sm:$0xff] }
 0x40a   : > { %v2497_v33 = vpop.permute.xlu0 %2496  ;;  %v2205_v57 = vpop.permute.xlu1 %2204  ;;  %v553_v14 = vsel %vm423_vm5, %v4740_v22, %v4739_v56  ;;  %v4744_v42 = vld [vmem:[#allocation50_spill] sm:$0xff] }
 0x40b   : > { %v2207_v16 = vsel %vm2206_vm13, %v2203_v1, %v2205_v57  ;;  %v2213_v3 = vmul.f32 %v2205_v57, %v2190_v37  ;;  %v4719_v1 = vld [vmem:[#allocation25_spill] sm:$0xff]  ;;  %v4726_v57 = vld [vmem:[#allocation30_spill] sm:$0xff] }
 0x40c   : > { %v2212_v5 = vmul.f32 %v2207_v16, %v2189_v26  ;;  %v404_v40 = vsel %vm402_vm4, %v4719_v1, %v4718_v59  ;;  %v403_v32 = vsel %vm402_vm4, %v4720_v25, %v4719_v1  ;;  %v446_v26 = vsel %vm444_vm6, %v4725_v4, %v4724_v30  ;;  %v4727_v16 = vld [vmem:[#allocation35_spill] sm:$0xff]  ;;  %v4742_v25 = vld [vmem:[#allocation49_spill] sm:$0xff] }
 0x40d   : > { %2221 = vrot.lane.b32.xlu0 %v2213_v3, %s3112_s20  ;;  %v408_v31 = vadd.f32 %v404_v40, %v387_v60  ;;  %v407_v37 = vadd.f32 %v403_v32, %v386_v61  ;;  %v445_v45 = vsel %vm444_vm6, %v4726_v57, %v4725_v4  ;;  %v4728_v3 = vld [vmem:[#allocation34_spill] sm:$0xff]  ;;  %v4741_v1 = vld [vmem:[#allocation47_spill] sm:$0xff]  ;;  %v4743_v32 = vld [vmem:[#allocation48_spill] sm:$0xff] }
 0x40e   : > { %v2501_v8 = vpop.permute.xlu0 %2500  ;;  %2219 = vrot.lane.b32.xlu1 %v2212_v5, %s3112_s20  ;;  %v2499_v24 = vpop.permute.xlu1 %2498  ;;  %v467_v12 = vsel %vm465_vm7, %v4728_v3, %v4727_v16  ;;  %v4729_v5 = vld [vmem:[#allocation33_spill] sm:$0xff]  ;;  %v554_v40 = vsel %vm423_vm5, %v4739_v56, %v4741_v1  ;;  %v573_v61 = vsel %vm444_vm6, %v4743_v32, %v4742_v25  ;;  %v4748_v57 = vld [vmem:[#allocation55_spill] sm:$0xff]  ;;  %vm2542_vm5 = vcmask 998400  }
 0x40f   : > { %v2502_v54 = vsel %vm486_vm8, %v2497_v33, %v2499_v24  ;;  %v2503_v0 = vsel %vm486_vm8, %v2499_v24, %v2501_v8  ;;  %v2509_v15 = vadd.f32 %v2501_v8, %v2487_v35  ;;  %v429_v33 = vadd.f32 %v425_v21, %v408_v31  ;;  %v4734_v35 = vld [vmem:[#allocation39_spill] sm:$0xff]  ;;  %v4747_v4 = vld [vmem:[#allocation53_spill] sm:$0xff] }
 0x410   : > { %v2507_v34 = vadd.f32 %v2502_v54, %v2485_v51  ;;  %v2508_v50 = vadd.f32 %v2503_v0, %v2486_v29  ;;  %v428_v39 = vadd.f32 %v424_v63, %v407_v37  ;;  %v466_v23 = vsel %vm465_vm7, %v4729_v5, %v4728_v3  ;;  %v4731_v51 = vld [vmem:[#allocation37_spill] sm:$0xff]  ;;  %v4746_v63 = vld [vmem:[#allocation51_spill] sm:$0xff] }
 0x411   : > { %v450_v49 = vadd.f32 %v446_v26, %v429_v33  ;;  %v488_v8 = vsel %vm486_vm8, %v4731_v51, %v4730_v38  ;;  %v487_v54 = vsel %vm486_vm8, %v4732_v13, %v4731_v51  ;;  %v494_v29 = vstv %s2720_s6  ;;  %v619_v16 = vld [vmem:[#allocation8] ss:$8 sm:$0x3] }
 0x412   : > { %v2524_v47 = vpop.permute.xlu0 %2523  ;;  %v2522_v44 = vpop.permute.xlu1 %2521  ;;  %v449_v9 = vadd.f32 %v445_v45, %v428_v39  ;;  %v574_v21 = vsel %vm444_vm6, %v4742_v25, %v4744_v42  ;;  %v593_v37 = vsel %vm465_vm7, %v4746_v63, %v4745_v2  ;;  %v594_v26 = vsel %vm465_vm7, %v4745_v2, %v4747_v4  ;;  %v4749_v45 = vld [vmem:[#allocation54_spill] sm:$0xff] }
 0x413   : > { %v2526_v19 = vsel %vm2525_vm14, %v2522_v44, %v2524_v47  ;;  %v2530_v27 = vmul.f32 %v2522_v44, %v2507_v34  ;;  %v2532_v10 = vmul.f32 %v2524_v47, %v2509_v15  ;;  %v471_v24 = vadd.f32 %v467_v12, %v450_v49  ;;  %v4733_v44 = vld [vmem:[#allocation40_spill] sm:$0xff]  ;;  %v4735_v15 = vld [vmem:[#allocation41_spill] sm:$0xff] }
 0x414   : > { %v2531_v7 = vmul.f32 %v2526_v19, %v2508_v50  ;;  %v470_v0 = vadd.f32 %v466_v23, %v449_v9  ;;  %v496_v50 = vmul.f32 %v494_v29, %v3359_v36  ;;  %v495_v47 = vmul.f32 %v494_v29, %v3347_v28  ;;  %v4750_v12 = vld [vmem:[#allocation56_spill] sm:$0xff] }
 0x415   : > { %2536 = vrot.lane.b32.xlu1 %v2530_v27, %s3113_s22  ;;  %v492_v34 = vadd.f32 %v488_v8, %v471_v24  ;;  %v513_v19 = vsel %vm381_vm3, %v4734_v35, %v4733_v44  ;;  %v534_v36 = vsel %vm402_vm4, %v4736_v17, %v4738_v53  ;;  %v613_v39 = vsel %vm486_vm8, %v4749_v45, %v4748_v57 }
 0x416   : > { %2538 = vrot.lane.b32.xlu0 %v2531_v7, %s3113_s22  ;;  %v491_v62 = vadd.f32 %v487_v54, %v470_v0  ;;  %v614_v49 = vsel %vm486_vm8, %v4748_v57, %v4750_v12  ;;  %v624_v38 = vrot.slane %v619_v16, %v4708_v6  ;;  %v628_v8 = vrot.slane %v619_v16, %v4709_v52  ;;  %v4751_v52 = vld [vmem:[#allocation20_spill] sm:$0xff] }
 0x417   : > { %v498_v27 = vadd.f32 %v496_v50, %v492_v34  ;;  %v948_v13 = vsel %vm947_vm15, %v3970_v18, %v3975_v48  ;;  %v949_v0 = vsel %vm947_vm15, %v3975_v48, %v3958_v46  ;;  %v1267_v6 = vsel %vm1266_vm0, %v3981_v11, %v3978_v58 }
 0x418   : > { %v497_v7 = vadd.f32 %v495_v47, %v491_v62  ;;  %vm2223_vm4 = vcmask 1006592  }
 0x419   : > { %2540 = vrot.lane.b32.xlu1 %v2532_v10, %s3113_s22  ;;  %v514_v10 = vsel %vm381_vm3, %v4733_v44, %v4735_v15  ;;  %vm1904_vm3 = vcmask 1014784   ;;  %v4752_v44 = vld [vmem:[#allocation18_spill] sm:$0xff] }
 0x41a   : > { %v517_v55 = vadd.f32 %v513_v19, %v497_v7  ;;  %v518_v28 = vadd.f32 %v514_v10, %v498_v27  ;;  %v1586_v35 = vsel %vm1585_vm2, %v4752_v44, %v4751_v52  ;;  %v4753_v19 = vld [vmem:[#allocation57_spill] sm:$0xff] }
 0x41b   : > { %v1268_v18 = vsel %vm1266_vm0, %v3978_v58, %v4753_v19  ;;  %v4754_v7 = vld [vmem:[#allocation17_spill] sm:$0xff] }
 0x41c   : > { %v537_v59 = vadd.f32 %v533_v20, %v517_v55  ;;  %v538_v60 = vadd.f32 %v534_v36, %v518_v28  ;;  %v1587_v15 = vsel %vm1585_vm2, %v4751_v52, %v4754_v7 }
 0x41e   : > { %v557_v43 = vadd.f32 %v553_v14, %v537_v59  ;;  %v558_v31 = vadd.f32 %v554_v40, %v538_v60 }
 0x420   : > { %v577_v30 = vadd.f32 %v573_v61, %v557_v43  ;;  %v578_v33 = vadd.f32 %v574_v21, %v558_v31 }
 0x422   : > { %v597_v3 = vadd.f32 %v593_v37, %v577_v30  ;;  %v598_v23 = vadd.f32 %v594_v26, %v578_v33  ;;  %v4755_v30 = vld [vmem:[#allocation19_spill] sm:$0xff] }
 0x424   : > { %v617_v9 = vadd.f32 %v613_v39, %v597_v3  ;;  %v618_v24 = vadd.f32 %v614_v49, %v598_v23 }
 0x426   : > { %v631_v54 = vmul.f32 %v624_v38, %v617_v9  ;;  %v632_v62 = vmul.f32 %v628_v8, %v618_v24 }
 0x428   : > { %v952_v50 = vadd.f32 %v948_v13, %v631_v54  ;;  %v953_v47 = vadd.f32 %v949_v0, %v632_v62 }
 0x42a   : > { %v1271_v27 = vadd.f32 %v1267_v6, %v952_v50  ;;  %v1272_v41 = vadd.f32 %v1268_v18, %v953_v47 }
 0x42c   : > { %v1590_v10 = vadd.f32 %v1586_v35, %v1271_v27  ;;  %v1591_v53 = vadd.f32 %v1587_v15, %v1272_v41 }
 0x46b   : > { %v1899_v5 = vpop.permute.xlu1 %1898 }
 0x46f   : > { %v1903_v29 = vpop.permute.xlu1 %1902 }
 0x470   : > { %v1901_v51 = vpop.permute.xlu0 %1900 }
 0x471   : > { %v1905_v48 = vsel %vm1904_vm3, %v1899_v5, %v1901_v51  ;;  %v1906_v20 = vsel %vm1904_vm3, %v1901_v51, %v1903_v29 }
 0x472   : > { %v1909_v55 = vadd.f32 %v1905_v48, %v1590_v10  ;;  %v1910_v58 = vadd.f32 %v1906_v20, %v1591_v53 }
 0x47b   : > { %v2218_v34 = vpop.permute.xlu0 %2217 }
 0x47f   : > { %v2222_v17 = vpop.permute.xlu0 %2221 }
 0x480   : > { %v2220_v46 = vpop.permute.xlu1 %2219 }
 0x481   : > { %v2224_v11 = vsel %vm2223_vm4, %v2218_v34, %v2220_v46  ;;  %v2225_v28 = vsel %vm2223_vm4, %v2220_v46, %v2222_v17 }
 0x482   : > { %v2228_v56 = vadd.f32 %v2224_v11, %v1909_v55  ;;  %v2229_v1 = vadd.f32 %v2225_v28, %v1910_v58 }
 0x487   : > { %v2537_v36 = vpop.permute.xlu1 %2536 }
 0x488   : > { %v2539_v22 = vpop.permute.xlu0 %2538 }
 0x489   : > { %v2543_v14 = vsel %vm2542_vm5, %v2537_v36, %v2539_v22 }
 0x48a   : > { %v2547_v59 = vadd.f32 %v2543_v14, %v2228_v56 }
 0x48b   : > { %v2541_v40 = vpop.permute.xlu1 %2540 }
 0x48c   : > { %v2811_v60 = vmul.f32 -1.442695, %v2547_v59  ;;  %v2544_v25 = vsel %vm2542_vm5, %v2539_v22, %v2541_v40 }
 0x48d   : > { %v2548_v32 = vadd.f32 %v2544_v25, %v2229_v1 }
 0x48e   : > { %2926 = vpow2.f32 %v2811_v60 }
 0x48f   : > { %v2812_v61 = vmul.f32 -1.442695, %v2548_v32 }
 0x491   : > { %2928 = vpow2.f32 %v2812_v61 }
 0x49b   : > { %v2927_v43 = vpop.eup %2926 }
 0x49c   : > { %v2555_v42 = vadd.f32 1.0, %v2927_v43 }
 0x49e   : > { %v2929_v21 = vpop.eup %2928  ;;  %2930 = vrcp.f32 %v2555_v42 }
 0x49f   : > { %v2556_v31 = vadd.f32 1.0, %v2929_v21 }
 0x4a1   : > { %2932 = vrcp.f32 %v2556_v31 }
 0x4ab   : > { %v2931_v2 = vpop.eup %2930 }
 0x4ae   : > { %v2933_v63 = vpop.eup %2932 }
 0x4af   : > { %v2563_v37 = vcombine.low %v2931_v2, %v2933_v63 }
 0x4b1   : > { %v2570_v4 = vrot.slane %v2563_v37, %v4755_v30 }
 0x4b3   : > { %v2577_v26 = vrot.slane %v2570_v4, %v4755_v30 }
 0x4b5   : > { %2579 = vst.msk [vmem:[%s227_s7] sm:$0x3] %vm3271_vm1, %v2577_v26 }
 0x4b6   : > { %3012 = shalt.err (!%p3009_p12)
}
 0x4b7   : > { %s3013_s4 = scalar_lea.hbm %s2593_s9, 32  ;;  %s3017_s22 = scalar_lea.hbm %s4629_s3, 64 }
 0x4b8   : > { %p3014_p7 = scmp.ne.s32.totalorder %s2593_s9, %s3013_s4  ;;  %p3018_p9 = scmp.lt.s32.totalorder %s2593_s9, %s4629_s3 }
 0x4b9   : > { %p3019_p13 = scmp.lt.s32.totalorder %s3017_s22, %s3013_s4 }
 0x4ba   : > { %p3015_p10 = pnand %p3014_p7, %p3231_p0 }
 0x4bb   : > { %p3020_p3 = por %p3019_p13, %p3018_p9 }
 0x4bc   : > { %p3016_p6 = pneg %p3015_p10 }
 0x4be   : > { %p3021_p1 = pnand %p3020_p3, %p3016_p6 }
 0x4c0   : > { %3024 = shalt.err (!%p3021_p1)
}
 0x4c1   : > { %2830 = dma.vmem_to_hbm [thread:$0]  (%p3231_p0), %s2596_s5, 32, %s2593_s9, %s2581_s10  }
 0x4c2 PF: > { %s2607_s29 = sand.u32 1, %s3067_s12   ;;  %p4757_p4 = scmp.ne.s32.totalorder %s4657_s23, 0 }
 0x4c3   : > { %p4758_p8 = scmp.ge.s32.totalorder %s3087_s17, 2  ;;  %s2608_s30 = scalar_lea.sflag [#allocation6], %s2607_s29 }
 0x4c5   : > { %p2844_p5 = pnand %p4758_p8, %p4757_p4 }
 0x4c7   : > { %p2845_p11 = pneg %p2844_p5 }
 0x4c9   : > { %3062 = dma.done.wait (%p2845_p11), %s2608_s30, 32  }
 0x4ca   : > { %3064 = vsyncadd (%p2845_p11), %s2608_s30, 4294967264  ;;  %s21_s17 = sadd.s32 1, %s3087_s17   ;;  %s4759_s12 = smov %s3071_s13 }
 0x4cb   : > { %p18_p2 = scmp.ge.s32.totalorder %s21_s17, 4   ;;  %s4760_s13 = smov %s3075_s14 }
 0x4cc   : > { %s4761_s14 = smov %s3237_s18  ;;  %s4762_s15 = smov %s3083_s16 }
 0x4cd   : > { %s4763_s16 = smov %s4765_s28  ;;  %20 = sbr.rel (!%p18_p2) target bundleno = 8 (0x8), region = 101 }
 0x4d2   :  { %2613 = vsyncpa [#allocation5], 1 }
 0x4d3   :  { %2615 = vsyncpa [#allocation5 + $0x1], 1 }
 0x4d4   :  { %2616 = vsyncpa [#allocation10], 1 }
 0x4d5   :  { %2618 = vsyncpa [#allocation10 + $0x1], 1 }
 0x4d6   :  { %2619 = vsyncpa [#allocation6], 1 }
 0x4d7   :  { %2621 = vsyncpa [#allocation6 + $0x1], 1 }
 0x4d8   :  { %2622 = vsyncpa [#allocation7], 1 }
 0x4d9   :  { %2624 = vsyncpa [#allocation7 + $0x1], 1 }

</bundles_post_ra>
